<compile_context>
chip_gen: v7x
topology: tpu7x:2x2x1
jax: 0.10.0
libtpu: 0.0.40
codegen_flags: <defaults>
</compile_context>

<pallas_src>
import functools

import jax
import jax.numpy as jnp
from jax.experimental import pallas as pl
from jax.experimental.pallas import tpu as pltpu


def _fused_add_conv1x1_bn_kernel(a_ref, b_ref, w_ref, gamma_ref, beta_ref, o_ref, *, eps, inv_m):
    # a_ref, b_ref: (Cin, M)   w_ref: (Cout, Cin)   gamma/beta: (Cout, 1)   o_ref: (Cout, M)
    x = a_ref[...] + b_ref[...]                                       # elementwise add (VPU)
    y = jnp.dot(w_ref[...], x, preferred_element_type=jnp.float32)    # 1x1 conv == matmul (MXU)

    # Per-channel batch statistics (reduce over M = N*H*W) in one traversal of y.
    s1 = jnp.sum(y, axis=1, keepdims=True)                            # (Cout, 1)
    s2 = jnp.sum(y * y, axis=1, keepdims=True)                        # (Cout, 1)
    mean = s1 * inv_m
    var = s2 * inv_m - mean * mean                                    # biased variance (train-mode BN)
    inv_std = jax.lax.rsqrt(var + eps)

    # Fold BN into a single per-channel scale/bias -> one FMA-style pass over (Cout, M).
    scale = gamma_ref[...] * inv_std                                  # (Cout, 1)
    bias = beta_ref[...] - mean * scale                               # (Cout, 1)
    o_ref[...] = (y * scale + bias).astype(o_ref.dtype)


def fused_add_conv1x1_bn(x103, x88, weight, gamma, beta, eps=1e-5):
    """x103, x88: (N, Cin, H, W) f32.  weight: (Cout, Cin) (PyTorch conv weight, kernel dims squeezed).
    Returns (N, Cout, H, W) f32 (train-mode BN, batch statistics)."""
    N, Cin, H, W = x103.shape
    Cout = weight.shape[0]
    M = N * H * W

    # Channels-first compute layout.  For N == 1 these are pure reshapes (bitcasts),
    # i.e. no transpose / extra HBM round trip.
    if N == 1:
        a2d = x103.reshape(Cin, M)
        b2d = x88.reshape(Cin, M)
    else:
        a2d = jnp.transpose(x103, (1, 0, 2, 3)).reshape(Cin, M)
        b2d = jnp.transpose(x88, (1, 0, 2, 3)).reshape(Cin, M)

    gamma2d = gamma.reshape(Cout, 1)
    beta2d = beta.reshape(Cout, 1)

    kernel = functools.partial(_fused_add_conv1x1_bn_kernel, eps=eps, inv_m=1.0 / M)
    cost = pl.CostEstimate(
        flops=2 * M * Cin * Cout + M * Cin + 6 * M * Cout,
        transcendentals=Cout,
        bytes_accessed=4 * (2 * M * Cin + Cout * Cin + 2 * Cout + M * Cout),
    )

    out2d = pl.pallas_call(
        kernel,
        out_shape=jax.ShapeDtypeStruct((Cout, M), jnp.float32),
        in_specs=[
            pl.BlockSpec(memory_space=pltpu.MemorySpace.VMEM),  # a     (Cin, M)
            pl.BlockSpec(memory_space=pltpu.MemorySpace.VMEM),  # b     (Cin, M)
            pl.BlockSpec(memory_space=pltpu.MemorySpace.VMEM),  # W     (Cout, Cin)
            pl.BlockSpec(memory_space=pltpu.MemorySpace.VMEM),  # gamma (Cout, 1)
            pl.BlockSpec(memory_space=pltpu.MemorySpace.VMEM),  # beta  (Cout, 1)
        ],
        out_specs=pl.BlockSpec(memory_space=pltpu.MemorySpace.VMEM),
        cost_estimate=cost,
    )(a2d, b2d, weight, gamma2d, beta2d)

    # (Cout, M) -> NCHW.  Pure reshape for N == 1.
    if N == 1:
        return out2d.reshape(1, Cout, H, W)
    return jnp.transpose(out2d.reshape(Cout, N, H, W), (1, 0, 2, 3))
    # TODO(synk): running_mean/running_var momentum update is a module-state side effect,
    # not part of the forward output, so it is not materialized here.


def _reference(x103, x88, weight, gamma, beta, eps=1e-5):
    x = x103 + x88
    # 1x1 conv, no bias: (N, Cin, H, W) x (Cout, Cin) -> (N, Cout, H, W)
    y = jnp.einsum("nchw,oc->nohw", x, weight)
    mean = jnp.mean(y, axis=(0, 2, 3), keepdims=True)
    var = jnp.mean((y - mean) ** 2, axis=(0, 2, 3), keepdims=True)
    return (y - mean) / jnp.sqrt(var + eps) * gamma.reshape(1, -1, 1, 1) + beta.reshape(1, -1, 1, 1)


if __name__ == "__main__":
    key = jax.random.PRNGKey(0)
    k1, k2, k3 = jax.random.split(key, 3)

    # Shapes from the module spec (already small): x103/x88 (1, 80, 14, 14), Conv2d(80 -> 480, 1x1).
    N, Cin, H, W = 1, 80, 14, 14
    Cout = 480

    x103 = jax.random.normal(k1, (N, Cin, H, W), dtype=jnp.float32)
    x88 = jax.random.normal(k2, (N, Cin, H, W), dtype=jnp.float32)

    # Conv2d(80, 480, kernel_size=1, bias=False) weight in PyTorch layout (Cout, Cin).
    weight = jax.random.normal(k3, (Cout, Cin), dtype=jnp.float32) * 0.05
    # BatchNorm2d(480) default init: gamma=1, beta=0; module is in train mode -> batch stats.
    gamma = jnp.ones((Cout,), dtype=jnp.float32)
    beta = jnp.zeros((Cout,), dtype=jnp.float32)

    out = fused_add_conv1x1_bn(x103, x88, weight, gamma, beta)
    out = jax.block_until_ready(out)

    ref = _reference(x103, x88, weight, gamma, beta)
    assert out.shape == (N, Cout, H, W)
    assert jnp.allclose(out, ref, rtol=1e-4, atol=1e-4), "mismatch vs reference"

    print("KERNEL_OK")
</pallas_src>

<mosaic_0001>
module attributes {stable_mosaic.version = 11 : i64} {
  func.func @_fused_add_conv1x1_bn_kernel(%arg0: memref<80x196xf32, #tpu.memory_space<vmem>>, %arg1: memref<80x196xf32, #tpu.memory_space<vmem>>, %arg2: memref<480x80xf32, #tpu.memory_space<vmem>>, %arg3: memref<480x1xf32, #tpu.memory_space<vmem>>, %arg4: memref<480x1xf32, #tpu.memory_space<vmem>>, %arg5: memref<480x196xf32, #tpu.memory_space<vmem>>) attributes {dimension_semantics = [], scalar_prefetch = 0 : i64, scratch_operands = 0 : i64, tpu.core_type = #tpu.core_type<tc>} {
    %c0 = arith.constant 0 : index
    %c0_0 = arith.constant 0 : index
    %0 = vector.load %arg0[%c0, %c0_0] : memref<80x196xf32, #tpu.memory_space<vmem>>, vector<80x196xf32>
    %c0_1 = arith.constant 0 : index
    %c0_2 = arith.constant 0 : index
    %1 = vector.load %arg1[%c0_1, %c0_2] : memref<80x196xf32, #tpu.memory_space<vmem>>, vector<80x196xf32>
    %2 = arith.addf %0, %1 : vector<80x196xf32>
    %c0_3 = arith.constant 0 : index
    %c0_4 = arith.constant 0 : index
    %3 = vector.load %arg2[%c0_3, %c0_4] : memref<480x80xf32, #tpu.memory_space<vmem>>, vector<480x80xf32>
    %cst = arith.constant dense<0.000000e+00> : vector<480x196xf32>
    %4 = tpu.matmul %3, %2, %cst {dimension_numbers = #tpu.dot_dimension_numbers<[1], [0], [0], [1], [0, 0, 1, 1], [], []>} : vector<480x80xf32>, vector<80x196xf32>, vector<480x196xf32> -> vector<480x196xf32>
    %cst_5 = arith.constant dense<0.000000e+00> : vector<480xf32>
    %5 = vector.multi_reduction <add>, %4, %cst_5 [1] : vector<480x196xf32> to vector<480xf32>
    %6 = vector.shape_cast %5 : vector<480xf32> to vector<480x1xf32>
    %7 = arith.mulf %4, %4 : vector<480x196xf32>
    %cst_6 = arith.constant dense<0.000000e+00> : vector<480xf32>
    %8 = vector.multi_reduction <add>, %7, %cst_6 [1] : vector<480x196xf32> to vector<480xf32>
    %9 = vector.shape_cast %8 : vector<480xf32> to vector<480x1xf32>
    %cst_7 = arith.constant 0.00510204071 : f32
    %10 = vector.broadcast %cst_7 : f32 to vector<480x1xf32>
    %11 = arith.mulf %6, %10 : vector<480x1xf32>
    %cst_8 = arith.constant 0.00510204071 : f32
    %12 = vector.broadcast %cst_8 : f32 to vector<480x1xf32>
    %13 = arith.mulf %9, %12 : vector<480x1xf32>
    %14 = arith.mulf %11, %11 : vector<480x1xf32>
    %15 = arith.subf %13, %14 : vector<480x1xf32>
    %cst_9 = arith.constant 9.99999974E-6 : f32
    %16 = vector.broadcast %cst_9 : f32 to vector<480x1xf32>
    %17 = arith.addf %15, %16 : vector<480x1xf32>
    %18 = math.rsqrt %17 : vector<480x1xf32>
    %c0_10 = arith.constant 0 : index
    %c0_11 = arith.constant 0 : index
    %19 = vector.load %arg3[%c0_10, %c0_11] : memref<480x1xf32, #tpu.memory_space<vmem>>, vector<480x1xf32>
    %20 = arith.mulf %19, %18 : vector<480x1xf32>
    %c0_12 = arith.constant 0 : index
    %c0_13 = arith.constant 0 : index
    %21 = vector.load %arg4[%c0_12, %c0_13] : memref<480x1xf32, #tpu.memory_space<vmem>>, vector<480x1xf32>
    %22 = arith.mulf %11, %20 : vector<480x1xf32>
    %23 = arith.subf %21, %22 : vector<480x1xf32>
    %24 = vector.broadcast %20 : vector<480x1xf32> to vector<480x196xf32>
    %25 = arith.mulf %4, %24 : vector<480x196xf32>
    %26 = vector.broadcast %23 : vector<480x1xf32> to vector<480x196xf32>
    %27 = arith.addf %25, %26 : vector<480x196xf32>
    %c0_14 = arith.constant 0 : index
    %c0_15 = arith.constant 0 : index
    %28 = vector.load %arg5[%c0_14, %c0_15] : memref<480x196xf32, #tpu.memory_space<vmem>>, vector<480x196xf32>
    tpu.vector_store %arg5[%c0_14, %c0_15], %27 {strides = array<i32>} : memref<480x196xf32, #tpu.memory_space<vmem>>, vector<480x196xf32>,
    return
  }
}

</mosaic_0001>

<bundles_post_ra>
// kernel: tpu_custom_call.1
= control target key start
LH: loop header
LB: loop body
LE: loop exit
PB: predicated region body
PF: predicated region fallthrough
CT: control target
= control target key end

     0   :  { %v3185_v3 = vmov 0.0   ;;  %vm140_vm0 = vcmask 654336   ;;  %vm746_vm1 = vcmask 556032   ;;  %s6251_s0 = inlined_call_operand.vmem [shape: f32[80,196], index: 0, kind: input, shape index: {}]   ;;  %s6252_s1 = inlined_call_operand.vmem [shape: f32[80,196], index: 1, kind: input, shape index: {}]   ;;  %s6253_s2 = inlined_call_operand.vmem [shape: f32[480,80], index: 2, kind: input, shape index: {}]   ;;  %s6254_s3 = inlined_call_operand.vmem [shape: f32[480,1], index: 3, kind: input, shape index: {}]   ;;  %s6255_s4 = inlined_call_operand.vmem [shape: f32[480,1], index: 4, kind: input, shape index: {}]   ;;  %s6256_s5 = inlined_call_operand.vmem [shape: f32[480,196], index: 5, kind: output, shape index: {}]  }
   0x1   :  { %v21_v0 = vld [vmem:[%s6251_s0 + $0x8] sm:$0xff]  ;;  %v23_v1 = vld [vmem:[%s6251_s0 + $0x18] sm:$0xff]  ;;  %385 = vmatprep.mubr.f32.mxu0 %v3185_v3  ;;  %565 = vmatprep.mubr.f32.mxu1 %v3185_v3  ;;  %v20_v6 = vld [vmem:[%s6251_s0] sm:$0xff] }
   0x2   :  { %v41_v2 = vld [vmem:[%s6252_s1 + $0x8] sm:$0xff]  ;;  %v43_v4 = vld [vmem:[%s6252_s1 + $0x18] sm:$0xff]  ;;  %v22_v7 = vld [vmem:[%s6251_s0 + $0x10] sm:$0xff] }
   0x3   :  { %v61_v5 = vadd.f32 %v41_v2, %v21_v0  ;;  %v63_v8 = vadd.f32 %v43_v4, %v23_v1  ;;  %v40_v9 = vld [vmem:[%s6252_s1] sm:$0xff]  ;;  %v42_v10 = vld [vmem:[%s6252_s1 + $0x10] sm:$0xff]  ;;  %v25_v11 = vld [vmem:[%s6251_s0 + $0x28] sm:$0xff] }
   0x4   :  { %v60_v12 = vadd.f32 %v40_v9, %v20_v6  ;;  %v62_v13 = vadd.f32 %v42_v10, %v22_v7  ;;  %v27_v14 = vld [vmem:[%s6251_s0 + $0x38] sm:$0xff]  ;;  %v45_v15 = vld [vmem:[%s6252_s1 + $0x28] sm:$0xff]  ;;  %v24_v20 = vld [vmem:[%s6251_s0 + $0x20] sm:$0xff] }
   0x5   :  { %v47_v16 = vld [vmem:[%s6252_s1 + $0x38] sm:$0xff]  ;;  %v3031_v17 = vpack.c.bf16 %v63_v8, %v61_v5  ;;  %v65_v18 = vadd.f32 %v45_v15, %v25_v11  ;;  %v26_v21 = vld [vmem:[%s6251_s0 + $0x30] sm:$0xff]  ;;  %v44_v22 = vld [vmem:[%s6252_s1 + $0x20] sm:$0xff] }
   0x6   :  { %v67_v19 = vadd.f32 %v47_v16, %v27_v14  ;;  %v3033_v23 = vpack.c.bf16 %v62_v13, %v60_v12  ;;  %v46_v24 = vld [vmem:[%s6252_s1 + $0x30] sm:$0xff]  ;;  %v64_v25 = vadd.f32 %v44_v22, %v24_v20  ;;  %v29_v26 = vld [vmem:[%s6251_s0 + $0x48] sm:$0xff]  ;;  %v31_v27 = vld [vmem:[%s6251_s0 + $0x58] sm:$0xff] }
   0x7   :  { %3032 = vmatprep.subr.bf16.mxu0 %v3031_v17  ;;  %3051 = vmatprep.subr.bf16.mxu1 %v3031_v17  ;;  %v66_v29 = vadd.f32 %v46_v24, %v26_v21  ;;  %v49_v30 = vld [vmem:[%s6252_s1 + $0x48] sm:$0xff]  ;;  %v51_v31 = vld [vmem:[%s6252_s1 + $0x58] sm:$0xff]  ;;  %v28_v32 = vld [vmem:[%s6251_s0 + $0x40] sm:$0xff] }
   0x8   :  { %v3035_v28 = vpack.c.bf16 %v67_v19, %v65_v18  ;;  %3034 = vmatpush1.bf16.msra.mxu0 %v3033_v23  ;;  %3056 = vmatpush1.bf16.msra.mxu1 %v3033_v23  ;;  %v69_v33 = vadd.f32 %v49_v30, %v29_v26  ;;  %v71_v34 = vadd.f32 %v51_v31, %v31_v27  ;;  %v30_v35 = vld [vmem:[%s6251_s0 + $0x50] sm:$0xff]  ;;  %v48_v36 = vld [vmem:[%s6252_s1 + $0x40] sm:$0xff]  ;;  %v33_v41 = vld [vmem:[%s6251_s0 + $0x68] sm:$0xff] }
   0x9   :  { %v50_v37 = vld [vmem:[%s6252_s1 + $0x50] sm:$0xff]  ;;  %v3037_v38 = vpack.c.bf16 %v66_v29, %v64_v25  ;;  %v68_v39 = vadd.f32 %v48_v36, %v28_v32  ;;  %v35_v42 = vld [vmem:[%s6251_s0 + $0x78] sm:$0xff]  ;;  %v53_v43 = vld [vmem:[%s6252_s1 + $0x68] sm:$0xff] }
   0xa   :  { %3036 = vmatprep.subr.bf16.mxu0 %v3035_v28  ;;  %3052 = vmatprep.subr.bf16.mxu1 %v3035_v28  ;;  %v70_v40 = vadd.f32 %v50_v37, %v30_v35  ;;  %v3039_v44 = vpack.c.bf16 %v71_v34, %v69_v33  ;;  %v55_v45 = vld [vmem:[%s6252_s1 + $0x78] sm:$0xff]  ;;  %v73_v46 = vadd.f32 %v53_v43, %v33_v41  ;;  %v32_v47 = vld [vmem:[%s6251_s0 + $0x60] sm:$0xff]  ;;  %v34_v48 = vld [vmem:[%s6251_s0 + $0x70] sm:$0xff] }
   0xb   :  { %v75_v49 = vadd.f32 %v55_v45, %v35_v42  ;;  %v52_v50 = vld [vmem:[%s6252_s1 + $0x60] sm:$0xff]  ;;  %v54_v51 = vld [vmem:[%s6252_s1 + $0x70] sm:$0xff]  ;;  %v37_v52 = vld [vmem:[%s6251_s0 + $0x88] sm:$0xff] }
   0xc   :  { %3038 = vmatpush1.bf16.msra.mxu0 %v3037_v38  ;;  %3057 = vmatpush1.bf16.msra.mxu1 %v3037_v38  ;;  %v3041_v53 = vpack.c.bf16 %v70_v40, %v68_v39  ;;  %v72_v54 = vadd.f32 %v52_v50, %v32_v47  ;;  %v74_v55 = vadd.f32 %v54_v51, %v34_v48  ;;  %v39_v56 = vld [vmem:[%s6251_s0 + $0x98] sm:$0xff]  ;;  %v57_v57 = vld [vmem:[%s6252_s1 + $0x88] sm:$0xff]  ;;  %v36_v62 = vld [vmem:[%s6251_s0 + $0x80] sm:$0xff] }
   0xd   :  { %v59_v58 = vld [vmem:[%s6252_s1 + $0x98] sm:$0xff]  ;;  %3040 = vmatprep.subr.bf16.mxu0 %v3039_v44  ;;  %3053 = vmatprep.subr.bf16.mxu1 %v3039_v44  ;;  %v3043_v59 = vpack.c.bf16 %v75_v49, %v73_v46  ;;  %v77_v60 = vadd.f32 %v57_v57, %v37_v52  ;;  %v38_v63 = vld [vmem:[%s6251_s0 + $0x90] sm:$0xff]  ;;  %v56_v0 = vld [vmem:[%s6252_s1 + $0x80] sm:$0xff] }
   0xe   :  { %v79_v61 = vadd.f32 %v59_v58, %v39_v56  ;;  %v58_v1 = vld [vmem:[%s6252_s1 + $0x90] sm:$0xff]  ;;  %v3045_v2 = vpack.c.bf16 %v74_v55, %v72_v54  ;;  %v76_v4 = vadd.f32 %v56_v0, %v36_v62  ;;  %v80_v8 = vld [vmem:[%s6253_s2] sm:$0xff]  ;;  %v81_v10 = vld [vmem:[%s6253_s2 + $0x8] sm:$0xff] }
   0xf   :  { %v78_v5 = vadd.f32 %v58_v1, %v38_v63  ;;  %v110_v9 = vld [vmem:[%s6253_s2 + $0xf0] sm:$0xff]  ;;  %v111_v11 = vld [vmem:[%s6253_s2 + $0xf8] sm:$0xff]  ;;  %v112_v13 = vld [vmem:[%s6253_s2 + $0x100] sm:$0xff] }
  0x10   :  { %3042 = vmatpush1.bf16.msra.mxu0 %v3041_v53  ;;  %3058 = vmatpush1.bf16.msra.mxu1 %v3041_v53  ;;  %v3047_v6 = vpack.c.bf16 %v79_v61, %v77_v60  ;;  %v82_v12 = vld [vmem:[%s6253_s2 + $0x10] sm:$0xff]  ;;  %v83_v14 = vld [vmem:[%s6253_s2 + $0x18] sm:$0xff]  ;;  %v113_v15 = vld [vmem:[%s6253_s2 + $0x108] sm:$0xff] }
  0x11   :  { %3044 = vmatprep.subr.bf16.mxu0 %v3043_v59  ;;  %3054 = vmatprep.subr.bf16.mxu1 %v3043_v59  ;;  %v3049_v7 = vpack.c.bf16 %v78_v5, %v76_v4  ;;  %v84_v16 = vld [vmem:[%s6253_s2 + $0x20] sm:$0xff]  ;;  %v114_v17 = vld [vmem:[%s6253_s2 + $0x110] sm:$0xff]  ;;  %v85_v18 = vld [vmem:[%s6253_s2 + $0x28] sm:$0xff] }
  0x12   :  { %v115_v19 = vld [vmem:[%s6253_s2 + $0x118] sm:$0xff]  ;;  %v86_v20 = vld [vmem:[%s6253_s2 + $0x30] sm:$0xff]  ;;  %v116_v21 = vld [vmem:[%s6253_s2 + $0x120] sm:$0xff] }
  0x13   :  { %v87_v22 = vld [vmem:[%s6253_s2 + $0x38] sm:$0xff]  ;;  %v117_v23 = vld [vmem:[%s6253_s2 + $0x128] sm:$0xff]  ;;  %v88_v24 = vld [vmem:[%s6253_s2 + $0x40] sm:$0xff] }
  0x14   :  { %3046 = vmatpush1.bf16.msra.mxu0 %v3045_v2  ;;  %3059 = vmatpush1.bf16.msra.mxu1 %v3045_v2  ;;  %v118_v25 = vld [vmem:[%s6253_s2 + $0x130] sm:$0xff]  ;;  %v89_v26 = vld [vmem:[%s6253_s2 + $0x48] sm:$0xff]  ;;  %v119_v27 = vld [vmem:[%s6253_s2 + $0x138] sm:$0xff] }
  0x15   :  { %3048 = vmatprep.subr.bf16.mxu0 %v3047_v6  ;;  %3055 = vmatprep.subr.bf16.mxu1 %v3047_v6  ;;  %v90_v28 = vld [vmem:[%s6253_s2 + $0x50] sm:$0xff]  ;;  %v120_v29 = vld [vmem:[%s6253_s2 + $0x140] sm:$0xff]  ;;  %v91_v30 = vld [vmem:[%s6253_s2 + $0x58] sm:$0xff] }
  0x16   :  { %v121_v31 = vld [vmem:[%s6253_s2 + $0x148] sm:$0xff]  ;;  %v92_v32 = vld [vmem:[%s6253_s2 + $0x60] sm:$0xff]  ;;  %v122_v33 = vld [vmem:[%s6253_s2 + $0x150] sm:$0xff] }
  0x17   :  { %v93_v34 = vld [vmem:[%s6253_s2 + $0x68] sm:$0xff]  ;;  %v123_v35 = vld [vmem:[%s6253_s2 + $0x158] sm:$0xff]  ;;  %v94_v36 = vld [vmem:[%s6253_s2 + $0x70] sm:$0xff] }
  0x18   :  { %3050 = vmatpush1.bf16.msra.mxu0 %v3049_v7  ;;  %3060 = vmatpush1.bf16.msra.mxu1 %v3049_v7  ;;  %v124_v37 = vld [vmem:[%s6253_s2 + $0x160] sm:$0xff]  ;;  %v95_v38 = vld [vmem:[%s6253_s2 + $0x78] sm:$0xff]  ;;  %v125_v39 = vld [vmem:[%s6253_s2 + $0x168] sm:$0xff] }
  0x19   :  { %v96_v40 = vld [vmem:[%s6253_s2 + $0x80] sm:$0xff]  ;;  %v126_v41 = vld [vmem:[%s6253_s2 + $0x170] sm:$0xff]  ;;  %v97_v42 = vld [vmem:[%s6253_s2 + $0x88] sm:$0xff] }
  0x1a   :  { %v127_v43 = vld [vmem:[%s6253_s2 + $0x178] sm:$0xff]  ;;  %v98_v44 = vld [vmem:[%s6253_s2 + $0x90] sm:$0xff]  ;;  %v128_v45 = vld [vmem:[%s6253_s2 + $0x180] sm:$0xff] }
  0x1b   :  { %2971 = vmatmul.mubr.msk.f32.vlgmr.msra.gmra.mrb[0].mxu0 %vm140_vm0, %v80_v8  ;;  %3001 = vmatmul.mubr.msk.f32.vlgmr.msra.gmra.mrb[0].mxu1 %vm140_vm0, %v110_v9  ;;  %v99_v46 = vld [vmem:[%s6253_s2 + $0x98] sm:$0xff]  ;;  %v129_v47 = vld [vmem:[%s6253_s2 + $0x188] sm:$0xff]  ;;  %v100_v48 = vld [vmem:[%s6253_s2 + $0xa0] sm:$0xff] }
  0x1c   :  { %391 = vmatprep.mubr.f32.mxu0 %v3185_v3  ;;  %571 = vmatprep.mubr.f32.mxu1 %v3185_v3  ;;  %v130_v49 = vld [vmem:[%s6253_s2 + $0x190] sm:$0xff]  ;;  %v101_v50 = vld [vmem:[%s6253_s2 + $0xa8] sm:$0xff]  ;;  %v131_v51 = vld [vmem:[%s6253_s2 + $0x198] sm:$0xff] }
  0x1d   :  { %v102_v52 = vld [vmem:[%s6253_s2 + $0xb0] sm:$0xff]  ;;  %v132_v53 = vld [vmem:[%s6253_s2 + $0x1a0] sm:$0xff]  ;;  %v103_v54 = vld [vmem:[%s6253_s2 + $0xb8] sm:$0xff] }
  0x1e   :  { %v133_v55 = vld [vmem:[%s6253_s2 + $0x1a8] sm:$0xff]  ;;  %v104_v56 = vld [vmem:[%s6253_s2 + $0xc0] sm:$0xff]  ;;  %v134_v57 = vld [vmem:[%s6253_s2 + $0x1b0] sm:$0xff] }
  0x1f   :  { %2972 = vmatmul.mubr.msk.f32.gmra.mrb[2].mxu0 %vm140_vm0, %v81_v10  ;;  %3002 = vmatmul.mubr.msk.f32.gmra.mrb[2].mxu1 %vm140_vm0, %v111_v11  ;;  %v105_v58 = vld [vmem:[%s6253_s2 + $0xc8] sm:$0xff]  ;;  %v135_v59 = vld [vmem:[%s6253_s2 + $0x1b8] sm:$0xff]  ;;  %v106_v60 = vld [vmem:[%s6253_s2 + $0xd0] sm:$0xff] }
  0x20   :  { %397 = vmatprep.mubr.f32.mxu0 %v3185_v3  ;;  %577 = vmatprep.mubr.f32.mxu1 %v3185_v3  ;;  %v136_v61 = vld [vmem:[%s6253_s2 + $0x1c0] sm:$0xff]  ;;  %v107_v62 = vld [vmem:[%s6253_s2 + $0xd8] sm:$0xff]  ;;  %v137_v63 = vld [vmem:[%s6253_s2 + $0x1c8] sm:$0xff] }
  0x21   :  { %v108_v0 = vld [vmem:[%s6253_s2 + $0xe0] sm:$0xff]  ;;  %v138_v1 = vld [vmem:[%s6253_s2 + $0x1d0] sm:$0xff]  ;;  %v109_v2 = vld [vmem:[%s6253_s2 + $0xe8] sm:$0xff] }
  0x22   :  { %v139_v4 = vld [vmem:[%s6253_s2 + $0x1d8] sm:$0xff] }
  0x23   :  { %2973 = vmatmul.mubr.msk.f32.gmra.mrb[4].mxu0 %vm140_vm0, %v82_v12  ;;  %3003 = vmatmul.mubr.msk.f32.gmra.mrb[4].mxu1 %vm140_vm0, %v112_v13 }
  0x24   :  { %403 = vmatprep.mubr.f32.mxu0 %v3185_v3  ;;  %583 = vmatprep.mubr.f32.mxu1 %v3185_v3 }
  0x27   :  { %2974 = vmatmul.mubr.msk.f32.gmra.mrb[6].mxu0 %vm140_vm0, %v83_v14  ;;  %3004 = vmatmul.mubr.msk.f32.gmra.mrb[6].mxu1 %vm140_vm0, %v113_v15 }
  0x28   :  { %409 = vmatprep.mubr.f32.mxu0 %v3185_v3  ;;  %589 = vmatprep.mubr.f32.mxu1 %v3185_v3 }
  0x2b   :  { %2975 = vmatmul.mubr.msk.f32.gmra.mrb[8].mxu0 %vm140_vm0, %v84_v16  ;;  %3005 = vmatmul.mubr.msk.f32.gmra.mrb[8].mxu1 %vm140_vm0, %v114_v17 }
  0x2c   :  { %415 = vmatprep.mubr.f32.mxu0 %v3185_v3  ;;  %595 = vmatprep.mubr.f32.mxu1 %v3185_v3 }
  0x2f   :  { %2976 = vmatmul.mubr.msk.f32.gmra.mrb[10].mxu0 %vm140_vm0, %v85_v18  ;;  %3006 = vmatmul.mubr.msk.f32.gmra.mrb[10].mxu1 %vm140_vm0, %v115_v19 }
  0x30   :  { %421 = vmatprep.mubr.f32.mxu0 %v3185_v3  ;;  %601 = vmatprep.mubr.f32.mxu1 %v3185_v3 }
  0x33   :  { %2977 = vmatmul.mubr.msk.f32.gmra.mrb[12].mxu0 %vm140_vm0, %v86_v20  ;;  %3007 = vmatmul.mubr.msk.f32.gmra.mrb[12].mxu1 %vm140_vm0, %v116_v21 }
  0x34   :  { %427 = vmatprep.mubr.f32.mxu0 %v3185_v3  ;;  %607 = vmatprep.mubr.f32.mxu1 %v3185_v3 }
  0x37   :  { %2978 = vmatmul.mubr.msk.f32.gmra.mrb[14].mxu0 %vm140_vm0, %v87_v22  ;;  %3008 = vmatmul.mubr.msk.f32.gmra.mrb[14].mxu1 %vm140_vm0, %v117_v23 }
  0x38   :  { %433 = vmatprep.mubr.f32.mxu0 %v3185_v3  ;;  %613 = vmatprep.mubr.f32.mxu1 %v3185_v3 }
  0x3b   :  { %2979 = vmatmul.mubr.msk.f32.gmra.mrb[16].mxu0 %vm140_vm0, %v88_v24  ;;  %3009 = vmatmul.mubr.msk.f32.gmra.mrb[16].mxu1 %vm140_vm0, %v118_v25 }
  0x3c   :  { %439 = vmatprep.mubr.f32.mxu0 %v3185_v3  ;;  %619 = vmatprep.mubr.f32.mxu1 %v3185_v3 }
  0x3f   :  { %2980 = vmatmul.mubr.msk.f32.gmra.mrb[18].mxu0 %vm140_vm0, %v89_v26  ;;  %3010 = vmatmul.mubr.msk.f32.gmra.mrb[18].mxu1 %vm140_vm0, %v119_v27 }
  0x40   :  { %445 = vmatprep.mubr.f32.mxu0 %v3185_v3  ;;  %625 = vmatprep.mubr.f32.mxu1 %v3185_v3 }
  0x43   :  { %2981 = vmatmul.mubr.msk.f32.gmra.mrb[20].mxu0 %vm140_vm0, %v90_v28  ;;  %3011 = vmatmul.mubr.msk.f32.gmra.mrb[20].mxu1 %vm140_vm0, %v120_v29 }
  0x44   :  { %451 = vmatprep.mubr.f32.mxu0 %v3185_v3  ;;  %631 = vmatprep.mubr.f32.mxu1 %v3185_v3 }
  0x47   :  { %2982 = vmatmul.mubr.msk.f32.gmra.mrb[22].mxu0 %vm140_vm0, %v91_v30  ;;  %3012 = vmatmul.mubr.msk.f32.gmra.mrb[22].mxu1 %vm140_vm0, %v121_v31 }
  0x48   :  { %457 = vmatprep.mubr.f32.mxu0 %v3185_v3  ;;  %637 = vmatprep.mubr.f32.mxu1 %v3185_v3 }
  0x4b   :  { %2983 = vmatmul.mubr.msk.f32.gmra.mrb[24].mxu0 %vm140_vm0, %v92_v32  ;;  %3013 = vmatmul.mubr.msk.f32.gmra.mrb[24].mxu1 %vm140_vm0, %v122_v33 }
  0x4c   :  { %463 = vmatprep.mubr.f32.mxu0 %v3185_v3  ;;  %643 = vmatprep.mubr.f32.mxu1 %v3185_v3 }
  0x4f   :  { %2984 = vmatmul.mubr.msk.f32.gmra.mrb[26].mxu0 %vm140_vm0, %v93_v34  ;;  %3014 = vmatmul.mubr.msk.f32.gmra.mrb[26].mxu1 %vm140_vm0, %v123_v35 }
  0x50   :  { %469 = vmatprep.mubr.f32.mxu0 %v3185_v3  ;;  %649 = vmatprep.mubr.f32.mxu1 %v3185_v3 }
  0x53   :  { %2985 = vmatmul.mubr.msk.f32.gmra.mrb[28].mxu0 %vm140_vm0, %v94_v36  ;;  %3015 = vmatmul.mubr.msk.f32.gmra.mrb[28].mxu1 %vm140_vm0, %v124_v37 }
  0x54   :  { %475 = vmatprep.mubr.f32.mxu0 %v3185_v3  ;;  %655 = vmatprep.mubr.f32.mxu1 %v3185_v3 }
  0x57   :  { %2986 = vmatmul.mubr.msk.f32.gmra.mrb[30].mxu0 %vm140_vm0, %v95_v38  ;;  %3016 = vmatmul.mubr.msk.f32.gmra.mrb[30].mxu1 %vm140_vm0, %v125_v39 }
  0x58   :  { %481 = vmatprep.mubr.f32.mxu0 %v3185_v3  ;;  %661 = vmatprep.mubr.f32.mxu1 %v3185_v3 }
  0x5b   :  { %2987 = vmatmul.mubr.msk.f32.gmra.mrb[32].mxu0 %vm140_vm0, %v96_v40  ;;  %3017 = vmatmul.mubr.msk.f32.gmra.mrb[32].mxu1 %vm140_vm0, %v126_v41 }
  0x5c   :  { %487 = vmatprep.mubr.f32.mxu0 %v3185_v3  ;;  %667 = vmatprep.mubr.f32.mxu1 %v3185_v3 }
  0x5f   :  { %2988 = vmatmul.mubr.msk.f32.gmra.mrb[34].mxu0 %vm140_vm0, %v97_v42  ;;  %3018 = vmatmul.mubr.msk.f32.gmra.mrb[34].mxu1 %vm140_vm0, %v127_v43 }
  0x60   :  { %493 = vmatprep.mubr.f32.mxu0 %v3185_v3  ;;  %673 = vmatprep.mubr.f32.mxu1 %v3185_v3 }
  0x63   :  { %2989 = vmatmul.mubr.msk.f32.gmra.mrb[36].mxu0 %vm140_vm0, %v98_v44  ;;  %3019 = vmatmul.mubr.msk.f32.gmra.mrb[36].mxu1 %vm140_vm0, %v128_v45 }
  0x64   :  { %499 = vmatprep.mubr.f32.mxu0 %v3185_v3  ;;  %679 = vmatprep.mubr.f32.mxu1 %v3185_v3 }
  0x67   :  { %2990 = vmatmul.mubr.msk.f32.gmra.mrb[38].mxu0 %vm140_vm0, %v99_v46  ;;  %3020 = vmatmul.mubr.msk.f32.gmra.mrb[38].mxu1 %vm140_vm0, %v129_v47 }
  0x68   :  { %505 = vmatprep.mubr.f32.mxu0 %v3185_v3  ;;  %685 = vmatprep.mubr.f32.mxu1 %v3185_v3 }
  0x6b   :  { %2991 = vmatmul.mubr.msk.f32.gmra.mrb[40].mxu0 %vm140_vm0, %v100_v48  ;;  %3021 = vmatmul.mubr.msk.f32.gmra.mrb[40].mxu1 %vm140_vm0, %v130_v49 }
  0x6c   :  { %511 = vmatprep.mubr.f32.mxu0 %v3185_v3  ;;  %691 = vmatprep.mubr.f32.mxu1 %v3185_v3 }
  0x6f   :  { %2992 = vmatmul.mubr.msk.f32.gmra.mrb[42].mxu0 %vm140_vm0, %v101_v50  ;;  %3022 = vmatmul.mubr.msk.f32.gmra.mrb[42].mxu1 %vm140_vm0, %v131_v51 }
  0x70   :  { %517 = vmatprep.mubr.f32.mxu0 %v3185_v3  ;;  %697 = vmatprep.mubr.f32.mxu1 %v3185_v3 }
  0x73   :  { %2993 = vmatmul.mubr.msk.f32.gmra.mrb[44].mxu0 %vm140_vm0, %v102_v52  ;;  %3023 = vmatmul.mubr.msk.f32.gmra.mrb[44].mxu1 %vm140_vm0, %v132_v53 }
  0x74   :  { %523 = vmatprep.mubr.f32.mxu0 %v3185_v3  ;;  %703 = vmatprep.mubr.f32.mxu1 %v3185_v3 }
  0x77   :  { %2994 = vmatmul.mubr.msk.f32.gmra.mrb[46].mxu0 %vm140_vm0, %v103_v54  ;;  %3024 = vmatmul.mubr.msk.f32.gmra.mrb[46].mxu1 %vm140_vm0, %v133_v55 }
  0x78   :  { %529 = vmatprep.mubr.f32.mxu0 %v3185_v3  ;;  %709 = vmatprep.mubr.f32.mxu1 %v3185_v3 }
  0x7b   :  { %2995 = vmatmul.mubr.msk.f32.gmra.mrb[48].mxu0 %vm140_vm0, %v104_v56  ;;  %3025 = vmatmul.mubr.msk.f32.gmra.mrb[48].mxu1 %vm140_vm0, %v134_v57 }
  0x7c   :  { %535 = vmatprep.mubr.f32.mxu0 %v3185_v3  ;;  %715 = vmatprep.mubr.f32.mxu1 %v3185_v3 }
  0x7f   :  { %2996 = vmatmul.mubr.msk.f32.gmra.mrb[50].mxu0 %vm140_vm0, %v105_v58  ;;  %3026 = vmatmul.mubr.msk.f32.gmra.mrb[50].mxu1 %vm140_vm0, %v135_v59 }
  0x80   :  { %541 = vmatprep.mubr.f32.mxu0 %v3185_v3  ;;  %721 = vmatprep.mubr.f32.mxu1 %v3185_v3 }
  0x83   :  { %2997 = vmatmul.mubr.msk.f32.gmra.mrb[52].mxu0 %vm140_vm0, %v106_v60  ;;  %3027 = vmatmul.mubr.msk.f32.gmra.mrb[52].mxu1 %vm140_vm0, %v136_v61 }
  0x84   :  { %547 = vmatprep.mubr.f32.mxu0 %v3185_v3  ;;  %727 = vmatprep.mubr.f32.mxu1 %v3185_v3 }
  0x87   :  { %2998 = vmatmul.mubr.msk.f32.gmra.mrb[54].mxu0 %vm140_vm0, %v107_v62  ;;  %3028 = vmatmul.mubr.msk.f32.gmra.mrb[54].mxu1 %vm140_vm0, %v137_v63 }
  0x88   :  { %553 = vmatprep.mubr.f32.mxu0 %v3185_v3  ;;  %733 = vmatprep.mubr.f32.mxu1 %v3185_v3 }
  0x8b   :  { %2999 = vmatmul.mubr.msk.f32.gmra.mrb[56].mxu0 %vm140_vm0, %v108_v0  ;;  %3029 = vmatmul.mubr.msk.f32.gmra.mrb[56].mxu1 %vm140_vm0, %v138_v1 }
  0x8c   :  { %559 = vmatprep.mubr.f32.mxu0 %v3185_v3  ;;  %739 = vmatprep.mubr.f32.mxu1 %v3185_v3 }
  0x8f   :  { %3000 = vmatmul.mubr.msk.f32.gmra.mrb[58].mxu0 %vm140_vm0, %v109_v2  ;;  %3030 = vmatmul.mubr.msk.f32.gmra.mrb[58].mxu1 %vm140_vm0, %v139_v4 }
  0xee   :  { %v3637_v5 = vpop.f32.mrb[0].mxu0  ;;  %v3639_v6 = vpop.f32.mrb[0].mxu1 }
  0xef   :  { %6377 = vst [vmem:[#allocation2_spill] sm:$0xff] %v3637_v5  ;;  %6378 = vst [vmem:[#allocation3_spill] sm:$0xff] %v3639_v6  ;;  %v3641_v7 = vpop.f32.mrb[1].mxu0  ;;  %v3643_v8 = vpop.f32.mrb[1].mxu1  ;;  %v987_v3 = vmul.f32 %v3637_v5, %v3637_v5  ;;  %v1047_v15 = vmul.f32 %v3639_v6, %v3639_v6 }
  0xf0   :  { %6379 = vst [vmem:[#allocation4_spill] sm:$0xff] %v3641_v7  ;;  %6380 = vst [vmem:[#allocation5_spill] sm:$0xff] %v3643_v8  ;;  %v988_v9 = vmul.f32 %v3641_v7, %v3641_v7  ;;  %v1048_v10 = vmul.f32 %v3643_v8, %v3643_v8  ;;  %v747_v11 = vsel %vm746_vm1, %v3641_v7, 0.0  ;;  %v867_v12 = vsel %vm746_vm1, %v3643_v8, 0.0 }
  0xf1   :  { %v748_v13 = vadd.f32 %v747_v11, %v3637_v5  ;;  %v868_v14 = vadd.f32 %v867_v12, %v3639_v6 }
  0xf2   :  { %v3659_v16 = vpop.f32.mrb[2].mxu0  ;;  %v3661_v17 = vpop.f32.mrb[2].mxu1  ;;  %v1107_v18 = vsel %vm746_vm1, %v988_v9, 0.0  ;;  %v1227_v19 = vsel %vm746_vm1, %v1048_v10, 0.0 }
  0xf3   :  { %6381 = vst [vmem:[#allocation6_spill] sm:$0xff] %v3659_v16  ;;  %6382 = vst [vmem:[#allocation7_spill] sm:$0xff] %v3661_v17  ;;  %v3665_v20 = vpop.f32.mrb[3].mxu1  ;;  %749 = vadd.xlane.f32.xlu0 %v748_v13  ;;  %v3667_v21 = vpop.f32.mrb[3].mxu0  ;;  %v1108_v22 = vadd.f32 %v1107_v18, %v987_v3  ;;  %v989_v23 = vmul.f32 %v3659_v16, %v3659_v16  ;;  %v1228_v24 = vadd.f32 %v1227_v19, %v1047_v15 }
  0xf4   :  { %6383 = vst [vmem:[#allocation8_spill] sm:$0xff] %v3665_v20  ;;  %6384 = vst [vmem:[#allocation9_spill] sm:$0xff] %v3667_v21  ;;  %v1050_v25 = vmul.f32 %v3665_v20, %v3665_v20  ;;  %v990_v26 = vmul.f32 %v3667_v21, %v3667_v21  ;;  %v871_v27 = vsel %vm746_vm1, %v3665_v20, 0.0  ;;  %v751_v28 = vsel %vm746_vm1, %v3667_v21, 0.0 }
  0xf5   :  { %v872_v29 = vadd.f32 %v871_v27, %v3661_v17  ;;  %v1049_v30 = vmul.f32 %v3661_v17, %v3661_v17  ;;  %v752_v31 = vadd.f32 %v751_v28, %v3659_v16 }
  0xf6   :  { %v1111_v32 = vsel %vm746_vm1, %v990_v26, 0.0  ;;  %v3684_v33 = vpop.f32.mrb[4].mxu0  ;;  %v1231_v34 = vsel %vm746_vm1, %v1050_v25, 0.0  ;;  %v3687_v35 = vpop.f32.mrb[4].mxu1 }
  0xf7   :  { %6385 = vst [vmem:[#allocation10_spill] sm:$0xff] %v3684_v33  ;;  %6386 = vst [vmem:[#allocation11_spill] sm:$0xff] %v3687_v35  ;;  %873 = vadd.xlane.f32.xlu1 %v872_v29  ;;  %869 = vadd.xlane.f32.xlu0 %v868_v14  ;;  %v1112_v36 = vadd.f32 %v1111_v32, %v989_v23  ;;  %v3689_v37 = vpop.f32.mrb[5].mxu0  ;;  %v1232_v38 = vadd.f32 %v1231_v34, %v1049_v30  ;;  %v3691_v39 = vpop.f32.mrb[5].mxu1 }
  0xf8   :  { %6387 = vst [vmem:[#allocation12_spill] sm:$0xff] %v3689_v37  ;;  %6388 = vst [vmem:[#allocation13_spill] sm:$0xff] %v3691_v39  ;;  %v991_v40 = vmul.f32 %v3684_v33, %v3684_v33  ;;  %v992_v41 = vmul.f32 %v3689_v37, %v3689_v37  ;;  %v1052_v42 = vmul.f32 %v3691_v39, %v3691_v39  ;;  %v755_v43 = vsel %vm746_vm1, %v3689_v37, 0.0 }
  0xf9   :  { %v875_v44 = vsel %vm746_vm1, %v3691_v39, 0.0  ;;  %v756_v45 = vadd.f32 %v755_v43, %v3684_v33  ;;  %v1051_v47 = vmul.f32 %v3687_v35, %v3687_v35 }
  0xfa   :  { %v876_v46 = vadd.f32 %v875_v44, %v3687_v35  ;;  %v3707_v48 = vpop.f32.mrb[6].mxu0  ;;  %v3709_v49 = vpop.f32.mrb[6].mxu1  ;;  %v1115_v50 = vsel %vm746_vm1, %v992_v41, 0.0  ;;  %v1235_v51 = vsel %vm746_vm1, %v1052_v42, 0.0 }
  0xfb   :  { %6389 = vst [vmem:[#allocation14_spill] sm:$0xff] %v3707_v48  ;;  %6390 = vst [vmem:[#allocation15_spill] sm:$0xff] %v3709_v49  ;;  %1109 = vadd.xlane.f32.xlu0 %v1108_v22  ;;  %1113 = vadd.xlane.f32.xlu1 %v1112_v36  ;;  %v3713_v52 = vpop.f32.mrb[7].mxu0  ;;  %v3715_v53 = vpop.f32.mrb[7].mxu1  ;;  %v3717_v54 = vadd.f32 %v1115_v50, %v991_v40  ;;  %v3719_v55 = vadd.f32 %v1235_v51, %v1051_v47 }
  0xfc   :  { %6391 = vst [vmem:[#allocation16_spill] sm:$0xff] %v3713_v52  ;;  %6392 = vst [vmem:[#allocation17_spill] sm:$0xff] %v3715_v53  ;;  %v993_v56 = vmul.f32 %v3707_v48, %v3707_v48  ;;  %v994_v57 = vmul.f32 %v3713_v52, %v3713_v52  ;;  %v1054_v58 = vmul.f32 %v3715_v53, %v3715_v53  ;;  %v759_v59 = vsel %vm746_vm1, %v3713_v52, 0.0 }
  0xfd   :  { %v879_v60 = vsel %vm746_vm1, %v3715_v53, 0.0  ;;  %v760_v61 = vadd.f32 %v759_v59, %v3707_v48  ;;  %v1053_v63 = vmul.f32 %v3709_v49, %v3709_v49 }
  0xfe   :  { %v880_v62 = vadd.f32 %v879_v60, %v3709_v49  ;;  %v3735_v0 = vpop.f32.mrb[8].mxu0  ;;  %v1119_v1 = vsel %vm746_vm1, %v994_v57, 0.0  ;;  %v3738_v2 = vpop.f32.mrb[8].mxu1  ;;  %v1239_v4 = vsel %vm746_vm1, %v1054_v58, 0.0 }
  0xff   :  { %6393 = vst [vmem:[#allocation18_spill] sm:$0xff] %v3735_v0  ;;  %6394 = vst [vmem:[#allocation19_spill] sm:$0xff] %v3738_v2  ;;  %1229 = vadd.xlane.f32.xlu0 %v1228_v24  ;;  %1233 = vadd.xlane.f32.xlu1 %v1232_v38  ;;  %v3741_v3 = vpop.f32.mrb[9].mxu0  ;;  %v3743_v9 = vadd.f32 %v1119_v1, %v993_v56  ;;  %v3745_v10 = vpop.f32.mrb[9].mxu1  ;;  %v3747_v11 = vadd.f32 %v1239_v4, %v1053_v63 }
 0x100   :  { %6395 = vst [vmem:[#allocation20_spill] sm:$0xff] %v3741_v3  ;;  %6396 = vst [vmem:[#allocation21_spill] sm:$0xff] %v3745_v10  ;;  %v995_v12 = vmul.f32 %v3735_v0, %v3735_v0  ;;  %v996_v13 = vmul.f32 %v3741_v3, %v3741_v3  ;;  %v1056_v14 = vmul.f32 %v3745_v10, %v3745_v10  ;;  %v763_v15 = vsel %vm746_vm1, %v3741_v3, 0.0 }
 0x101   :  { %v883_v18 = vsel %vm746_vm1, %v3745_v10, 0.0  ;;  %v3760_v19 = vadd.f32 %v763_v15, %v3735_v0  ;;  %v1055_v23 = vmul.f32 %v3738_v2, %v3738_v2 }
 0x102   :  { %v3763_v22 = vadd.f32 %v883_v18, %v3738_v2  ;;  %v3767_v24 = vpop.f32.mrb[10].mxu0  ;;  %v3769_v25 = vpop.f32.mrb[10].mxu1  ;;  %v1123_v26 = vsel %vm746_vm1, %v996_v13, 0.0  ;;  %v1243_v27 = vsel %vm746_vm1, %v1056_v14, 0.0 }
 0x103   :  { %6397 = vst [vmem:[#allocation22_spill] sm:$0xff] %v3767_v24  ;;  %6398 = vst [vmem:[#allocation23_spill] sm:$0xff] %v3769_v25  ;;  %753 = vadd.xlane.f32.xlu0 %v752_v31  ;;  %757 = vadd.xlane.f32.xlu1 %v756_v45  ;;  %v3773_v28 = vpop.f32.mrb[11].mxu0  ;;  %v3775_v29 = vpop.f32.mrb[11].mxu1  ;;  %v3777_v30 = vadd.f32 %v1123_v26, %v995_v12  ;;  %v3779_v32 = vadd.f32 %v1243_v27, %v1055_v23 }
 0x104   :  { %6399 = vst [vmem:[#allocation24_spill] sm:$0xff] %v3773_v28  ;;  %6400 = vst [vmem:[#allocation25_spill] sm:$0xff] %v3775_v29  ;;  %v997_v34 = vmul.f32 %v3767_v24, %v3767_v24  ;;  %v998_v36 = vmul.f32 %v3773_v28, %v3773_v28  ;;  %v1058_v38 = vmul.f32 %v3775_v29, %v3775_v29  ;;  %v767_v31 = vsel %vm746_vm1, %v3773_v28, 0.0 }
 0x105   :  { %v887_v40 = vsel %vm746_vm1, %v3775_v29, 0.0  ;;  %v3792_v41 = vadd.f32 %v767_v31, %v3767_v24  ;;  %v1057_v43 = vmul.f32 %v3769_v25, %v3769_v25 }
 0x106   :  { %v3795_v42 = vadd.f32 %v887_v40, %v3769_v25  ;;  %v3799_v44 = vpop.f32.mrb[12].mxu0  ;;  %v1127_v45 = vsel %vm746_vm1, %v998_v36, 0.0  ;;  %v3802_v47 = vpop.f32.mrb[12].mxu1  ;;  %v1247_v50 = vsel %vm746_vm1, %v1058_v38, 0.0 }
 0x107   :  { %6401 = vst [vmem:[#allocation26_spill] sm:$0xff] %v3799_v44  ;;  %6402 = vst [vmem:[#allocation27_spill] sm:$0xff] %v3802_v47  ;;  %877 = vadd.xlane.f32.xlu0 %v876_v46  ;;  %761 = vadd.xlane.f32.xlu1 %v760_v61  ;;  %v3805_v51 = vpop.f32.mrb[13].mxu0  ;;  %v3807_v56 = vadd.f32 %v1127_v45, %v997_v34  ;;  %v3809_v57 = vpop.f32.mrb[13].mxu1  ;;  %v3811_v58 = vadd.f32 %v1247_v50, %v1057_v43 }
 0x108   :  { %6403 = vst [vmem:[#allocation28_spill] sm:$0xff] %v3805_v51  ;;  %6404 = vst [vmem:[#allocation29_spill] sm:$0xff] %v3809_v57  ;;  %v999_v59 = vmul.f32 %v3799_v44, %v3799_v44  ;;  %v1000_v60 = vmul.f32 %v3805_v51, %v3805_v51  ;;  %v1060_v63 = vmul.f32 %v3809_v57, %v3809_v57  ;;  %v771_v46 = vsel %vm746_vm1, %v3805_v51, 0.0 }
 0x109   :  { %v891_v61 = vsel %vm746_vm1, %v3809_v57, 0.0  ;;  %v3824_v1 = vadd.f32 %v771_v46, %v3799_v44  ;;  %v1059_v12 = vmul.f32 %v3802_v47, %v3802_v47 }
 0x10a   :  { %v3827_v4 = vadd.f32 %v891_v61, %v3802_v47  ;;  %v3831_v13 = vpop.f32.mrb[14].mxu0  ;;  %v3833_v14 = vpop.f32.mrb[14].mxu1  ;;  %v1131_v15 = vsel %vm746_vm1, %v1000_v60, 0.0  ;;  %v1251_v18 = vsel %vm746_vm1, %v1060_v63, 0.0 }
 0x10b   :  { %6405 = vst [vmem:[#allocation30_spill] sm:$0xff] %v3831_v13  ;;  %6406 = vst [vmem:[#allocation31_spill] sm:$0xff] %v3833_v14  ;;  %1117 = vadd.xlane.f32.xlu0 %v3717_v54  ;;  %881 = vadd.xlane.f32.xlu1 %v880_v62  ;;  %v3838_v23 = vpop.f32.mrb[15].mxu0  ;;  %v3840_v26 = vpop.f32.mrb[15].mxu1  ;;  %v3842_v27 = vadd.f32 %v1131_v15, %v999_v59  ;;  %v3844_v34 = vadd.f32 %v1251_v18, %v1059_v12 }
 0x10c   :  { %6407 = vst [vmem:[#allocation32_spill] sm:$0xff] %v3838_v23  ;;  %6408 = vst [vmem:[#allocation33_spill] sm:$0xff] %v3840_v26  ;;  %v1001_v36 = vmul.f32 %v3831_v13, %v3831_v13  ;;  %v1002_v38 = vmul.f32 %v3838_v23, %v3838_v23  ;;  %v1062_v31 = vmul.f32 %v3840_v26, %v3840_v26  ;;  %v775_v54 = vsel %vm746_vm1, %v3838_v23, 0.0 }
 0x10d   :  { %v895_v62 = vsel %vm746_vm1, %v3840_v26, 0.0  ;;  %v3857_v40 = vadd.f32 %v775_v54, %v3831_v13  ;;  %v1061_v45 = vmul.f32 %v3833_v14, %v3833_v14 }
 0x10e   :  { %v3860_v43 = vadd.f32 %v895_v62, %v3833_v14  ;;  %v3864_v50 = vpop.f32.mrb[16].mxu0  ;;  %v1135_v59 = vsel %vm746_vm1, %v1002_v38, 0.0  ;;  %v3867_v60 = vpop.f32.mrb[16].mxu1  ;;  %v1255_v63 = vsel %vm746_vm1, %v1062_v31, 0.0 }
 0x10f   :  { %6409 = vst [vmem:[#allocation34_spill] sm:$0xff] %v3864_v50  ;;  %6410 = vst [vmem:[#allocation35_spill] sm:$0xff] %v3867_v60  ;;  %1237 = vadd.xlane.f32.xlu0 %v3719_v55  ;;  %1121 = vadd.xlane.f32.xlu1 %v3743_v9  ;;  %v3872_v46 = vpop.f32.mrb[17].mxu0  ;;  %v3874_v61 = vadd.f32 %v1135_v59, %v1001_v36  ;;  %v3876_v12 = vpop.f32.mrb[17].mxu1  ;;  %v3878_v15 = vadd.f32 %v1255_v63, %v1061_v45 }
 0x110   :  { %6411 = vst [vmem:[#allocation36_spill] sm:$0xff] %v3872_v46  ;;  %6412 = vst [vmem:[#allocation37_spill] sm:$0xff] %v3876_v12  ;;  %v1003_v18 = vmul.f32 %v3864_v50, %v3864_v50  ;;  %v1004_v38 = vmul.f32 %v3872_v46, %v3872_v46  ;;  %v1064_v31 = vmul.f32 %v3876_v12, %v3876_v12  ;;  %v779_v55 = vsel %vm746_vm1, %v3872_v46, 0.0 }
 0x111   :  { %v899_v9 = vsel %vm746_vm1, %v3876_v12, 0.0  ;;  %v3891_v36 = vadd.f32 %v779_v55, %v3864_v50  ;;  %v1063_v62 = vmul.f32 %v3867_v60, %v3867_v60 }
 0x112   :  { %v3894_v54 = vadd.f32 %v899_v9, %v3867_v60  ;;  %v3898_v45 = vpop.f32.mrb[18].mxu0  ;;  %v3900_v59 = vpop.f32.mrb[18].mxu1  ;;  %v1139_v63 = vsel %vm746_vm1, %v1004_v38, 0.0  ;;  %v1259_v46 = vsel %vm746_vm1, %v1064_v31, 0.0 }
 0x113   :  { %6413 = vst [vmem:[#allocation38_spill] sm:$0xff] %v3898_v45  ;;  %6414 = vst [vmem:[#allocation39_spill] sm:$0xff] %v3900_v59  ;;  %1241 = vadd.xlane.f32.xlu1 %v3747_v11  ;;  %765 = vadd.xlane.f32.xlu0 %v3760_v19  ;;  %v3906_v55 = vpop.f32.mrb[19].mxu0  ;;  %v3908_v12 = vpop.f32.mrb[19].mxu1  ;;  %v3910_v9 = vadd.f32 %v1139_v63, %v1003_v18  ;;  %v3912_v50 = vadd.f32 %v1259_v46, %v1063_v62 }
 0x114   :  { %6415 = vst [vmem:[#allocation40_spill] sm:$0xff] %v3906_v55  ;;  %6416 = vst [vmem:[#allocation41_spill] sm:$0xff] %v3908_v12  ;;  %v1005_v60 = vmul.f32 %v3898_v45, %v3898_v45  ;;  %v1006_v38 = vmul.f32 %v3906_v55, %v3906_v55  ;;  %v1066_v31 = vmul.f32 %v3908_v12, %v3908_v12  ;;  %v783_v11 = vsel %vm746_vm1, %v3906_v55, 0.0 }
 0x115   :  { %v903_v19 = vsel %vm746_vm1, %v3908_v12, 0.0  ;;  %v3925_v18 = vadd.f32 %v783_v11, %v3898_v45  ;;  %v1065_v62 = vmul.f32 %v3900_v59, %v3900_v59 }
 0x116   :  { %v3928_v46 = vadd.f32 %v903_v19, %v3900_v59  ;;  %v3932_v63 = vpop.f32.mrb[20].mxu0  ;;  %v1143_v57 = vsel %vm746_vm1, %v1006_v38, 0.0  ;;  %v3935_v47 = vpop.f32.mrb[20].mxu1  ;;  %v1263_v51 = vsel %vm746_vm1, %v1066_v31, 0.0 }
 0x117   :  { %6417 = vst [vmem:[#allocation42_spill] sm:$0xff] %v3932_v63  ;;  %6418 = vst [vmem:[#allocation43_spill] sm:$0xff] %v3935_v47  ;;  %885 = vadd.xlane.f32.xlu0 %v3763_v22  ;;  %769 = vadd.xlane.f32.xlu1 %v3792_v41  ;;  %v3940_v11 = vpop.f32.mrb[21].mxu0  ;;  %v3942_v44 = vadd.f32 %v1143_v57, %v1005_v60  ;;  %v3944_v19 = vpop.f32.mrb[21].mxu1  ;;  %v3946_v23 = vadd.f32 %v1263_v51, %v1065_v62 }
 0x118   :  { %6419 = vst [vmem:[#allocation44_spill] sm:$0xff] %v3940_v11  ;;  %6420 = vst [vmem:[#allocation45_spill] sm:$0xff] %v3944_v19  ;;  %v1007_v13 = vmul.f32 %v3932_v63, %v3932_v63  ;;  %v1008_v38 = vmul.f32 %v3940_v11, %v3940_v11  ;;  %v1068_v31 = vmul.f32 %v3944_v19, %v3944_v19  ;;  %v787_v22 = vsel %vm746_vm1, %v3940_v11, 0.0 }
 0x119   :  { %v907_v41 = vsel %vm746_vm1, %v3944_v19, 0.0  ;;  %v3959_v57 = vadd.f32 %v787_v22, %v3932_v63  ;;  %v1067_v60 = vmul.f32 %v3935_v47, %v3935_v47 }
 0x11a   :  { %v3962_v51 = vadd.f32 %v907_v41, %v3935_v47  ;;  %v3966_v62 = vpop.f32.mrb[22].mxu0  ;;  %v3968_v12 = vpop.f32.mrb[22].mxu1  ;;  %v1147_v59 = vsel %vm746_vm1, %v1008_v38, 0.0  ;;  %v1267_v11 = vsel %vm746_vm1, %v1068_v31, 0.0 }
 0x11b   :  { %6421 = vst [vmem:[#allocation46_spill] sm:$0xff] %v3966_v62  ;;  %6422 = vst [vmem:[#allocation47_spill] sm:$0xff] %v3968_v12  ;;  %1125 = vadd.xlane.f32.xlu0 %v3777_v30  ;;  %889 = vadd.xlane.f32.xlu1 %v3795_v42  ;;  %v3974_v22 = vpop.f32.mrb[23].mxu0  ;;  %v3976_v19 = vpop.f32.mrb[23].mxu1  ;;  %v3978_v41 = vadd.f32 %v1147_v59, %v1007_v13  ;;  %v3980_v63 = vadd.f32 %v1267_v11, %v1067_v60 }
 0x11c   :  { %6423 = vst [vmem:[#allocation48_spill] sm:$0xff] %v3974_v22  ;;  %6424 = vst [vmem:[#allocation49_spill] sm:$0xff] %v3976_v19  ;;  %v1009_v47 = vmul.f32 %v3966_v62, %v3966_v62  ;;  %v1010_v38 = vmul.f32 %v3974_v22, %v3974_v22  ;;  %v1070_v31 = vmul.f32 %v3976_v19, %v3976_v19  ;;  %v791_v30 = vsel %vm746_vm1, %v3974_v22, 0.0 }
 0x11d   :  { %v911_v42 = vsel %vm746_vm1, %v3976_v19, 0.0  ;;  %v3993_v13 = vadd.f32 %v791_v30, %v3966_v62  ;;  %v1069_v11 = vmul.f32 %v3968_v12, %v3968_v12 }
 0x11e   :  { %v3996_v59 = vadd.f32 %v911_v42, %v3968_v12  ;;  %v4000_v60 = vpop.f32.mrb[24].mxu0  ;;  %v1151_v55 = vsel %vm746_vm1, %v1010_v38, 0.0  ;;  %v4003_v45 = vpop.f32.mrb[24].mxu1  ;;  %v1271_v22 = vsel %vm746_vm1, %v1070_v31, 0.0 }
 0x11f   :  { %6425 = vst [vmem:[#allocation50_spill] sm:$0xff] %v4000_v60  ;;  %6426 = vst [vmem:[#allocation51_spill] sm:$0xff] %v4003_v45  ;;  %1245 = vadd.xlane.f32.xlu0 %v3779_v32  ;;  %1129 = vadd.xlane.f32.xlu1 %v3807_v56  ;;  %v4008_v30 = vpop.f32.mrb[25].mxu0  ;;  %v4010_v19 = vadd.f32 %v1151_v55, %v1009_v47  ;;  %v4012_v42 = vpop.f32.mrb[25].mxu1  ;;  %v4014_v62 = vadd.f32 %v1271_v22, %v1069_v11 }
 0x120   :  { %6427 = vst [vmem:[#allocation52_spill] sm:$0xff] %v4008_v30  ;;  %6428 = vst [vmem:[#allocation53_spill] sm:$0xff] %v4012_v42  ;;  %v1011_v12 = vmul.f32 %v4000_v60, %v4000_v60  ;;  %v1012_v38 = vmul.f32 %v4008_v30, %v4008_v30  ;;  %v1072_v31 = vmul.f32 %v4012_v42, %v4012_v42  ;;  %v795_v32 = vsel %vm746_vm1, %v4008_v30, 0.0 }
 0x121   :  { %v915_v47 = vsel %vm746_vm1, %v4012_v42, 0.0  ;;  %v4027_v56 = vadd.f32 %v795_v32, %v4000_v60  ;;  %v1071_v22 = vmul.f32 %v4003_v45, %v4003_v45 }
 0x122   :  { %v4030_v55 = vadd.f32 %v915_v47, %v4003_v45  ;;  %v4034_v11 = vpop.f32.mrb[26].mxu0  ;;  %v4036_v10 = vpop.f32.mrb[26].mxu1  ;;  %v1155_v2 = vsel %vm746_vm1, %v1012_v38, 0.0  ;;  %v1275_v30 = vsel %vm746_vm1, %v1072_v31, 0.0 }
 0x123   :  { %6429 = vst [vmem:[#allocation54_spill] sm:$0xff] %v4034_v11  ;;  %6430 = vst [vmem:[#allocation55_spill] sm:$0xff] %v4036_v10  ;;  %1249 = vadd.xlane.f32.xlu1 %v3811_v58  ;;  %773 = vadd.xlane.f32.xlu0 %v3824_v1  ;;  %v4042_v32 = vpop.f32.mrb[27].mxu0  ;;  %v4044_v42 = vpop.f32.mrb[27].mxu1  ;;  %v4046_v47 = vadd.f32 %v1155_v2, %v1011_v12  ;;  %v4048_v60 = vadd.f32 %v1275_v30, %v1071_v22 }
 0x124   :  { %6431 = vst [vmem:[#allocation56_spill] sm:$0xff] %v4042_v32  ;;  %6432 = vst [vmem:[#allocation57_spill] sm:$0xff] %v4044_v42  ;;  %v1013_v45 = vmul.f32 %v4034_v11, %v4034_v11  ;;  %v1014_v38 = vmul.f32 %v4042_v32, %v4042_v32  ;;  %v1074_v31 = vmul.f32 %v4044_v42, %v4044_v42  ;;  %v799_v58 = vsel %vm746_vm1, %v4042_v32, 0.0 }
 0x125   :  { %v919_v1 = vsel %vm746_vm1, %v4044_v42, 0.0  ;;  %v4061_v2 = vadd.f32 %v799_v58, %v4034_v11  ;;  %v1073_v30 = vmul.f32 %v4036_v10, %v4036_v10 }
 0x126   :  { %v4064_v12 = vadd.f32 %v919_v1, %v4036_v10  ;;  %v4068_v22 = vpop.f32.mrb[28].mxu0  ;;  %v1159_v26 = vsel %vm746_vm1, %v1014_v38, 0.0  ;;  %v4071_v14 = vpop.f32.mrb[28].mxu1  ;;  %v1279_v32 = vsel %vm746_vm1, %v1074_v31, 0.0 }
 0x127   :  { %6433 = vst [vmem:[#allocation58_spill] sm:$0xff] %v4068_v22  ;;  %6434 = vst [vmem:[#allocation59_spill] sm:$0xff] %v4071_v14  ;;  %893 = vadd.xlane.f32.xlu0 %v3827_v4  ;;  %777 = vadd.xlane.f32.xlu1 %v3857_v40  ;;  %v4076_v58 = vpop.f32.mrb[29].mxu0  ;;  %v4078_v42 = vadd.f32 %v1159_v26, %v1013_v45  ;;  %v4080_v1 = vpop.f32.mrb[29].mxu1  ;;  %v4082_v11 = vadd.f32 %v1279_v32, %v1073_v30 }
 0x128   :  { %6435 = vst [vmem:[#allocation60_spill] sm:$0xff] %v4076_v58  ;;  %6436 = vst [vmem:[#allocation61_spill] sm:$0xff] %v4080_v1  ;;  %v1015_v10 = vmul.f32 %v4068_v22, %v4068_v22  ;;  %v1016_v38 = vmul.f32 %v4076_v58, %v4076_v58  ;;  %v1076_v31 = vmul.f32 %v4080_v1, %v4080_v1  ;;  %v803_v4 = vsel %vm746_vm1, %v4076_v58, 0.0 }
 0x129   :  { %v923_v26 = vsel %vm746_vm1, %v4080_v1, 0.0  ;;  %v4095_v40 = vadd.f32 %v803_v4, %v4068_v22  ;;  %v1075_v32 = vmul.f32 %v4071_v14, %v4071_v14 }
 0x12a   :  { %v4098_v45 = vadd.f32 %v923_v26, %v4071_v14  ;;  %v4102_v30 = vpop.f32.mrb[30].mxu0  ;;  %v4104_v3 = vpop.f32.mrb[30].mxu1  ;;  %v1163_v0 = vsel %vm746_vm1, %v1016_v38, 0.0  ;;  %v1283_v58 = vsel %vm746_vm1, %v1076_v31, 0.0 }
 0x12b   :  { %6437 = vst [vmem:[#allocation62_spill] sm:$0xff] %v4102_v30  ;;  %6438 = vst [vmem:[#allocation63_spill] sm:$0xff] %v4104_v3  ;;  %1133 = vadd.xlane.f32.xlu0 %v3842_v27  ;;  %897 = vadd.xlane.f32.xlu1 %v3860_v43  ;;  %v4110_v4 = vpop.f32.mrb[31].mxu0  ;;  %v4112_v1 = vpop.f32.mrb[31].mxu1  ;;  %v4114_v26 = vadd.f32 %v1163_v0, %v1015_v10  ;;  %v4116_v22 = vadd.f32 %v1283_v58, %v1075_v32 }
 0x12c   :  { %6439 = vst [vmem:[#allocation64_spill] sm:$0xff] %v4110_v4  ;;  %6440 = vst [vmem:[#allocation65_spill] sm:$0xff] %v4112_v1  ;;  %v1017_v14 = vmul.f32 %v4102_v30, %v4102_v30  ;;  %v1018_v38 = vmul.f32 %v4110_v4, %v4110_v4  ;;  %v1078_v31 = vmul.f32 %v4112_v1, %v4112_v1  ;;  %v807_v27 = vsel %vm746_vm1, %v4110_v4, 0.0 }
 0x12d   :  { %v927_v43 = vsel %vm746_vm1, %v4112_v1, 0.0  ;;  %v4129_v0 = vadd.f32 %v807_v27, %v4102_v30  ;;  %v1077_v58 = vmul.f32 %v4104_v3, %v4104_v3 }
 0x12e   :  { %v4132_v10 = vadd.f32 %v927_v43, %v4104_v3  ;;  %v4136_v32 = vpop.f32.mrb[32].mxu0  ;;  %v1167_v28 = vsel %vm746_vm1, %v1018_v38, 0.0  ;;  %v4139_v24 = vpop.f32.mrb[32].mxu1  ;;  %v1287_v4 = vsel %vm746_vm1, %v1078_v31, 0.0 }
 0x12f   :  { %6441 = vst [vmem:[#allocation66_spill] sm:$0xff] %v4136_v32  ;;  %6442 = vst [vmem:[#allocation67_spill] sm:$0xff] %v4139_v24  ;;  %1253 = vadd.xlane.f32.xlu0 %v3844_v34  ;;  %1137 = vadd.xlane.f32.xlu1 %v3874_v61  ;;  %v4144_v27 = vpop.f32.mrb[33].mxu0  ;;  %v4146_v1 = vadd.f32 %v1167_v28, %v1017_v14  ;;  %v4148_v43 = vpop.f32.mrb[33].mxu1  ;;  %v4150_v30 = vadd.f32 %v1287_v4, %v1077_v58 }
 0x130   :  { %6443 = vst [vmem:[#allocation68_spill] sm:$0xff] %v4144_v27  ;;  %6444 = vst [vmem:[#allocation69_spill] sm:$0xff] %v4148_v43  ;;  %v1019_v3 = vmul.f32 %v4136_v32, %v4136_v32  ;;  %v1020_v38 = vmul.f32 %v4144_v27, %v4144_v27  ;;  %v1080_v31 = vmul.f32 %v4148_v43, %v4148_v43  ;;  %v811_v34 = vsel %vm746_vm1, %v4144_v27, 0.0 }
 0x131   :  { %v931_v28 = vsel %vm746_vm1, %v4148_v43, 0.0  ;;  %v4163_v14 = vadd.f32 %v811_v34, %v4136_v32  ;;  %v1079_v4 = vmul.f32 %v4139_v24, %v4139_v24 }
 0x132   :  { %v4166_v61 = vadd.f32 %v931_v28, %v4139_v24  ;;  %v4170_v58 = vpop.f32.mrb[34].mxu0  ;;  %v4172_v29 = vpop.f32.mrb[34].mxu1  ;;  %v1171_v25 = vsel %vm746_vm1, %v1020_v38, 0.0  ;;  %v1291_v27 = vsel %vm746_vm1, %v1080_v31, 0.0 }
 0x133   :  { %6445 = vst [vmem:[#allocation70_spill] sm:$0xff] %v4170_v58  ;;  %6446 = vst [vmem:[#allocation71_spill] sm:$0xff] %v4172_v29  ;;  %1257 = vadd.xlane.f32.xlu1 %v3878_v15  ;;  %781 = vadd.xlane.f32.xlu0 %v3891_v36  ;;  %v4178_v34 = vpop.f32.mrb[35].mxu0  ;;  %v4180_v43 = vpop.f32.mrb[35].mxu1  ;;  %v4182_v28 = vadd.f32 %v1171_v25, %v1019_v3  ;;  %v4184_v32 = vadd.f32 %v1291_v27, %v1079_v4 }
 0x134   :  { %6447 = vst [vmem:[#allocation72_spill] sm:$0xff] %v4178_v34  ;;  %6448 = vst [vmem:[#allocation73_spill] sm:$0xff] %v4180_v43  ;;  %v1021_v24 = vmul.f32 %v4170_v58, %v4170_v58  ;;  %v1022_v38 = vmul.f32 %v4178_v34, %v4178_v34  ;;  %v1082_v31 = vmul.f32 %v4180_v43, %v4180_v43  ;;  %v815_v15 = vsel %vm746_vm1, %v4178_v34, 0.0 }
 0x135   :  { %v935_v36 = vsel %vm746_vm1, %v4180_v43, 0.0  ;;  %v4197_v3 = vadd.f32 %v815_v15, %v4170_v58  ;;  %v1081_v27 = vmul.f32 %v4172_v29, %v4172_v29 }
 0x136   :  { %v4200_v25 = vadd.f32 %v935_v36, %v4172_v29  ;;  %v4204_v4 = vpop.f32.mrb[36].mxu0  ;;  %v1175_v39 = vsel %vm746_vm1, %v1022_v38, 0.0  ;;  %v4207_v35 = vpop.f32.mrb[36].mxu1  ;;  %v1295_v34 = vsel %vm746_vm1, %v1082_v31, 0.0 }
 0x137   :  { %6449 = vst [vmem:[#allocation74_spill] sm:$0xff] %v4204_v4  ;;  %6450 = vst [vmem:[#allocation75_spill] sm:$0xff] %v4207_v35  ;;  %901 = vadd.xlane.f32.xlu0 %v3894_v54  ;;  %785 = vadd.xlane.f32.xlu1 %v3925_v18  ;;  %v4212_v15 = vpop.f32.mrb[37].mxu0  ;;  %v4214_v43 = vadd.f32 %v1175_v39, %v1021_v24  ;;  %v4216_v36 = vpop.f32.mrb[37].mxu1  ;;  %v4218_v58 = vadd.f32 %v1295_v34, %v1081_v27 }
 0x138   :  { %6451 = vst [vmem:[#allocation76_spill] sm:$0xff] %v4212_v15  ;;  %6452 = vst [vmem:[#allocation77_spill] sm:$0xff] %v4216_v36  ;;  %v1023_v29 = vmul.f32 %v4204_v4, %v4204_v4  ;;  %v1024_v38 = vmul.f32 %v4212_v15, %v4212_v15  ;;  %v1084_v31 = vmul.f32 %v4216_v36, %v4216_v36  ;;  %v819_v54 = vsel %vm746_vm1, %v4212_v15, 0.0 }
 0x139   :  { %v939_v39 = vsel %vm746_vm1, %v4216_v36, 0.0  ;;  %v4231_v24 = vadd.f32 %v819_v54, %v4204_v4  ;;  %v1083_v34 = vmul.f32 %v4207_v35, %v4207_v35 }
 0x13a   :  { %v4234_v18 = vadd.f32 %v939_v39, %v4207_v35  ;;  %v4238_v27 = vpop.f32.mrb[38].mxu0  ;;  %v4240_v37 = vpop.f32.mrb[38].mxu1  ;;  %v1179_v33 = vsel %vm746_vm1, %v1024_v38, 0.0  ;;  %v1299_v15 = vsel %vm746_vm1, %v1084_v31, 0.0 }
 0x13b   :  { %6453 = vst [vmem:[#allocation78_spill] sm:$0xff] %v4238_v27  ;;  %6454 = vst [vmem:[#allocation79_spill] sm:$0xff] %v4240_v37  ;;  %1141 = vadd.xlane.f32.xlu0 %v3910_v9  ;;  %905 = vadd.xlane.f32.xlu1 %v3928_v46  ;;  %v4246_v54 = vpop.f32.mrb[39].mxu0  ;;  %v4248_v36 = vpop.f32.mrb[39].mxu1  ;;  %v4250_v39 = vadd.f32 %v1179_v33, %v1023_v29  ;;  %v4252_v4 = vadd.f32 %v1299_v15, %v1083_v34 }
 0x13c   :  { %6455 = vst [vmem:[#allocation80_spill] sm:$0xff] %v4246_v54  ;;  %6456 = vst [vmem:[#allocation81_spill] sm:$0xff] %v4248_v36  ;;  %v1025_v35 = vmul.f32 %v4238_v27, %v4238_v27  ;;  %v1026_v38 = vmul.f32 %v4246_v54, %v4246_v54  ;;  %v1086_v31 = vmul.f32 %v4248_v36, %v4248_v36  ;;  %v823_v9 = vsel %vm746_vm1, %v4246_v54, 0.0 }
 0x13d   :  { %v943_v46 = vsel %vm746_vm1, %v4248_v36, 0.0  ;;  %v4265_v33 = vadd.f32 %v823_v9, %v4238_v27  ;;  %v1085_v15 = vmul.f32 %v4240_v37, %v4240_v37 }
 0x13e   :  { %v4268_v29 = vadd.f32 %v943_v46, %v4240_v37  ;;  %v4272_v34 = vpop.f32.mrb[40].mxu0  ;;  %v1183_v52 = vsel %vm746_vm1, %v1026_v38, 0.0  ;;  %v4275_v48 = vpop.f32.mrb[40].mxu1  ;;  %v1303_v54 = vsel %vm746_vm1, %v1086_v31, 0.0 }
 0x13f   :  { %6457 = vst [vmem:[#allocation82_spill] sm:$0xff] %v4272_v34  ;;  %6458 = vst [vmem:[#allocation83_spill] sm:$0xff] %v4275_v48  ;;  %1261 = vadd.xlane.f32.xlu0 %v3912_v50  ;;  %1145 = vadd.xlane.f32.xlu1 %v3942_v44  ;;  %v4280_v9 = vpop.f32.mrb[41].mxu0  ;;  %v4282_v36 = vadd.f32 %v1183_v52, %v1025_v35  ;;  %v4284_v46 = vpop.f32.mrb[41].mxu1  ;;  %v4286_v27 = vadd.f32 %v1303_v54, %v1085_v15 }
 0x140   :  { %6459 = vst [vmem:[#allocation84_spill] sm:$0xff] %v4280_v9  ;;  %6460 = vst [vmem:[#allocation85_spill] sm:$0xff] %v4284_v46  ;;  %v1027_v37 = vmul.f32 %v4272_v34, %v4272_v34  ;;  %v1028_v38 = vmul.f32 %v4280_v9, %v4280_v9  ;;  %v1088_v31 = vmul.f32 %v4284_v46, %v4284_v46  ;;  %v827_v44 = vsel %vm746_vm1, %v4280_v9, 0.0 }
 0x141   :  { %v947_v35 = vsel %vm746_vm1, %v4284_v46, 0.0  ;;  %v4299_v52 = vadd.f32 %v827_v44, %v4272_v34  ;;  %v1087_v54 = vmul.f32 %v4275_v48, %v4275_v48 }
 0x142   :  { %v4302_v50 = vadd.f32 %v947_v35, %v4275_v48  ;;  %v4306_v15 = vpop.f32.mrb[42].mxu0  ;;  %v4308_v53 = vpop.f32.mrb[42].mxu1  ;;  %v1187_v49 = vsel %vm746_vm1, %v1028_v38, 0.0  ;;  %v1307_v9 = vsel %vm746_vm1, %v1088_v31, 0.0 }
 0x143   :  { %6461 = vst [vmem:[#allocation86_spill] sm:$0xff] %v4306_v15  ;;  %6462 = vst [vmem:[#allocation87_spill] sm:$0xff] %v4308_v53  ;;  %1265 = vadd.xlane.f32.xlu1 %v3946_v23  ;;  %789 = vadd.xlane.f32.xlu0 %v3959_v57  ;;  %v4314_v44 = vpop.f32.mrb[43].mxu0  ;;  %v4316_v46 = vpop.f32.mrb[43].mxu1  ;;  %v4318_v35 = vadd.f32 %v1187_v49, %v1027_v37  ;;  %v4320_v34 = vadd.f32 %v1307_v9, %v1087_v54 }
 0x144   :  { %6463 = vst [vmem:[#allocation88_spill] sm:$0xff] %v4314_v44  ;;  %6464 = vst [vmem:[#allocation89_spill] sm:$0xff] %v4316_v46  ;;  %v1029_v48 = vmul.f32 %v4306_v15, %v4306_v15  ;;  %v1030_v38 = vmul.f32 %v4314_v44, %v4314_v44  ;;  %v1090_v31 = vmul.f32 %v4316_v46, %v4316_v46  ;;  %v831_v23 = vsel %vm746_vm1, %v4314_v44, 0.0 }
 0x145   :  { %v951_v57 = vsel %vm746_vm1, %v4316_v46, 0.0  ;;  %v4333_v37 = vadd.f32 %v831_v23, %v4306_v15  ;;  %v1089_v9 = vmul.f32 %v4308_v53, %v4308_v53 }
 0x146   :  { %v4336_v49 = vadd.f32 %v951_v57, %v4308_v53  ;;  %v4340_v54 = vpop.f32.mrb[44].mxu0  ;;  %v1191_v20 = vsel %vm746_vm1, %v1030_v38, 0.0  ;;  %v4343_v17 = vpop.f32.mrb[44].mxu1  ;;  %v1311_v44 = vsel %vm746_vm1, %v1090_v31, 0.0 }
 0x147   :  { %6465 = vst [vmem:[#allocation90_spill] sm:$0xff] %v4340_v54  ;;  %6466 = vst [vmem:[#allocation91_spill] sm:$0xff] %v4343_v17  ;;  %909 = vadd.xlane.f32.xlu0 %v3962_v51  ;;  %793 = vadd.xlane.f32.xlu1 %v3993_v13  ;;  %v4348_v23 = vpop.f32.mrb[45].mxu0  ;;  %v4350_v46 = vadd.f32 %v1191_v20, %v1029_v48  ;;  %v4352_v57 = vpop.f32.mrb[45].mxu1  ;;  %v4354_v15 = vadd.f32 %v1311_v44, %v1089_v9 }
 0x148   :  { %6467 = vst [vmem:[#allocation92_spill] sm:$0xff] %v4348_v23  ;;  %6468 = vst [vmem:[#allocation93_spill] sm:$0xff] %v4352_v57  ;;  %v1031_v53 = vmul.f32 %v4340_v54, %v4340_v54  ;;  %v1032_v38 = vmul.f32 %v4348_v23, %v4348_v23  ;;  %v1092_v31 = vmul.f32 %v4352_v57, %v4352_v57  ;;  %v835_v51 = vsel %vm746_vm1, %v4348_v23, 0.0 }
 0x149   :  { %v955_v20 = vsel %vm746_vm1, %v4352_v57, 0.0  ;;  %v4367_v48 = vadd.f32 %v835_v51, %v4340_v54  ;;  %v1091_v44 = vmul.f32 %v4343_v17, %v4343_v17 }
 0x14a   :  { %v4370_v13 = vadd.f32 %v955_v20, %v4343_v17  ;;  %v4374_v9 = vpop.f32.mrb[46].mxu0  ;;  %v4376_v8 = vpop.f32.mrb[46].mxu1  ;;  %v1195_v6 = vsel %vm746_vm1, %v1032_v38, 0.0  ;;  %v1315_v23 = vsel %vm746_vm1, %v1092_v31, 0.0 }
 0x14b   :  { %6469 = vst [vmem:[#allocation94_spill] sm:$0xff] %v4374_v9  ;;  %6470 = vst [vmem:[#allocation95_spill] sm:$0xff] %v4376_v8  ;;  %1149 = vadd.xlane.f32.xlu0 %v3978_v41  ;;  %913 = vadd.xlane.f32.xlu1 %v3996_v59  ;;  %v4382_v51 = vpop.f32.mrb[47].mxu0  ;;  %v4384_v57 = vpop.f32.mrb[47].mxu1  ;;  %v4386_v20 = vadd.f32 %v1195_v6, %v1031_v53  ;;  %v4388_v54 = vadd.f32 %v1315_v23, %v1091_v44 }
 0x14c   :  { %6471 = vst [vmem:[#allocation96_spill] sm:$0xff] %v4382_v51  ;;  %6472 = vst [vmem:[#allocation97_spill] sm:$0xff] %v4384_v57  ;;  %v1033_v17 = vmul.f32 %v4374_v9, %v4374_v9  ;;  %v1034_v38 = vmul.f32 %v4382_v51, %v4382_v51  ;;  %v1094_v31 = vmul.f32 %v4384_v57, %v4384_v57  ;;  %v839_v41 = vsel %vm746_vm1, %v4382_v51, 0.0 }
 0x14d   :  { %v959_v59 = vsel %vm746_vm1, %v4384_v57, 0.0  ;;  %v4401_v6 = vadd.f32 %v839_v41, %v4374_v9  ;;  %v1093_v23 = vmul.f32 %v4376_v8, %v4376_v8 }
 0x14e   :  { %v4404_v53 = vadd.f32 %v959_v59, %v4376_v8  ;;  %v4408_v44 = vpop.f32.mrb[48].mxu0  ;;  %v1199_v21 = vsel %vm746_vm1, %v1034_v38, 0.0  ;;  %v4411_v16 = vpop.f32.mrb[48].mxu1  ;;  %v1319_v51 = vsel %vm746_vm1, %v1094_v31, 0.0 }
 0x14f   :  { %6473 = vst [vmem:[#allocation98_spill] sm:$0xff] %v4408_v44  ;;  %6474 = vst [vmem:[#allocation99_spill] sm:$0xff] %v4411_v16  ;;  %1269 = vadd.xlane.f32.xlu0 %v3980_v63  ;;  %1153 = vadd.xlane.f32.xlu1 %v4010_v19  ;;  %v1035_v41 = vmul.f32 %v4408_v44, %v4408_v44  ;;  %v4418_v59 = vpop.f32.mrb[49].mxu0  ;;  %v4420_v57 = vadd.f32 %v1199_v21, %v1033_v17  ;;  %v4422_v8 = vpop.f32.mrb[49].mxu1 }
 0x150   :  { %6475 = vst [vmem:[#allocation100_spill] sm:$0xff] %v4418_v59  ;;  %6477 = vst [vmem:[#allocation102_spill] sm:$0xff] %v4422_v8  ;;  %v1036_v38 = vmul.f32 %v4418_v59, %v4418_v59  ;;  %v963_v9 = vsel %vm746_vm1, %v4422_v8, 0.0  ;;  %v1096_v63 = vmul.f32 %v4422_v8, %v4422_v8  ;;  %v4430_v31 = vadd.f32 %v1319_v51, %v1093_v23 }
 0x151   :  { %6476 = vst [vmem:[#allocation101_spill] sm:$0xff] %v4420_v57  ;;  %v1095_v19 = vmul.f32 %v4411_v16, %v4411_v16  ;;  %v843_v17 = vsel %vm746_vm1, %v4418_v59, 0.0  ;;  %v4437_v21 = vadd.f32 %v963_v9, %v4411_v16 }
 0x152   :  { %v4439_v7 = vpop.f32.mrb[50].mxu0  ;;  %v4442_v5 = vadd.f32 %v843_v17, %v4408_v44  ;;  %v4444_v57 = vpop.f32.mrb[50].mxu1  ;;  %v1203_v8 = vsel %vm746_vm1, %v1036_v38, 0.0  ;;  %v1323_v51 = vsel %vm746_vm1, %v1096_v63, 0.0 }
 0x153   :  { %6478 = vst [vmem:[#allocation103_spill] sm:$0xff] %v4437_v21  ;;  %6479 = vst [vmem:[#allocation104_spill] sm:$0xff] %v4439_v7  ;;  %1273 = vadd.xlane.f32.xlu1 %v4014_v62  ;;  %797 = vadd.xlane.f32.xlu0 %v4027_v56  ;;  %v1037_v23 = vmul.f32 %v4439_v7, %v4439_v7  ;;  %v4452_v9 = vpop.f32.mrb[51].mxu0  ;;  %v4454_v16 = vpop.f32.mrb[51].mxu1  ;;  %v4456_v59 = vadd.f32 %v1203_v8, %v1035_v41 }
 0x154   :  { %6480 = vst [vmem:[#allocation105_spill] sm:$0xff] %v4442_v5  ;;  %6481 = vst [vmem:[#allocation106_spill] sm:$0xff] %v4444_v57  ;;  %v1038_v17 = vmul.f32 %v4452_v9, %v4452_v9  ;;  %v967_v38 = vsel %vm746_vm1, %v4454_v16, 0.0  ;;  %v1098_v62 = vmul.f32 %v4454_v16, %v4454_v16  ;;  %v847_v56 = vsel %vm746_vm1, %v4452_v9, 0.0 }
 0x155   :  { %6482 = vst [vmem:[#allocation107_spill] sm:$0xff] %v4452_v9  ;;  %6483 = vst [vmem:[#allocation108_spill] sm:$0xff] %v4454_v16  ;;  %v1097_v63 = vmul.f32 %v4444_v57, %v4444_v57  ;;  %v4469_v44 = vadd.f32 %v847_v56, %v4439_v7  ;;  %v4472_v8 = vadd.f32 %v967_v38, %v4444_v57 }
 0x156   :  { %6484 = vst [vmem:[#allocation109_spill] sm:$0xff] %v4456_v59  ;;  %v4474_v41 = vadd.f32 %v1323_v51, %v1095_v19  ;;  %v4476_v59 = vpop.f32.mrb[52].mxu0  ;;  %v1207_v21 = vsel %vm746_vm1, %v1038_v17, 0.0  ;;  %v4479_v5 = vpop.f32.mrb[52].mxu1  ;;  %v1327_v16 = vsel %vm746_vm1, %v1098_v62, 0.0 }
 0x157   :  { %6486 = vst [vmem:[#allocation111_spill] sm:$0xff] %v4476_v59  ;;  %6487 = vst [vmem:[#allocation112_spill] sm:$0xff] %v4479_v5  ;;  %917 = vadd.xlane.f32.xlu0 %v4030_v55  ;;  %801 = vadd.xlane.f32.xlu1 %v4061_v2  ;;  %v1039_v56 = vmul.f32 %v4476_v59, %v4476_v59  ;;  %v4486_v9 = vpop.f32.mrb[53].mxu0  ;;  %v4488_v38 = vadd.f32 %v1207_v21, %v1037_v23  ;;  %v4490_v19 = vpop.f32.mrb[53].mxu1 }
 0x158   :  { %6485 = vst [vmem:[#allocation110_spill] sm:$0xff] %v4474_v41  ;;  %6488 = vst [vmem:[#allocation113_spill] sm:$0xff] %v4486_v9  ;;  %v851_v51 = vsel %vm746_vm1, %v4486_v9, 0.0  ;;  %v1040_v17 = vmul.f32 %v4486_v9, %v4486_v9  ;;  %v971_v55 = vsel %vm746_vm1, %v4490_v19, 0.0  ;;  %v1100_v2 = vmul.f32 %v4490_v19, %v4490_v19 }
 0x159   :  { %6489 = vst [vmem:[#allocation114_spill] sm:$0xff] %v4488_v38  ;;  %6490 = vst [vmem:[#allocation115_spill] sm:$0xff] %v4490_v19  ;;  %v1099_v62 = vmul.f32 %v4479_v5, %v4479_v5  ;;  %v4502_v57 = vadd.f32 %v1327_v16, %v1097_v63  ;;  %v4505_v21 = vadd.f32 %v851_v51, %v4476_v59 }
 0x15a   :  { %v4508_v23 = vadd.f32 %v971_v55, %v4479_v5  ;;  %v4510_v7 = vpop.f32.mrb[54].mxu0  ;;  %v4512_v9 = vpop.f32.mrb[54].mxu1  ;;  %v1211_v38 = vsel %vm746_vm1, %v1040_v17, 0.0  ;;  %v1331_v41 = vsel %vm746_vm1, %v1100_v2, 0.0 }
 0x15b   :  { %6492 = vst [vmem:[#allocation117_spill] sm:$0xff] %v4510_v7  ;;  %6493 = vst [vmem:[#allocation118_spill] sm:$0xff] %v4512_v9  ;;  %1157 = vadd.xlane.f32.xlu0 %v4046_v47  ;;  %921 = vadd.xlane.f32.xlu1 %v4064_v12  ;;  %v1041_v16 = vmul.f32 %v4510_v7, %v4510_v7  ;;  %v4520_v63 = vpop.f32.mrb[55].mxu0  ;;  %v4522_v51 = vpop.f32.mrb[55].mxu1  ;;  %v4524_v55 = vadd.f32 %v1211_v38, %v1039_v56 }
 0x15c   :  { %6491 = vst [vmem:[#allocation116_spill] sm:$0xff] %v4508_v23  ;;  %6494 = vst [vmem:[#allocation119_spill] sm:$0xff] %v4520_v63  ;;  %v855_v19 = vsel %vm746_vm1, %v4520_v63, 0.0  ;;  %v1042_v17 = vmul.f32 %v4520_v63, %v4520_v63  ;;  %v975_v47 = vsel %vm746_vm1, %v4522_v51, 0.0  ;;  %v1102_v12 = vmul.f32 %v4522_v51, %v4522_v51 }
 0x15d   :  { %6495 = vst [vmem:[#allocation120_spill] sm:$0xff] %v4522_v51  ;;  %6496 = vst [vmem:[#allocation121_spill] sm:$0xff] %v4524_v55  ;;  %v1101_v2 = vmul.f32 %v4512_v9, %v4512_v9  ;;  %v4537_v5 = vadd.f32 %v855_v19, %v4510_v7  ;;  %v4540_v56 = vadd.f32 %v975_v47, %v4512_v9 }
 0x15e   :  { %v4542_v38 = vadd.f32 %v1331_v41, %v1099_v62  ;;  %v4544_v59 = vpop.f32.mrb[56].mxu0  ;;  %v1215_v63 = vsel %vm746_vm1, %v1042_v17, 0.0  ;;  %v4547_v55 = vpop.f32.mrb[56].mxu1  ;;  %v1335_v23 = vsel %vm746_vm1, %v1102_v12, 0.0 }
 0x15f   :  { %6498 = vst [vmem:[#allocation123_spill] sm:$0xff] %v4544_v59  ;;  %6499 = vst [vmem:[#allocation124_spill] sm:$0xff] %v4547_v55  ;;  %1277 = vadd.xlane.f32.xlu0 %v4048_v60  ;;  %1161 = vadd.xlane.f32.xlu1 %v4078_v42  ;;  %v1043_v19 = vmul.f32 %v4544_v59, %v4544_v59  ;;  %v4554_v51 = vpop.f32.mrb[57].mxu0  ;;  %v4556_v47 = vadd.f32 %v1215_v63, %v1041_v16  ;;  %v4558_v41 = vpop.f32.mrb[57].mxu1 }
 0x160   :  { %6497 = vst [vmem:[#allocation122_spill] sm:$0xff] %v4542_v38  ;;  %6500 = vst [vmem:[#allocation125_spill] sm:$0xff] %v4554_v51  ;;  %v859_v62 = vsel %vm746_vm1, %v4554_v51, 0.0  ;;  %v1044_v17 = vmul.f32 %v4554_v51, %v4554_v51  ;;  %v979_v60 = vsel %vm746_vm1, %v4558_v41, 0.0  ;;  %v1104_v42 = vmul.f32 %v4558_v41, %v4558_v41 }
 0x161   :  { %6501 = vst [vmem:[#allocation126_spill] sm:$0xff] %v4556_v47  ;;  %6502 = vst [vmem:[#allocation127_spill] sm:$0xff] %v4558_v41  ;;  %v1103_v12 = vmul.f32 %v4547_v55, %v4547_v55  ;;  %v4570_v9 = vadd.f32 %v1335_v23, %v1101_v2  ;;  %v4573_v16 = vadd.f32 %v859_v62, %v4544_v59 }
 0x162   :  { %v4576_v63 = vadd.f32 %v979_v60, %v4547_v55  ;;  %v4578_v7 = vpop.f32.mrb[58].mxu0  ;;  %v4580_v51 = vpop.f32.mrb[58].mxu1  ;;  %v1219_v47 = vsel %vm746_vm1, %v1044_v17, 0.0  ;;  %v1339_v38 = vsel %vm746_vm1, %v1104_v42, 0.0 }
 0x163   :  { %6504 = vst [vmem:[#allocation129_spill] sm:$0xff] %v4578_v7  ;;  %6505 = vst [vmem:[#allocation130_spill] sm:$0xff] %v4580_v51  ;;  %1281 = vadd.xlane.f32.xlu1 %v4082_v11  ;;  %805 = vadd.xlane.f32.xlu0 %v4095_v40  ;;  %v1045_v23 = vmul.f32 %v4578_v7, %v4578_v7  ;;  %v4588_v2 = vpop.f32.mrb[59].mxu0  ;;  %v1105_v62 = vmul.f32 %v4580_v51, %v4580_v51  ;;  %v4592_v60 = vpop.f32.mrb[59].mxu1 }
 0x164   :  { %6503 = vst [vmem:[#allocation128_spill] sm:$0xff] %v4576_v63  ;;  %6506 = vst [vmem:[#allocation131_spill] sm:$0xff] %v4588_v2  ;;  %v4594_v41 = vadd.f32 %v1219_v47, %v1043_v19  ;;  %v863_v17 = vsel %vm746_vm1, %v4588_v2, 0.0  ;;  %v1046_v11 = vmul.f32 %v4588_v2, %v4588_v2  ;;  %v983_v40 = vsel %vm746_vm1, %v4592_v60, 0.0 }
 0x165   :  { %6507 = vst [vmem:[#allocation132_spill] sm:$0xff] %v4592_v60  ;;  %v1106_v42 = vmul.f32 %v4592_v60, %v4592_v60  ;;  %v4605_v55 = vadd.f32 %v863_v17, %v4578_v7  ;;  %v4608_v59 = vadd.f32 %v983_v40, %v4580_v51  ;;  %v4610_v19 = vadd.f32 %v1339_v38, %v1103_v12  ;;  %v1827_v60 = vld [vmem:[%s6255_s4] sm:$0xff]  ;;  %v1828_v51 = vld [vmem:[%s6255_s4 + $0x8] sm:$0xff] }
 0x166   :  { %6508 = vst [vmem:[#allocation133_spill] sm:$0xff] %v4594_v41  ;;  %v1223_v47 = vsel %vm746_vm1, %v1046_v11, 0.0  ;;  %v3186_v38 = vmov 0  }
 0x167   :  { %v1343_v41 = vsel %vm746_vm1, %v1106_v42, 0.0  ;;  %925 = vadd.xlane.f32.xlu0 %v4098_v45  ;;  %809 = vadd.xlane.f32.xlu1 %v4129_v0  ;;  %v4616_v2 = vadd.f32 %v1223_v47, %v1045_v23 }
 0x168   :  { %v4618_v63 = vadd.f32 %v1343_v41, %v1105_v62  ;;  %3064 = vset.pattern.permute.xlu1 %v3186_v38  ;;  %3063 = vset.pattern.permute.xlu0 %v3186_v38 }
 0x16b   :  { %1165 = vadd.xlane.f32.xlu0 %v4114_v26  ;;  %929 = vadd.xlane.f32.xlu1 %v4132_v10 }
 0x16f   :  { %1285 = vadd.xlane.f32.xlu0 %v4116_v22  ;;  %1169 = vadd.xlane.f32.xlu1 %v4146_v1 }
 0x173   :  { %1289 = vadd.xlane.f32.xlu1 %v4150_v30  ;;  %813 = vadd.xlane.f32.xlu0 %v4163_v14 }
 0x177   :  { %933 = vadd.xlane.f32.xlu0 %v4166_v61  ;;  %817 = vadd.xlane.f32.xlu1 %v4197_v3 }
 0x17b   :  { %1173 = vadd.xlane.f32.xlu0 %v4182_v28  ;;  %937 = vadd.xlane.f32.xlu1 %v4200_v25 }
 0x17f   :  { %1293 = vadd.xlane.f32.xlu0 %v4184_v32  ;;  %1177 = vadd.xlane.f32.xlu1 %v4214_v43 }
 0x180   :  { %v750_v22 = vpop.xlane.xlu0 %749 }
 0x181   :  { %v1347_v30 = vmul.f32 0.0051020407, %v750_v22  ;;  %v1707_v22 = vld [vmem:[%s6254_s3] sm:$0xff] }
 0x183   :  { %1297 = vadd.xlane.f32.xlu1 %v4218_v58  ;;  %821 = vadd.xlane.f32.xlu0 %v4231_v24  ;;  %v1467_v14 = vmul.f32 %v1347_v30, %v1347_v30 }
 0x184   :  { %v874_v1 = vpop.xlane.xlu1 %873  ;;  %v870_v45 = vpop.xlane.xlu0 %869 }
 0x185   :  { %v4636_v26 = vmul.f32 0.0051020407, %v874_v1  ;;  %v4638_v32 = vmul.f32 0.0051020407, %v870_v45 }
 0x187   :  { %941 = vadd.xlane.f32.xlu0 %v4234_v18  ;;  %825 = vadd.xlane.f32.xlu1 %v4265_v33  ;;  %v1498_v58 = vmul.f32 %v4636_v26, %v4636_v26  ;;  %v1497_v25 = vmul.f32 %v4638_v32, %v4638_v32 }
 0x188   :  { %v1110_v0 = vpop.xlane.xlu0 %1109  ;;  %v1114_v10 = vpop.xlane.xlu1 %1113 }
 0x189   :  { %v1407_v43 = vmul.f32 0.0051020407, %v1110_v0  ;;  %v1408_v11 = vmul.f32 0.0051020407, %v1114_v10 }
 0x18b   :  { %v1527_v61 = vsub.f32 %v1407_v43, %v1467_v14  ;;  %1181 = vadd.xlane.f32.xlu0 %v4250_v39  ;;  %945 = vadd.xlane.f32.xlu1 %v4268_v29 }
 0x18c   :  { %v1230_v28 = vpop.xlane.xlu0 %1229  ;;  %v1234_v3 = vpop.xlane.xlu1 %1233 }
 0x18d   :  { %v1587_v24 = vadd.f32 1e-05, %v1527_v61  ;;  %v1437_v18 = vmul.f32 0.0051020407, %v1230_v28  ;;  %v1438_v33 = vmul.f32 0.0051020407, %v1234_v3 }
 0x18f   :  { %3065 = vrsqrt.f32 %v1587_v24  ;;  %v1557_v41 = vsub.f32 %v1437_v18, %v1497_v25  ;;  %v1558_v12 = vsub.f32 %v1438_v33, %v1498_v58  ;;  %1301 = vadd.xlane.f32.xlu0 %v4252_v4  ;;  %1185 = vadd.xlane.f32.xlu1 %v4282_v36  ;;  %v1738_v25 = vld [vmem:[%s6254_s3 + $0xf8] sm:$0xff] }
 0x190   :  { %v754_v39 = vpop.xlane.xlu0 %753  ;;  %v758_v29 = vpop.xlane.xlu1 %757 }
 0x191   :  { %v1617_v23 = vadd.f32 1e-05, %v1557_v41  ;;  %v1618_v62 = vadd.f32 1e-05, %v1558_v12  ;;  %v4648_v17 = vmul.f32 0.0051020407, %v754_v39 }
 0x192   :  { %v4654_v36 = vmul.f32 0.0051020407, %v758_v29 }
 0x193   :  { %3067 = vrsqrt.f32 %v1617_v23  ;;  %v1468_v40 = vmul.f32 %v4648_v17, %v4648_v17  ;;  %1305 = vadd.xlane.f32.xlu1 %v4286_v27  ;;  %829 = vadd.xlane.f32.xlu0 %v4299_v52 }
 0x194   :  { %3069 = vrsqrt.f32 %v1618_v62  ;;  %v878_v42 = vpop.xlane.xlu0 %877  ;;  %v762_v4 = vpop.xlane.xlu1 %761  ;;  %v1469_v0 = vmul.f32 %v4654_v36, %v4654_v36 }
 0x195   :  { %v1528_v47 = vsub.f32 %v1408_v11, %v1468_v40  ;;  %v4661_v1 = vmul.f32 0.0051020407, %v878_v42  ;;  %v4665_v10 = vmul.f32 0.0051020407, %v762_v4 }
 0x197   :  { %v1588_v38 = vadd.f32 1e-05, %v1528_v47  ;;  %949 = vadd.xlane.f32.xlu0 %v4302_v50  ;;  %833 = vadd.xlane.f32.xlu1 %v4333_v37  ;;  %v1737_v37 = vld [vmem:[%s6254_s3 + $0xf0] sm:$0xff]  ;;  %v1499_v61 = vmul.f32 %v4661_v1, %v4661_v1 }
 0x198   :  { %v1118_v27 = vpop.xlane.xlu0 %1117  ;;  %v882_v45 = vpop.xlane.xlu1 %881 }
 0x199   :  { %v3066_v52 = vpop.eup %3065  ;;  %3071 = vrsqrt.f32 %v1588_v38  ;;  %v1409_v14 = vmul.f32 0.0051020407, %v1118_v27  ;;  %v4676_v58 = vmul.f32 0.0051020407, %v882_v45 }
 0x19a   :  { %v4667_v43 = vmul.f32 %v3066_v52, %v1707_v22 }
 0x19b   :  { %v1529_v50 = vsub.f32 %v1409_v14, %v1469_v0  ;;  %1189 = vadd.xlane.f32.xlu0 %v4318_v35  ;;  %953 = vadd.xlane.f32.xlu1 %v4336_v49  ;;  %v1470_v49 = vmul.f32 %v4665_v10, %v4665_v10  ;;  %v1500_v11 = vmul.f32 %v4676_v58, %v4676_v58 }
 0x19c   :  { %v1238_v28 = vpop.xlane.xlu0 %1237  ;;  %v1122_v3 = vpop.xlane.xlu1 %1121  ;;  %v4682_v24 = vmul.f32 %v4667_v43, %v1347_v30  ;;  %v1708_v30 = vld [vmem:[%s6254_s3 + $0x8] sm:$0xff] }
 0x19d   :  { %v3068_v35 = vpop.eup %3067  ;;  %v1589_v18 = vadd.f32 1e-05, %v1529_v50  ;;  %v1439_v33 = vmul.f32 0.0051020407, %v1238_v28  ;;  %v1410_v41 = vmul.f32 0.0051020407, %v1122_v3 }
 0x19e   :  { %v3070_v12 = vpop.eup %3069  ;;  %v4686_v39 = vmul.f32 %v3068_v35, %v1737_v37 }
 0x19f   :  { %3073 = vrsqrt.f32 %v1589_v18  ;;  %v1559_v29 = vsub.f32 %v1439_v33, %v1499_v61  ;;  %v1530_v23 = vsub.f32 %v1410_v41, %v1470_v49  ;;  %1309 = vadd.xlane.f32.xlu0 %v4320_v34  ;;  %1193 = vadd.xlane.f32.xlu1 %v4350_v46  ;;  %v4690_v62 = vmul.f32 %v3070_v12, %v1738_v25  ;;  %v1710_v49 = vld [vmem:[%s6254_s3 + $0x18] sm:$0xff] }
 0x1a0   :  { %v1242_v40 = vpop.xlane.xlu1 %1241  ;;  %v766_v42 = vpop.xlane.xlu0 %765  ;;  %v4699_v4 = vmul.f32 %v4686_v39, %v4638_v32 }
 0x1a1   :  { %v1619_v47 = vadd.f32 1e-05, %v1559_v29  ;;  %v1590_v38 = vadd.f32 1e-05, %v1530_v23  ;;  %v1440_v34 = vmul.f32 0.0051020407, %v1242_v40  ;;  %v4703_v46 = vmul.f32 %v4690_v62, %v4636_v26 }
 0x1a2   :  { %v1351_v14 = vmul.f32 0.0051020407, %v766_v42 }
 0x1a3   :  { %v3072_v22 = vpop.eup %3071  ;;  %3075 = vrsqrt.f32 %v1619_v47  ;;  %v1560_v27 = vsub.f32 %v1440_v34, %v1500_v11  ;;  %1313 = vadd.xlane.f32.xlu1 %v4354_v15  ;;  %837 = vadd.xlane.f32.xlu0 %v4367_v48  ;;  %v1709_v15 = vld [vmem:[%s6254_s3 + $0x10] sm:$0xff]  ;;  %v1740_v11 = vld [vmem:[%s6254_s3 + $0x108] sm:$0xff] }
 0x1a4   :  { %v4707_v45 = vmul.f32 %v3072_v22, %v1708_v30  ;;  %3077 = vrsqrt.f32 %v1590_v38  ;;  %v4709_v52 = vpop.xlane.xlu0 %885  ;;  %v770_v32 = vpop.xlane.xlu1 %769  ;;  %v1471_v61 = vmul.f32 %v1351_v14, %v1351_v14  ;;  %v6509_v30 = vld [vmem:[#allocation101_spill] sm:$0xff] }
 0x1a5   :  { %v1620_v0 = vadd.f32 1e-05, %v1560_v27  ;;  %v1352_v28 = vmul.f32 0.0051020407, %v770_v32  ;;  %v6510_v27 = vld [vmem:[#allocation105_spill] sm:$0xff] }
 0x1a6   :  { %v4713_v50 = vmul.f32 %v4707_v45, %v4648_v17 }
 0x1a7   :  { %3079 = vrsqrt.f32 %v1620_v0  ;;  %957 = vadd.xlane.f32.xlu0 %v4370_v13  ;;  %841 = vadd.xlane.f32.xlu1 %v4401_v6  ;;  %v1739_v13 = vld [vmem:[%s6254_s3 + $0x100] sm:$0xff]  ;;  %v1472_v41 = vmul.f32 %v1352_v28, %v1352_v28 }
 0x1a8   :  { %v1126_v48 = vpop.xlane.xlu0 %1125  ;;  %v4720_v26 = vpop.xlane.xlu1 %889 }
 0x1a9   :  { %v3074_v37 = vpop.eup %3073  ;;  %v1411_v3 = vmul.f32 0.0051020407, %v1126_v48 }
 0x1aa   :  { %v4722_v25 = vmul.f32 %v3074_v37, %v1709_v15  ;;  %v6511_v15 = vld [vmem:[#allocation103_spill] sm:$0xff] }
 0x1ab   :  { %v1531_v17 = vsub.f32 %v1411_v3, %v1471_v61  ;;  %1197 = vadd.xlane.f32.xlu0 %v4386_v20  ;;  %961 = vadd.xlane.f32.xlu1 %v4404_v53  ;;  %v6512_v3 = vld [vmem:[#allocation109_spill] sm:$0xff] }
 0x1ac   :  { %v4729_v6 = vpop.xlane.xlu0 %1245  ;;  %v1130_v35 = vpop.xlane.xlu1 %1129  ;;  %v4736_v18 = vmul.f32 %v4722_v25, %v4654_v36 }
 0x1ad   :  { %v3076_v33 = vpop.eup %3075  ;;  %v1591_v20 = vadd.f32 1e-05, %v1531_v17  ;;  %v1412_v12 = vmul.f32 0.0051020407, %v1130_v35 }
 0x1ae   :  { %v3078_v53 = vpop.eup %3077  ;;  %v4738_v29 = vmul.f32 %v3076_v33, %v1739_v13  ;;  %v6514_v33 = vld [vmem:[#allocation114_spill] sm:$0xff] }
 0x1af   :  { %3081 = vrsqrt.f32 %v1591_v20  ;;  %v1532_v23 = vsub.f32 %v1412_v12, %v1472_v41  ;;  %1317 = vadd.xlane.f32.xlu0 %v4388_v54  ;;  %1201 = vadd.xlane.f32.xlu1 %v6509_v30  ;;  %v4745_v40 = vmul.f32 %v3078_v53, %v1710_v49  ;;  %v6513_v49 = vld [vmem:[#allocation110_spill] sm:$0xff] }
 0x1b0   :  { %v4747_v36 = vpop.xlane.xlu1 %1249  ;;  %v4749_v42 = vpop.xlane.xlu0 %773  ;;  %v4753_v47 = vmul.f32 %v4738_v29, %v4661_v1 }
 0x1b1   :  { %v3080_v38 = vpop.eup %3079  ;;  %v1592_v34 = vadd.f32 1e-05, %v1532_v23  ;;  %v4757_v54 = vmul.f32 %v4745_v40, %v4665_v10  ;;  %v1711_v10 = vld [vmem:[%s6254_s3 + $0x20] sm:$0xff]  ;;  %v6515_v23 = vld [vmem:[#allocation116_spill] sm:$0xff] }
 0x1b2   :  { %v4759_v22 = vmul.f32 %v3080_v38, %v1740_v11  ;;  %v6516_v38 = vld [vmem:[#allocation121_spill] sm:$0xff] }
 0x1b3   :  { %1321 = vadd.xlane.f32.xlu1 %v4430_v31  ;;  %845 = vadd.xlane.f32.xlu0 %v6510_v27  ;;  %3083 = vrsqrt.f32 %v1592_v34  ;;  %v6518_v34 = vld [vmem:[#allocation126_spill] sm:$0xff] }
 0x1b4   :  { %v4763_v32 = vpop.xlane.xlu0 %893  ;;  %v4765_v0 = vpop.xlane.xlu1 %777  ;;  %v4769_v1 = vmul.f32 %v4759_v22, %v4676_v58 }
 0x1b7   :  { %965 = vadd.xlane.f32.xlu0 %v6511_v15  ;;  %849 = vadd.xlane.f32.xlu1 %v4469_v44  ;;  %v1712_v44 = vld [vmem:[%s6254_s3 + $0x28] sm:$0xff] }
 0x1b8   :  { %v4776_v31 = vpop.xlane.xlu0 %1133  ;;  %v4778_v48 = vpop.xlane.xlu1 %897 }
 0x1b9   :  { %v3082_v37 = vpop.eup %3081 }
 0x1ba   :  { %v4780_v61 = vmul.f32 %v3082_v37, %v1711_v10 }
 0x1bb   :  { %1205 = vadd.xlane.f32.xlu0 %v6512_v3  ;;  %969 = vadd.xlane.f32.xlu1 %v4472_v8 }
 0x1bc   :  { %v4784_v58 = vpop.xlane.xlu0 %1253  ;;  %v4786_v17 = vpop.xlane.xlu1 %1137  ;;  %v4792_v13 = vmul.f32 %v4780_v61, %v1351_v14 }
 0x1bd   :  { %v3084_v35 = vpop.eup %3083 }
 0x1be   :  { %v4796_v41 = vmul.f32 %v3084_v35, %v1712_v44  ;;  %v6520_v44 = vld [vmem:[#allocation133_spill] sm:$0xff] }
 0x1bf   :  { %1325 = vadd.xlane.f32.xlu0 %v6513_v49  ;;  %1209 = vadd.xlane.f32.xlu1 %v6514_v33 }
 0x1c0   :  { %v4798_v20 = vpop.xlane.xlu1 %1257  ;;  %v4800_v8 = vpop.xlane.xlu0 %781  ;;  %v4803_v12 = vmul.f32 %v4796_v41, %v1352_v28 }
 0x1c3   :  { %1329 = vadd.xlane.f32.xlu1 %v4502_v57  ;;  %853 = vadd.xlane.f32.xlu0 %v4505_v21  ;;  %v6517_v21 = vld [vmem:[#allocation122_spill] sm:$0xff] }
 0x1c4   :  { %v4807_v14 = vpop.xlane.xlu0 %901  ;;  %v4809_v53 = vpop.xlane.xlu1 %785 }
 0x1c7   :  { %973 = vadd.xlane.f32.xlu0 %v6515_v23  ;;  %857 = vadd.xlane.f32.xlu1 %v4537_v5 }
 0x1c8   :  { %v4813_v30 = vpop.xlane.xlu0 %1141  ;;  %v4815_v11 = vpop.xlane.xlu1 %905 }
 0x1cb   :  { %1213 = vadd.xlane.f32.xlu0 %v6516_v38  ;;  %977 = vadd.xlane.f32.xlu1 %v4540_v56  ;;  %v6519_v56 = vld [vmem:[#allocation128_spill] sm:$0xff] }
 0x1cc   :  { %v4819_v28 = vpop.xlane.xlu0 %1261  ;;  %v4821_v57 = vpop.xlane.xlu1 %1145 }
 0x1cf   :  { %1333 = vadd.xlane.f32.xlu0 %v6517_v21  ;;  %1217 = vadd.xlane.f32.xlu1 %v6518_v34  ;;  %v4871_v34 = vmul.f32 0.0051020407, %v4720_v26 }
 0x1d0   :  { %v4825_v27 = vpop.xlane.xlu1 %1265  ;;  %v4827_v15 = vpop.xlane.xlu0 %789 }
 0x1d1   :  { %v1502_v26 = vmul.f32 %v4871_v34, %v4871_v34 }
 0x1d3   :  { %1337 = vadd.xlane.f32.xlu1 %v4570_v9  ;;  %861 = vadd.xlane.f32.xlu0 %v4573_v16 }
 0x1d4   :  { %v4831_v5 = vpop.xlane.xlu0 %909  ;;  %v4833_v10 = vpop.xlane.xlu1 %793 }
 0x1d7   :  { %981 = vadd.xlane.f32.xlu0 %v6519_v56  ;;  %865 = vadd.xlane.f32.xlu1 %v4605_v55 }
 0x1d8   :  { %v4837_v37 = vpop.xlane.xlu0 %1149  ;;  %v4839_v3 = vpop.xlane.xlu1 %913 }
 0x1db   :  { %1221 = vadd.xlane.f32.xlu0 %v6520_v44  ;;  %985 = vadd.xlane.f32.xlu1 %v4608_v59  ;;  %v1442_v44 = vmul.f32 0.0051020407, %v4747_v36  ;;  %v1948_v36 = vsub.f32 %v1828_v51, %v4713_v50  ;;  %v1414_v51 = vmul.f32 0.0051020407, %v4786_v17  ;;  %v1441_v17 = vmul.f32 0.0051020407, %v4729_v6 }
 0x1dc   :  { %v4843_v35 = vpop.xlane.xlu0 %1269  ;;  %v4845_v9 = vpop.xlane.xlu1 %1153  ;;  %v1830_v6 = vld [vmem:[%s6255_s4 + $0x18] sm:$0xff] }
 0x1df   :  { %1341 = vadd.xlane.f32.xlu0 %v4610_v19  ;;  %1225 = vadd.xlane.f32.xlu1 %v4616_v2 }
 0x1e0   :  { %v4849_v16 = vpop.xlane.xlu1 %1273  ;;  %v4851_v49 = vpop.xlane.xlu0 %797 }
 0x1e3   :  { %1345 = vadd.xlane.f32.xlu1 %v4618_v63 }
 0x1e4   :  { %v4854_v55 = vpop.xlane.xlu0 %917  ;;  %v4856_v33 = vpop.xlane.xlu1 %801 }
 0x1e5   :  { %6521 = vst [vmem:[#allocation101_spill] sm:$0xff] %v4854_v55 }
 0x1e8   :  { %v4858_v23 = vpop.xlane.xlu0 %1157  ;;  %v4860_v59 = vpop.xlane.xlu1 %921 }
 0x1ec   :  { %v4862_v38 = vpop.xlane.xlu0 %1277  ;;  %v4864_v21 = vpop.xlane.xlu1 %1161 }
 0x1ed   :  { %6522 = vst [vmem:[#allocation105_spill] sm:$0xff] %v4862_v38  ;;  %v4900_v38 = vmul.f32 0.0051020407, %v4765_v0 }
 0x1ef   :  { %v1474_v0 = vmul.f32 %v4900_v38, %v4900_v38 }
 0x1f0   :  { %v4866_v19 = vpop.xlane.xlu1 %1281  ;;  %v4868_v2 = vpop.xlane.xlu0 %805 }
 0x1f1   :  { %6523 = vst [vmem:[#allocation103_spill] sm:$0xff] %v4868_v2  ;;  %v1857_v2 = vld [vmem:[%s6255_s4 + $0xf0] sm:$0xff] }
 0x1f4   :  { %v4873_v63 = vpop.xlane.xlu0 %925  ;;  %v4875_v56 = vpop.xlane.xlu1 %809  ;;  %2159 = vperm.xlu1 %3064, %v4686_v39   ;;  %v1947_v39 = vsub.f32 %v1827_v60, %v4682_v24  ;;  %v1977_v24 = vsub.f32 %v1857_v2, %v4699_v4  ;;  %v1534_v4 = vsub.f32 %v1414_v51, %v1474_v0 }
 0x1f5   :  { %6524 = vst [vmem:[#allocation109_spill] sm:$0xff] %v4873_v63  ;;  %2009 = vperm.xlu0 %3063, %v4667_v43   ;;  %v1562_v43 = vsub.f32 %v1442_v44, %v1502_v26  ;;  %v4918_v44 = vmul.f32 0.0051020407, %v4778_v48 }
 0x1f7   :  { %v1622_v60 = vadd.f32 1e-05, %v1562_v43  ;;  %v1504_v2 = vmul.f32 %v4918_v44, %v4918_v44 }
 0x1f8   :  { %v4888_v7 = vpop.xlane.xlu0 %1165  ;;  %v4890_v63 = vpop.xlane.xlu1 %929  ;;  %2014 = vperm.xlu1 %3064, %v4707_v45   ;;  %v4912_v45 = vmul.f32 0.0051020407, %v4709_v52  ;;  %v1444_v52 = vmul.f32 0.0051020407, %v4798_v20  ;;  %v1594_v20 = vadd.f32 1e-05, %v1534_v4 }
 0x1f9   :  { %6525 = vst [vmem:[#allocation110_spill] sm:$0xff] %v4888_v7  ;;  %2164 = vperm.xlu0 %3063, %v4690_v62   ;;  %v1858_v62 = vld [vmem:[%s6255_s4 + $0xf8] sm:$0xff]  ;;  %3085 = vrsqrt.f32 %v1622_v60  ;;  %v1950_v60 = vsub.f32 %v1830_v6, %v4757_v54  ;;  %v1829_v54 = vld [vmem:[%s6255_s4 + $0x10] sm:$0xff]  ;;  %v4953_v4 = vmul.f32 0.0051020407, %v4809_v53 }
 0x1fa   :  { %v1978_v50 = vsub.f32 %v1858_v62, %v4703_v46  ;;  %v1501_v46 = vmul.f32 %v4912_v45, %v4912_v45  ;;  %v1564_v62 = vsub.f32 %v1444_v52, %v1504_v2  ;;  %3087 = vrsqrt.f32 %v1594_v20 }
 0x1fb   :  { %v1949_v2 = vsub.f32 %v1829_v54, %v4736_v18  ;;  %v4966_v53 = vmul.f32 0.0051020407, %v4749_v42  ;;  %v4974_v20 = vmul.f32 0.0051020407, %v4815_v11  ;;  %v1832_v18 = vld [vmem:[%s6255_s4 + $0x28] sm:$0xff] }
 0x1fc   :  { %v4902_v55 = vpop.xlane.xlu0 %1285  ;;  %v4904_v7 = vpop.xlane.xlu1 %1169  ;;  %2429 = vperm.xlu1 %3064, %v1947_v39   ;;  %v1624_v0 = vadd.f32 1e-05, %v1564_v62  ;;  %v1413_v42 = vmul.f32 0.0051020407, %v4776_v31 }
 0x1fd   :  { %2434 = vperm.xlu0 %3063, %v1948_v36   ;;  %v1561_v36 = vsub.f32 %v1441_v17, %v1501_v46  ;;  %v1742_v46 = vld [vmem:[%s6254_s3 + $0x118] sm:$0xff]  ;;  %v1473_v11 = vmul.f32 %v4966_v53, %v4966_v53  ;;  %v1506_v31 = vmul.f32 %v4974_v20, %v4974_v20 }
 0x200   :  { %v4920_v26 = vpop.xlane.xlu1 %1289  ;;  %v4922_v39 = vpop.xlane.xlu0 %813  ;;  %2579 = vperm.xlu1 %3064, %v1977_v24  }
 0x201   :  { %2584 = vperm.xlu0 %3063, %v1978_v50   ;;  %v1621_v50 = vadd.f32 1e-05, %v1561_v36  ;;  %v1859_v36 = vld [vmem:[%s6255_s4 + $0x100] sm:$0xff] }
 0x203   :  { %v3086_v17 = vpop.eup %3085  ;;  %3089 = vrsqrt.f32 %v1621_v50  ;;  %v1979_v50 = vsub.f32 %v1859_v36, %v4753_v47  ;;  %v1862_v47 = vld [vmem:[%s6255_s4 + $0x118] sm:$0xff] }
 0x204   :  { %v4930_v48 = vpop.xlane.xlu0 %933  ;;  %v4932_v43 = vpop.xlane.xlu1 %817  ;;  %2019 = vperm.xlu1 %3064, %v4722_v25   ;;  %v1860_v25 = vld [vmem:[%s6255_s4 + $0x108] sm:$0xff]  ;;  %3091 = vrsqrt.f32 %v1624_v0  ;;  %v1802_v6 = vmul.f32 %v3086_v17, %v1742_v46  ;;  %v4989_v0 = vmul.f32 0.0051020407, %v4763_v32  ;;  %v1714_v32 = vld [vmem:[%s6254_s3 + $0x38] sm:$0xff] }
 0x205   :  { %2174 = vperm.xlu0 %3063, %v4759_v22   ;;  %v1980_v22 = vsub.f32 %v1860_v25, %v4769_v1  ;;  %v1416_v1 = vmul.f32 0.0051020407, %v4821_v57  ;;  %v1446_v25 = vmul.f32 0.0051020407, %v4825_v27  ;;  %v3088_v17 = vpop.eup %3087  ;;  %v1443_v27 = vmul.f32 0.0051020407, %v4784_v58 }
 0x206   :  { %v1922_v54 = vmul.f32 %v1802_v6, %v4871_v34  ;;  %v1503_v36 = vmul.f32 %v4989_v0, %v4989_v0  ;;  %v1744_v58 = vld [vmem:[%s6254_s3 + $0x128] sm:$0xff] }
 0x208   :  { %v4940_v51 = vpop.xlane.xlu0 %1173  ;;  %v4942_v24 = vpop.xlane.xlu1 %937  ;;  %2169 = vperm.xlu1 %3064, %v4738_v29  }
 0x209   :  { %2444 = vperm.xlu0 %3063, %v1950_v60  }
 0x20c   :  { %v4955_v52 = vpop.xlane.xlu0 %1293  ;;  %v4957_v29 = vpop.xlane.xlu1 %1177  ;;  %2024 = vperm.xlu1 %3064, %v4745_v40   ;;  %v1476_v40 = vmul.f32 %v4953_v4, %v4953_v4 }
 0x20d   :  { %2594 = vperm.xlu0 %3063, %v1980_v22   ;;  %v1952_v22 = vsub.f32 %v1832_v18, %v4803_v12  ;;  %v1533_v12 = vsub.f32 %v1413_v42, %v1473_v11  ;;  %v1741_v18 = vld [vmem:[%s6254_s3 + $0x110] sm:$0xff] }
 0x20e   :  { %v1536_v57 = vsub.f32 %v1416_v1, %v1476_v40  ;;  %v1982_v40 = vsub.f32 %v1862_v47, %v1922_v54 }
 0x210   :  { %v4976_v62 = vpop.xlane.xlu1 %1297  ;;  %v4978_v60 = vpop.xlane.xlu0 %821  ;;  %2439 = vperm.xlu1 %3064, %v1949_v2   ;;  %v1596_v34 = vadd.f32 1e-05, %v1536_v57  ;;  %v1566_v2 = vsub.f32 %v1446_v25, %v1506_v31  ;;  %v1593_v57 = vadd.f32 1e-05, %v1533_v12  ;;  %v1563_v25 = vsub.f32 %v1443_v27, %v1503_v36 }
 0x211   :  { %6526 = vst [vmem:[#allocation114_spill] sm:$0xff] %v4978_v60  ;;  %2184 = vperm.xlu0 %3063, %v1802_v6   ;;  %v3090_v6 = vpop.eup %3089  ;;  %v5024_v31 = vmul.f32 0.0051020407, %v4833_v10  ;;  %v1831_v10 = vld [vmem:[%s6255_s4 + $0x20] sm:$0xff] }
 0x212   :  { %3093 = vrsqrt.f32 %v1596_v34  ;;  %v1626_v11 = vadd.f32 1e-05, %v1566_v2  ;;  %v1623_v12 = vadd.f32 1e-05, %v1563_v25  ;;  %v5041_v2 = vmul.f32 0.0051020407, %v4839_v3 }
 0x213   :  { %3095 = vrsqrt.f32 %v1593_v57  ;;  %v1478_v34 = vmul.f32 %v5024_v31, %v5024_v31 }
 0x214   :  { %v4995_v46 = vpop.xlane.xlu0 %941  ;;  %v4997_v1 = vpop.xlane.xlu1 %825  ;;  %2589 = vperm.xlu1 %3064, %v1979_v50   ;;  %v5011_v50 = vmul.f32 %v3088_v17, %v1714_v32  ;;  %v1834_v32 = vld [vmem:[%s6255_s4 + $0x38] sm:$0xff]  ;;  %3097 = vrsqrt.f32 %v1626_v11  ;;  %v1508_v11 = vmul.f32 %v5041_v2, %v5041_v2 }
 0x215   :  { %6527 = vst [vmem:[#allocation116_spill] sm:$0xff] %v4995_v46  ;;  %2454 = vperm.xlu0 %3063, %v1952_v22   ;;  %v3092_v46 = vpop.eup %3091  ;;  %v1801_v22 = vmul.f32 %v3090_v6, %v1741_v18  ;;  %3099 = vrsqrt.f32 %v1623_v12  ;;  %v1951_v18 = vsub.f32 %v1831_v10, %v4792_v13  ;;  %v1716_v13 = vld [vmem:[%s6254_s3 + $0x48] sm:$0xff]  ;;  %v1713_v10 = vld [vmem:[%s6254_s3 + $0x30] sm:$0xff] }
 0x216   :  { %v1804_v54 = vmul.f32 %v3092_v46, %v1744_v58  ;;  %v1894_v17 = vmul.f32 %v5011_v50, %v4900_v38  ;;  %v1418_v46 = vmul.f32 0.0051020407, %v4845_v9  ;;  %v1864_v9 = vld [vmem:[%s6255_s4 + $0x128] sm:$0xff]  ;;  %v5055_v58 = vmul.f32 0.0051020407, %v4800_v8 }
 0x217   :  { %v1921_v3 = vmul.f32 %v1801_v22, %v4912_v45  ;;  %v1415_v8 = vmul.f32 0.0051020407, %v4813_v30 }
 0x218   :  { %v5013_v60 = vpop.xlane.xlu0 %1181  ;;  %v5015_v42 = vpop.xlane.xlu1 %945  ;;  %2029 = vperm.xlu1 %3064, %v4780_v61   ;;  %v1954_v27 = vsub.f32 %v1834_v32, %v1894_v17  ;;  %v1924_v38 = vmul.f32 %v1804_v54, %v4918_v44  ;;  %v1448_v44 = vmul.f32 0.0051020407, %v4849_v16  ;;  %v1475_v12 = vmul.f32 %v5055_v58, %v5055_v58 }
 0x219   :  { %2604 = vperm.xlu0 %3063, %v1982_v40   ;;  %v1538_v40 = vsub.f32 %v1418_v46, %v1478_v34  ;;  %v5073_v46 = vmul.f32 0.0051020407, %v4807_v14 }
 0x21a   :  { %v1984_v57 = vsub.f32 %v1864_v9, %v1924_v38  ;;  %v1568_v45 = vsub.f32 %v1448_v44, %v1508_v11  ;;  %v1746_v9 = vld [vmem:[%s6254_s3 + $0x138] sm:$0xff]  ;;  %v1445_v44 = vmul.f32 0.0051020407, %v4819_v28 }
 0x21b   :  { %v1598_v16 = vadd.f32 1e-05, %v1538_v40  ;;  %v1535_v40 = vsub.f32 %v1415_v8, %v1475_v12 }
 0x21c   :  { %v5026_v47 = vpop.xlane.xlu0 %1301  ;;  %v5028_v61 = vpop.xlane.xlu1 %1185  ;;  %2179 = vperm.xlu1 %3064, %v1801_v22   ;;  %v1628_v14 = vadd.f32 1e-05, %v1568_v45 }
 0x21d   :  { %2194 = vperm.xlu0 %3063, %v1804_v54   ;;  %v3094_v25 = vpop.eup %3093  ;;  %3101 = vrsqrt.f32 %v1598_v16  ;;  %v1836_v16 = vld [vmem:[%s6255_s4 + $0x48] sm:$0xff]  ;;  %v1595_v45 = vadd.f32 1e-05, %v1535_v40  ;;  %v1866_v40 = vld [vmem:[%s6255_s4 + $0x138] sm:$0xff] }
 0x21e   :  { %v3096_v32 = vpop.eup %3095  ;;  %3103 = vrsqrt.f32 %v1628_v14 }
 0x21f   :  { %v3098_v38 = vpop.eup %3097  ;;  %3105 = vrsqrt.f32 %v1595_v45 }
 0x220   :  { %v5043_v6 = vpop.xlane.xlu1 %1305  ;;  %v5045_v36 = vpop.xlane.xlu0 %829  ;;  %2034 = vperm.xlu1 %3064, %v4796_v41   ;;  %v1861_v41 = vld [vmem:[%s6255_s4 + $0x110] sm:$0xff] }
 0x221   :  { %2464 = vperm.xlu0 %3063, %v1954_v27   ;;  %v1981_v22 = vsub.f32 %v1861_v41, %v1921_v3  ;;  %v1776_v27 = vmul.f32 %v3094_v25, %v1716_v13  ;;  %v3100_v3 = vpop.eup %3099  ;;  %v1806_v41 = vmul.f32 %v3098_v38, %v1746_v9  ;;  %v1743_v25 = vld [vmem:[%s6254_s3 + $0x120] sm:$0xff]  ;;  %v5093_v13 = vmul.f32 0.0051020407, %v4856_v33 }
 0x222   :  { %v1803_v12 = vmul.f32 %v3100_v3, %v1743_v25  ;;  %v1833_v3 = vld [vmem:[%s6255_s4 + $0x30] sm:$0xff]  ;;  %v1417_v25 = vmul.f32 0.0051020407, %v4837_v37 }
 0x223   :  { %v1896_v11 = vmul.f32 %v1776_v27, %v4953_v4  ;;  %v1926_v33 = vmul.f32 %v1806_v41, %v4974_v20 }
 0x224   :  { %v5062_v54 = vpop.xlane.xlu0 %949  ;;  %v5064_v17 = vpop.xlane.xlu1 %833  ;;  %2449 = vperm.xlu1 %3064, %v1951_v18   ;;  %v1773_v18 = vmul.f32 %v3096_v32, %v1713_v10  ;;  %v1420_v32 = vmul.f32 0.0051020407, %v4864_v21  ;;  %v5107_v10 = vmul.f32 0.0051020407, %v4860_v59  ;;  %v1450_v59 = vmul.f32 0.0051020407, %v4866_v19 }
 0x225   :  { %2614 = vperm.xlu0 %3063, %v1984_v57   ;;  %v1505_v57 = vmul.f32 %v5073_v46, %v5073_v46  ;;  %v1956_v4 = vsub.f32 %v1836_v16, %v1896_v11 }
 0x226   :  { %v1893_v20 = vmul.f32 %v1773_v18, %v4966_v53  ;;  %v1510_v11 = vmul.f32 %v5107_v10, %v5107_v10 }
 0x228   :  { %v5078_v34 = vpop.xlane.xlu0 %1189  ;;  %v5080_v30 = vpop.xlane.xlu1 %953  ;;  %2599 = vperm.xlu1 %3064, %v1981_v22   ;;  %v1565_v22 = vsub.f32 %v1445_v44, %v1505_v57  ;;  %v5118_v44 = vmul.f32 0.0051020407, %v4827_v15  ;;  %v1986_v57 = vsub.f32 %v1866_v40, %v1926_v33  ;;  %v1718_v15 = vld [vmem:[%s6254_s3 + $0x58] sm:$0xff]  ;;  %v1953_v19 = vsub.f32 %v1833_v3, %v1893_v20  ;;  %v1748_v20 = vld [vmem:[%s6254_s3 + $0x148] sm:$0xff] }
 0x229   :  { %2054 = vperm.xlu0 %3063, %v1776_v27   ;;  %v1480_v27 = vmul.f32 %v5093_v13, %v5093_v13  ;;  %v1570_v45 = vsub.f32 %v1450_v59, %v1510_v11  ;;  %v5159_v11 = vmul.f32 0.0051020407, %v4875_v56  ;;  %v1745_v56 = vld [vmem:[%s6254_s3 + $0x130] sm:$0xff] }
 0x22a   :  { %v1625_v21 = vadd.f32 1e-05, %v1565_v22  ;;  %v1923_v22 = vmul.f32 %v1803_v12, %v4989_v0  ;;  %v1447_v0 = vmul.f32 0.0051020407, %v4843_v35 }
 0x22b   :  { %v1540_v14 = vsub.f32 %v1420_v32, %v1480_v27  ;;  %v5139_v32 = vmul.f32 0.0051020407, %v4831_v5  ;;  %v1630_v5 = vadd.f32 1e-05, %v1570_v45 }
 0x22c   :  { %v5095_v8 = vpop.xlane.xlu0 %1309  ;;  %v5097_v28 = vpop.xlane.xlu1 %1193  ;;  %2039 = vperm.xlu1 %3064, %v1773_v18   ;;  %3107 = vrsqrt.f32 %v1625_v21  ;;  %v1477_v18 = vmul.f32 %v5118_v44, %v5118_v44 }
 0x22d   :  { %2204 = vperm.xlu0 %3063, %v1806_v41   ;;  %v3102_v41 = vpop.eup %3101  ;;  %v1600_v37 = vadd.f32 1e-05, %v1540_v14  ;;  %v1507_v59 = vmul.f32 %v5139_v32, %v5139_v32 }
 0x22e   :  { %v3104_v33 = vpop.eup %3103  ;;  %v1537_v27 = vsub.f32 %v1417_v25, %v1477_v18 }
 0x22f   :  { %3109 = vrsqrt.f32 %v1600_v37  ;;  %v3106_v14 = vpop.eup %3105  ;;  %v1808_v3 = vmul.f32 %v3104_v33, %v1748_v20  ;;  %v1567_v18 = vsub.f32 %v1447_v0, %v1507_v59  ;;  %v1422_v37 = vmul.f32 0.0051020407, %v4904_v7  ;;  %v1868_v7 = vld [vmem:[%s6255_s4 + $0x148] sm:$0xff] }
 0x230   :  { %v5109_v38 = vpop.xlane.xlu1 %1313  ;;  %v5111_v9 = vpop.xlane.xlu0 %837  ;;  %2189 = vperm.xlu1 %3064, %v1803_v12   ;;  %v1597_v25 = vadd.f32 1e-05, %v1537_v27  ;;  %3111 = vrsqrt.f32 %v1630_v5  ;;  %v5176_v33 = vmul.f32 0.0051020407, %v4890_v63  ;;  %v5188_v63 = vmul.f32 0.0051020407, %v4851_v49 }
 0x231   :  { %2474 = vperm.xlu0 %3063, %v1956_v4   ;;  %v1778_v4 = vmul.f32 %v3102_v41, %v1718_v15  ;;  %v1627_v0 = vadd.f32 1e-05, %v1567_v18  ;;  %v1419_v49 = vmul.f32 0.0051020407, %v4858_v23 }
 0x232   :  { %3113 = vrsqrt.f32 %v1597_v25 }
 0x233   :  { %v1898_v41 = vmul.f32 %v1778_v4, %v5024_v31  ;;  %3115 = vrsqrt.f32 %v1627_v0 }
 0x234   :  { %v5127_v16 = vpop.xlane.xlu0 %957  ;;  %v5129_v53 = vpop.xlane.xlu1 %841  ;;  %2044 = vperm.xlu1 %3064, %v5011_v50   ;;  %v1863_v50 = vld [vmem:[%s6255_s4 + $0x120] sm:$0xff] }
 0x235   :  { %2624 = vperm.xlu0 %3063, %v1986_v57   ;;  %v1983_v12 = vsub.f32 %v1863_v50, %v1923_v22  ;;  %v1715_v57 = vld [vmem:[%s6254_s3 + $0x40] sm:$0xff]  ;;  %v1482_v50 = vmul.f32 %v5159_v11, %v5159_v11 }
 0x236   :  { %v1775_v45 = vmul.f32 %v3106_v14, %v1715_v57  ;;  %v3108_v31 = vpop.eup %3107 }
 0x237   :  { %v1542_v5 = vsub.f32 %v1422_v37, %v1482_v50  ;;  %v1865_v50 = vld [vmem:[%s6255_s4 + $0x130] sm:$0xff] }
 0x238   :  { %v5144_v40 = vpop.xlane.xlu0 %1197  ;;  %v5146_v21 = vpop.xlane.xlu1 %961  ;;  %2459 = vperm.xlu1 %3064, %v1953_v19   ;;  %v1838_v19 = vld [vmem:[%s6255_s4 + $0x58] sm:$0xff]  ;;  %v1895_v14 = vmul.f32 %v1775_v45, %v5055_v58 }
 0x239   :  { %2064 = vperm.xlu0 %3063, %v1778_v4   ;;  %v1958_v22 = vsub.f32 %v1838_v19, %v1898_v41  ;;  %v1928_v4 = vmul.f32 %v1808_v3, %v5041_v2  ;;  %v1452_v2 = vmul.f32 0.0051020407, %v4920_v26  ;;  %v3110_v57 = vpop.eup %3109  ;;  %v1512_v41 = vmul.f32 %v5176_v33, %v5176_v33  ;;  %v1720_v26 = vld [vmem:[%s6254_s3 + $0x68] sm:$0xff] }
 0x23a   :  { %v1602_v58 = vadd.f32 1e-05, %v1542_v5 }
 0x23b   :  { %v1988_v59 = vsub.f32 %v1868_v7, %v1928_v4  ;;  %v1572_v18 = vsub.f32 %v1452_v2, %v1512_v41  ;;  %v1780_v4 = vmul.f32 %v3110_v57, %v1720_v26  ;;  %v3112_v7 = vpop.eup %3111  ;;  %v6529_v2 = vld [vmem:[#allocation105_spill] sm:$0xff]  ;;  %v1717_v57 = vld [vmem:[%s6254_s3 + $0x50] sm:$0xff] }
 0x23c   :  { %v5161_v35 = vpop.xlane.xlu0 %1317  ;;  %v5163_v15 = vpop.xlane.xlu1 %1201  ;;  %2609 = vperm.xlu1 %3064, %v1983_v12   ;;  %v1805_v12 = vmul.f32 %v3108_v31, %v1745_v56  ;;  %v1479_v31 = vmul.f32 %v5188_v63, %v5188_v63  ;;  %3117 = vrsqrt.f32 %v1602_v58  ;;  %v1840_v58 = vld [vmem:[%s6255_s4 + $0x68] sm:$0xff] }
 0x23d   :  { %2214 = vperm.xlu0 %3063, %v1808_v3   ;;  %v1835_v3 = vld [vmem:[%s6255_s4 + $0x40] sm:$0xff] }
 0x23e   :  { %v1955_v37 = vsub.f32 %v1835_v3, %v1895_v14  ;;  %v1539_v5 = vsub.f32 %v1419_v49, %v1479_v31  ;;  %v3114_v14 = vpop.eup %3113 }
 0x240   :  { %v5178_v27 = vpop.xlane.xlu1 %1321  ;;  %v5180_v20 = vpop.xlane.xlu0 %845  ;;  %2049 = vperm.xlu1 %3064, %v1775_v45   ;;  %v1925_v45 = vmul.f32 %v1805_v12, %v5073_v46  ;;  %v1750_v46 = vld [vmem:[%s6254_s3 + $0x158] sm:$0xff] }
 0x241   :  { %2484 = vperm.xlu0 %3063, %v1958_v22   ;;  %v6528_v22 = vld [vmem:[#allocation101_spill] sm:$0xff]  ;;  %v1810_v26 = vmul.f32 %v3112_v7, %v1750_v46  ;;  %v1424_v7 = vmul.f32 0.0051020407, %v4957_v29 }
 0x242   :  { %v5207_v56 = vmul.f32 0.0051020407, %v6528_v22  ;;  %v1985_v3 = vsub.f32 %v1865_v50, %v1925_v45  ;;  %v5227_v22 = vmul.f32 0.0051020407, %v4932_v43  ;;  %v1777_v50 = vmul.f32 %v3114_v14, %v1717_v57  ;;  %v1747_v43 = vld [vmem:[%s6254_s3 + $0x140] sm:$0xff]  ;;  %v1870_v29 = vld [vmem:[%s6255_s4 + $0x158] sm:$0xff] }
 0x243   :  { %v1930_v46 = vmul.f32 %v1810_v26, %v5107_v10  ;;  %v1454_v57 = vmul.f32 0.0051020407, %v4976_v62  ;;  %v1722_v62 = vld [vmem:[%s6254_s3 + $0x78] sm:$0xff] }
 0x244   :  { %v5195_v25 = vpop.xlane.xlu0 %965  ;;  %v5197_v19 = vpop.xlane.xlu1 %849  ;;  %2199 = vperm.xlu1 %3064, %v1805_v12   ;;  %v1449_v12 = vmul.f32 0.0051020407, %v6529_v2  ;;  %v1509_v41 = vmul.f32 %v5207_v56, %v5207_v56  ;;  %v1484_v2 = vmul.f32 %v5227_v22, %v5227_v22  ;;  %v1897_v10 = vmul.f32 %v1777_v50, %v5118_v44  ;;  %v6534_v44 = vld [vmem:[#allocation110_spill] sm:$0xff] }
 0x245   :  { %2634 = vperm.xlu0 %3063, %v1988_v59   ;;  %v1632_v59 = vadd.f32 1e-05, %v1572_v18  ;;  %v1599_v18 = vadd.f32 1e-05, %v1539_v5 }
 0x246   :  { %v1569_v45 = vsub.f32 %v1449_v12, %v1509_v41 }
 0x247   :  { %3119 = vrsqrt.f32 %v1632_v59  ;;  %v1544_v59 = vsub.f32 %v1424_v7, %v1484_v2 }
 0x248   :  { %v5212_v0 = vpop.xlane.xlu0 %1205  ;;  %v5214_v23 = vpop.xlane.xlu1 %969  ;;  %2469 = vperm.xlu1 %3064, %v1955_v37   ;;  %v1900_v37 = vmul.f32 %v1780_v4, %v5093_v13  ;;  %3121 = vrsqrt.f32 %v1599_v18  ;;  %v1629_v14 = vadd.f32 1e-05, %v1569_v45 }
 0x249   :  { %2074 = vperm.xlu0 %3063, %v1780_v4   ;;  %v3116_v13 = vpop.eup %3115 }
 0x24a   :  { %v1960_v4 = vsub.f32 %v1840_v58, %v1900_v37  ;;  %v1807_v41 = vmul.f32 %v3116_v13, %v1747_v43  ;;  %v1990_v58 = vsub.f32 %v1870_v29, %v1930_v46  ;;  %3123 = vrsqrt.f32 %v1629_v14  ;;  %v6535_v13 = vld [vmem:[#allocation109_spill] sm:$0xff] }
 0x24b   :  { %v5272_v43 = vmul.f32 0.0051020407, %v6535_v13  ;;  %v1604_v46 = vadd.f32 1e-05, %v1544_v59 }
 0x24c   :  { %v5229_v49 = vpop.xlane.xlu0 %1325  ;;  %v5231_v31 = vpop.xlane.xlu1 %1209  ;;  %2619 = vperm.xlu1 %3064, %v1985_v3   ;;  %v5244_v3 = vmul.f32 0.0051020407, %v4942_v24  ;;  %v1837_v24 = vld [vmem:[%s6255_s4 + $0x50] sm:$0xff]  ;;  %v1927_v29 = vmul.f32 %v1807_v41, %v5139_v32  ;;  %v1752_v32 = vld [vmem:[%s6254_s3 + $0x168] sm:$0xff] }
 0x24d   :  { %6530 = vst [vmem:[#allocation121_spill] sm:$0xff] %v5229_v49  ;;  %2224 = vperm.xlu0 %3063, %v1810_v26   ;;  %v6532_v26 = vld [vmem:[#allocation103_spill] sm:$0xff]  ;;  %v1957_v7 = vsub.f32 %v1837_v24, %v1897_v10  ;;  %v1867_v49 = vld [vmem:[%s6255_s4 + $0x140] sm:$0xff]  ;;  %3125 = vrsqrt.f32 %v1604_v46 }
 0x24e   :  { %v5259_v37 = vmul.f32 0.0051020407, %v6532_v26  ;;  %v1514_v18 = vmul.f32 %v5244_v3, %v5244_v3 }
 0x250   :  { %v5246_v5 = vpop.xlane.xlu1 %1329  ;;  %v5248_v12 = vpop.xlane.xlu0 %853  ;;  %2059 = vperm.xlu1 %3064, %v1777_v50   ;;  %v1421_v50 = vmul.f32 0.0051020407, %v6534_v44  ;;  %v1574_v2 = vsub.f32 %v1454_v57, %v1514_v18  ;;  %v1481_v26 = vmul.f32 %v5259_v37, %v5259_v37  ;;  %v1451_v44 = vmul.f32 0.0051020407, %v4902_v55 }
 0x251   :  { %6531 = vst [vmem:[#allocation122_spill] sm:$0xff] %v5248_v12  ;;  %2494 = vperm.xlu0 %3063, %v1960_v4   ;;  %v3118_v12 = vpop.eup %3117  ;;  %v5291_v55 = vmul.f32 0.0051020407, %v4997_v1  ;;  %v1426_v1 = vmul.f32 0.0051020407, %v5028_v61 }
 0x252   :  { %v3120_v14 = vpop.eup %3119  ;;  %v1541_v59 = vsub.f32 %v1421_v50, %v1481_v26  ;;  %v1634_v57 = vadd.f32 1e-05, %v1574_v2  ;;  %v5306_v2 = vmul.f32 0.0051020407, %v4922_v39  ;;  %v1423_v39 = vmul.f32 0.0051020407, %v4940_v51 }
 0x253   :  { %v3122_v24 = vpop.eup %3121  ;;  %v1812_v18 = vmul.f32 %v3120_v14, %v1752_v32  ;;  %v5311_v14 = vmul.f32 0.0051020407, %v5015_v42  ;;  %v1749_v32 = vld [vmem:[%s6254_s3 + $0x150] sm:$0xff]  ;;  %v1872_v42 = vld [vmem:[%s6255_s4 + $0x168] sm:$0xff] }
 0x254   :  { %v5263_v45 = vpop.xlane.xlu0 %973  ;;  %v5265_v4 = vpop.xlane.xlu1 %857  ;;  %2209 = vperm.xlu1 %3064, %v1807_v41   ;;  %v1987_v41 = vsub.f32 %v1867_v49, %v1927_v29  ;;  %v1842_v49 = vld [vmem:[%s6255_s4 + $0x78] sm:$0xff]  ;;  %v1601_v46 = vadd.f32 1e-05, %v1541_v59  ;;  %3127 = vrsqrt.f32 %v1634_v57 }
 0x255   :  { %6533 = vst [vmem:[#allocation126_spill] sm:$0xff] %v5263_v45  ;;  %2644 = vperm.xlu0 %3063, %v1990_v58   ;;  %v1782_v45 = vmul.f32 %v3118_v12, %v1722_v62  ;;  %v1511_v12 = vmul.f32 %v5272_v43, %v5272_v43  ;;  %v1719_v62 = vld [vmem:[%s6254_s3 + $0x60] sm:$0xff]  ;;  %v1932_v61 = vmul.f32 %v1812_v18, %v5176_v33 }
 0x256   :  { %v1779_v29 = vmul.f32 %v3122_v24, %v1719_v62  ;;  %3129 = vrsqrt.f32 %v1601_v46  ;;  %v1456_v24 = vmul.f32 0.0051020407, %v5043_v6  ;;  %v1483_v33 = vmul.f32 %v5306_v2, %v5306_v2 }
 0x257   :  { %v1571_v13 = vsub.f32 %v1451_v44, %v1511_v12  ;;  %v1516_v62 = vmul.f32 %v5311_v14, %v5311_v14 }
 0x258   :  { %v5281_v58 = vpop.xlane.xlu0 %1213  ;;  %v5283_v10 = vpop.xlane.xlu1 %977  ;;  %2479 = vperm.xlu1 %3064, %v1957_v7   ;;  %v1902_v7 = vmul.f32 %v1782_v45, %v5159_v11  ;;  %v1899_v51 = vmul.f32 %v1779_v29, %v5188_v63  ;;  %v1543_v46 = vsub.f32 %v1423_v39, %v1483_v33  ;;  %v1724_v63 = vld [vmem:[%s6254_s3 + $0x88] sm:$0xff] }
 0x259   :  { %6536 = vst [vmem:[#allocation128_spill] sm:$0xff] %v5281_v58  ;;  %2084 = vperm.xlu0 %3063, %v1782_v45   ;;  %v3124_v11 = vpop.eup %3123  ;;  %v1486_v45 = vmul.f32 %v5291_v55, %v5291_v55  ;;  %v1631_v59 = vadd.f32 1e-05, %v1571_v13  ;;  %v1839_v13 = vld [vmem:[%s6255_s4 + $0x60] sm:$0xff]  ;;  %v6547_v58 = vld [vmem:[#allocation9_spill] sm:$0xff] }
 0x25a   :  { %v1962_v44 = vsub.f32 %v1842_v49, %v1902_v7  ;;  %v1992_v7 = vsub.f32 %v1872_v42, %v1932_v61  ;;  %v3126_v49 = vpop.eup %3125  ;;  %v1603_v42 = vadd.f32 1e-05, %v1543_v46  ;;  %v6541_v46 = vld [vmem:[#allocation114_spill] sm:$0xff] }
 0x25b   :  { %3131 = vrsqrt.f32 %v1631_v59  ;;  %v1784_v61 = vmul.f32 %v3126_v49, %v1724_v63  ;;  %v1869_v59 = vld [vmem:[%s6255_s4 + $0x150] sm:$0xff]  ;;  %v5366_v63 = vmul.f32 0.0051020407, %v6541_v46  ;;  %v1455_v46 = vmul.f32 0.0051020407, %v5026_v47 }
 0x25c   :  { %v5297_v50 = vpop.xlane.xlu0 %1333  ;;  %v5299_v26 = vpop.xlane.xlu1 %1217  ;;  %2629 = vperm.xlu1 %3064, %v1987_v41   ;;  %v1546_v41 = vsub.f32 %v1426_v1, %v1486_v45  ;;  %v1959_v45 = vsub.f32 %v1839_v13, %v1899_v51  ;;  %v1721_v49 = vld [vmem:[%s6254_s3 + $0x70] sm:$0xff] }
 0x25d   :  { %6537 = vst [vmem:[#allocation133_spill] sm:$0xff] %v5297_v50  ;;  %2234 = vperm.xlu0 %3063, %v1812_v18   ;;  %v1809_v18 = vmul.f32 %v3124_v11, %v1749_v32  ;;  %v1576_v11 = vsub.f32 %v1456_v24, %v1516_v62  ;;  %v5343_v32 = vmul.f32 0.0051020407, %v4930_v48  ;;  %v1453_v24 = vmul.f32 0.0051020407, %v4955_v52 }
 0x25e   :  { %v3128_v39 = vpop.eup %3127  ;;  %v1904_v52 = vmul.f32 %v1784_v61, %v5227_v22  ;;  %v5376_v22 = vmul.f32 0.0051020407, %v5080_v30 }
 0x25f   :  { %v1513_v62 = vmul.f32 %v5343_v32, %v5343_v32 }
 0x260   :  { %v5318_v12 = vpop.xlane.xlu1 %1337  ;;  %v5320_v57 = vpop.xlane.xlu0 %861  ;;  %2069 = vperm.xlu1 %3064, %v1779_v29   ;;  %v1606_v29 = vadd.f32 1e-05, %v1546_v41  ;;  %v1754_v41 = vld [vmem:[%s6254_s3 + $0x178] sm:$0xff] }
 0x261   :  { %6538 = vst [vmem:[#allocation101_spill] sm:$0xff] %v5320_v57  ;;  %2504 = vperm.xlu0 %3063, %v1962_v44   ;;  %v1929_v44 = vmul.f32 %v1809_v18, %v5207_v56  ;;  %v1636_v56 = vadd.f32 1e-05, %v1576_v11  ;;  %v3130_v51 = vpop.eup %3129  ;;  %v1814_v13 = vmul.f32 %v3128_v39, %v1754_v41  ;;  %v1844_v11 = vld [vmem:[%s6255_s4 + $0x88] sm:$0xff]  ;;  %v1751_v39 = vld [vmem:[%s6254_s3 + $0x160] sm:$0xff] }
 0x262   :  { %3133 = vrsqrt.f32 %v1606_v29  ;;  %v1964_v41 = vsub.f32 %v1844_v11, %v1904_v52  ;;  %v1518_v11 = vmul.f32 %v5376_v22, %v5376_v22  ;;  %v6546_v57 = vld [vmem:[#allocation6_spill] sm:$0xff] }
 0x263   :  { %3135 = vrsqrt.f32 %v1603_v42 }
 0x264   :  { %v5334_v1 = vpop.xlane.xlu0 %981  ;;  %2219 = vperm.xlu1 %3064, %v1809_v18   ;;  %v5336_v6 = vpop.xlane.xlu1 %865  ;;  %v1989_v18 = vsub.f32 %v1869_v59, %v1929_v44  ;;  %3137 = vrsqrt.f32 %v1636_v56  ;;  %v1425_v59 = vmul.f32 0.0051020407, %v5013_v60  ;;  %v6542_v56 = vld [vmem:[#allocation116_spill] sm:$0xff]  ;;  %v1458_v60 = vmul.f32 0.0051020407, %v5109_v38 }
 0x265   :  { %6539 = vst [vmem:[#allocation105_spill] sm:$0xff] %v5334_v1  ;;  %2654 = vperm.xlu0 %3063, %v1992_v7   ;;  %v5359_v7 = vmul.f32 0.0051020407, %v5064_v17  ;;  %v1573_v17 = vsub.f32 %v1453_v24, %v1513_v62  ;;  %v3132_v44 = vpop.eup %3131  ;;  %v1934_v24 = vmul.f32 %v1814_v13, %v5244_v3  ;;  %v1874_v62 = vld [vmem:[%s6255_s4 + $0x178] sm:$0xff]  ;;  %v1841_v1 = vld [vmem:[%s6255_s4 + $0x70] sm:$0xff] }
 0x266   :  { %v1811_v3 = vmul.f32 %v3132_v44, %v1751_v39  ;;  %v1578_v44 = vsub.f32 %v1458_v60, %v1518_v11  ;;  %v1723_v60 = vld [vmem:[%s6254_s3 + $0x80] sm:$0xff] }
 0x267   :  { %v1488_v42 = vmul.f32 %v5359_v7, %v5359_v7 }
 0x268   :  { %2489 = vperm.xlu1 %3064, %v1959_v45   ;;  %v5348_v33 = vpop.xlane.xlu1 %985  ;;  %v5354_v48 = vpop.xlane.xlu0 %1221  ;;  %v1428_v45 = vmul.f32 0.0051020407, %v5097_v28  ;;  %v1485_v28 = vmul.f32 %v5366_v63, %v5366_v63 }
 0x269   :  { %2094 = vperm.xlu0 %3063, %v1784_v61   ;;  %6540 = vst [vmem:[#allocation103_spill] sm:$0xff] %v5354_v48  ;;  %v1781_v61 = vmul.f32 %v3130_v51, %v1721_v49  ;;  %v1633_v49 = vadd.f32 1e-05, %v1573_v17  ;;  %v1726_v17 = vld [vmem:[%s6254_s3 + $0x98] sm:$0xff] }
 0x26a   :  { %v1548_v52 = vsub.f32 %v1428_v45, %v1488_v42 }
 0x26b   :  { %v1901_v38 = vmul.f32 %v1781_v61, %v5259_v37  ;;  %3139 = vrsqrt.f32 %v1633_v49  ;;  %v1931_v37 = vmul.f32 %v1811_v3, %v5272_v43  ;;  %v1638_v49 = vadd.f32 1e-05, %v1578_v44 }
 0x26c   :  { %2639 = vperm.xlu1 %3064, %v1989_v18   ;;  %v5368_v29 = vpop.xlane.xlu1 %1225  ;;  %v5387_v18 = vmul.f32 0.0051020407, %v6542_v56  ;;  %v5390_v30 = vpop.xlane.xlu0 %1341  ;;  %v1608_v39 = vadd.f32 1e-05, %v1548_v52 }
 0x26d   :  { %2244 = vperm.xlu0 %3063, %v1814_v13   ;;  %6543 = vst [vmem:[#allocation110_spill] sm:$0xff] %v5390_v30  ;;  %v1545_v13 = vsub.f32 %v1425_v59, %v1485_v28  ;;  %v3134_v56 = vpop.eup %3133  ;;  %v1994_v30 = vsub.f32 %v1874_v62, %v1934_v24  ;;  %v1961_v24 = vsub.f32 %v1841_v1, %v1901_v38  ;;  %v1871_v62 = vld [vmem:[%s6255_s4 + $0x160] sm:$0xff] }
 0x26e   :  { %v1515_v45 = vmul.f32 %v5387_v18, %v5387_v18  ;;  %v1786_v28 = vmul.f32 %v3134_v56, %v1726_v17  ;;  %3141 = vrsqrt.f32 %v1608_v39  ;;  %v1991_v1 = vsub.f32 %v1871_v62, %v1931_v37  ;;  %v6544_v56 = vld [vmem:[#allocation2_spill] sm:$0xff]  ;;  %v1846_v39 = vld [vmem:[%s6255_s4 + $0x98] sm:$0xff] }
 0x26f   :  { %v1605_v42 = vadd.f32 1e-05, %v1545_v13  ;;  %v5428_v37 = vmul.f32 0.0051020407, %v5045_v36  ;;  %v1430_v36 = vmul.f32 0.0051020407, %v5163_v15 }
 0x270   :  { %2079 = vperm.xlu1 %3064, %v1781_v61   ;;  %v5392_v51 = vpop.xlane.xlu1 %1345  ;;  %v3136_v61 = vpop.eup %3135  ;;  %v1906_v38 = vmul.f32 %v1786_v28, %v5291_v55  ;;  %v5434_v55 = vmul.f32 0.0051020407, %v5129_v53 }
 0x271   :  { %2514 = vperm.xlu0 %3063, %v1964_v41   ;;  %v1575_v41 = vsub.f32 %v1455_v46, %v1515_v45  ;;  %v3138_v11 = vpop.eup %3137  ;;  %3143 = vrsqrt.f32 %v1605_v42  ;;  %v6545_v45 = vld [vmem:[#allocation4_spill] sm:$0xff]  ;;  %v1487_v15 = vmul.f32 %v5428_v37, %v5428_v37 }
 0x272   :  { %3145 = vrsqrt.f32 %v1638_v49  ;;  %v1966_v62 = vsub.f32 %v1846_v39, %v1906_v38 }
 0x273   :  { %v1635_v13 = vadd.f32 1e-05, %v1575_v41 }
 0x274   :  { %v2010_v47 = vpop.permute.xlu0 %2009  ;;  %2229 = vperm.xlu1 %3064, %v1811_v3   ;;  %v2160_v59 = vpop.permute.xlu1 %2159  ;;  %v1783_v3 = vmul.f32 %v3136_v61, %v1723_v60  ;;  %v5431_v61 = vmul.f32 0.0051020407, %v5078_v34 }
 0x275   :  { %2664 = vperm.xlu0 %3063, %v1994_v30   ;;  %v1756_v30 = vld [vmem:[%s6254_s3 + $0x188] sm:$0xff]  ;;  %v2307_v17 = vmul.f32 %v2010_v47, %v6544_v56  ;;  %v2308_v48 = vmul.f32 %v2010_v47, %v6545_v45  ;;  %v3140_v60 = vpop.eup %3139  ;;  %3147 = vrsqrt.f32 %v1635_v13 }
 0x276   :  { %v1816_v46 = vmul.f32 %v3138_v11, %v1756_v30  ;;  %v6548_v11 = vld [vmem:[#allocation3_spill] sm:$0xff]  ;;  %v6549_v30 = vld [vmem:[#allocation5_spill] sm:$0xff]  ;;  %v1903_v38 = vmul.f32 %v1783_v3, %v5306_v2  ;;  %v1547_v2 = vsub.f32 %v5431_v61, %v1487_v15  ;;  %v1457_v61 = vmul.f32 0.0051020407, %v5095_v8 }
 0x277   :  { %v2367_v53 = vmul.f32 %v2160_v59, %v6548_v11  ;;  %v2368_v49 = vmul.f32 %v2160_v59, %v6549_v30  ;;  %v1758_v8 = vld [vmem:[%s6254_s3 + $0x198] sm:$0xff] }
 0x278   :  { %v2165_v43 = vpop.permute.xlu0 %2164  ;;  %2499 = vperm.xlu1 %3064, %v1961_v24   ;;  %v2015_v52 = vpop.permute.xlu1 %2014  ;;  %v1936_v34 = vmul.f32 %v1816_v46, %v5311_v14  ;;  %v1490_v14 = vmul.f32 %v5434_v55, %v5434_v55 }
 0x279   :  { %2104 = vperm.xlu0 %3063, %v1786_v28   ;;  %v2309_v50 = vmul.f32 %v2015_v52, %v6546_v57  ;;  %v2310_v44 = vmul.f32 %v2015_v52, %v6547_v58  ;;  %v5437_v28 = vmul.f32 0.0051020407, %v5146_v21  ;;  %v6550_v52 = vld [vmem:[#allocation7_spill] sm:$0xff]  ;;  %v1753_v21 = vld [vmem:[%s6254_s3 + $0x170] sm:$0xff] }
 0x27c   :  { %v2435_v42 = vpop.permute.xlu0 %2434  ;;  %2649 = vperm.xlu1 %3064, %v1991_v1   ;;  %v2430_v47 = vpop.permute.xlu1 %2429  ;;  %v2369_v1 = vmul.f32 %v2165_v43, %v6550_v52  ;;  %v1607_v52 = vadd.f32 1e-05, %v1547_v2  ;;  %v6554_v2 = vld [vmem:[#allocation14_spill] sm:$0xff] }
 0x27d   :  { %v2729_v57 = vadd.f32 %v2435_v42, %v2309_v50  ;;  %v2730_v41 = vadd.f32 %v2435_v42, %v2310_v44  ;;  %v2727_v58 = vadd.f32 %v2430_v47, %v2307_v17  ;;  %v2728_v24 = vadd.f32 %v2430_v47, %v2308_v48  ;;  %2254 = vperm.xlu0 %3063, %v1816_v46   ;;  %v6551_v50 = vld [vmem:[#allocation8_spill] sm:$0xff]  ;;  %v1876_v46 = vld [vmem:[%s6255_s4 + $0x188] sm:$0xff] }
 0x27e   :  { %v2370_v56 = vmul.f32 %v2165_v43, %v6551_v50  ;;  %v1460_v48 = vmul.f32 0.0051020407, %v5178_v27  ;;  %v5472_v42 = vmul.f32 0.0051020407, %v5062_v54  ;;  %v1520_v27 = vmul.f32 %v5437_v28, %v5437_v28 }
 0x27f   :  { %2849 = vst [vmem:[%s6256_s5 + $0x10] sm:$0xff] %v2729_v57  ;;  %2850 = vst.msk [vmem:[%s6256_s5 + $0x18] sm:$0xff] %vm746_vm1, %v2730_v41  ;;  %v1550_v47 = vsub.f32 %v1430_v36, %v1490_v14  ;;  %v1813_v57 = vmul.f32 %v3140_v60, %v1753_v21  ;;  %v1843_v41 = vld [vmem:[%s6255_s4 + $0x80] sm:$0xff]  ;;  %v1996_v54 = vsub.f32 %v1876_v46, %v1936_v34  ;;  %v1725_v14 = vld [vmem:[%s6254_s3 + $0x90] sm:$0xff] }
 0x280   :  { %2847 = vst [vmem:[%s6256_s5] sm:$0xff] %v2727_v58  ;;  %2848 = vst.msk [vmem:[%s6256_s5 + $0x8] sm:$0xff] %vm746_vm1, %v2728_v24  ;;  %v2585_v59 = vpop.permute.xlu0 %2584  ;;  %2089 = vperm.xlu1 %3064, %v1783_v3   ;;  %v2580_v43 = vpop.permute.xlu1 %2579  ;;  %v1728_v3 = vld [vmem:[%s6254_s3 + $0xa8] sm:$0xff]  ;;  %v1580_v24 = vsub.f32 %v1460_v48, %v1520_v27  ;;  %v1963_v60 = vsub.f32 %v1843_v41, %v1903_v38  ;;  %v6553_v38 = vld [vmem:[#allocation17_spill] sm:$0xff] }
 0x281   :  { %v2789_v17 = vadd.f32 %v2585_v59, %v2369_v1  ;;  %v2790_v45 = vadd.f32 %v2585_v59, %v2370_v56  ;;  %v2787_v44 = vadd.f32 %v2580_v43, %v2367_v53  ;;  %v2788_v39 = vadd.f32 %v2580_v43, %v2368_v49  ;;  %2524 = vperm.xlu0 %3063, %v1966_v62   ;;  %v3142_v58 = vpop.eup %3141  ;;  %v1873_v1 = vld [vmem:[%s6255_s4 + $0x170] sm:$0xff]  ;;  %v6552_v43 = vld [vmem:[#allocation15_spill] sm:$0xff] }
 0x282   :  { %v3144_v13 = vpop.eup %3143  ;;  %v1517_v53 = vmul.f32 %v5472_v42, %v5472_v42  ;;  %v1610_v30 = vadd.f32 1e-05, %v1550_v47  ;;  %v1788_v49 = vmul.f32 %v3142_v58, %v1728_v3  ;;  %v1933_v34 = vmul.f32 %v1813_v57, %v5343_v32  ;;  %v6555_v3 = vld [vmem:[#allocation16_spill] sm:$0xff] }
 0x283   :  { %2909 = vst [vmem:[%s6256_s5 + $0x1f0] sm:$0xff] %v2789_v17  ;;  %2910 = vst.msk [vmem:[%s6256_s5 + $0x1f8] sm:$0xff] %vm746_vm1, %v2790_v45  ;;  %v3146_v11 = vpop.eup %3145  ;;  %v1640_v56 = vadd.f32 1e-05, %v1580_v24  ;;  %v1848_v45 = vld [vmem:[%s6255_s4 + $0xa8] sm:$0xff]  ;;  %v1755_v24 = vld [vmem:[%s6254_s3 + $0x180] sm:$0xff] }
 0x284   :  { %2907 = vst [vmem:[%s6256_s5 + $0x1e0] sm:$0xff] %v2787_v44  ;;  %2908 = vst.msk [vmem:[%s6256_s5 + $0x1e8] sm:$0xff] %vm746_vm1, %v2788_v39  ;;  %v2175_v36 = vpop.permute.xlu0 %2174  ;;  %2239 = vperm.xlu1 %3064, %v1813_v57   ;;  %v2020_v62 = vpop.permute.xlu1 %2019  ;;  %v1577_v50 = vsub.f32 %v1457_v61, %v1517_v53  ;;  %3149 = vrsqrt.f32 %v1610_v30  ;;  %v1993_v32 = vsub.f32 %v1873_v1, %v1933_v34  ;;  %v5517_v39 = vmul.f32 0.0051020407, %v5197_v19  ;;  %v6557_v30 = vld [vmem:[#allocation12_spill] sm:$0xff] }
 0x285   :  { %2674 = vperm.xlu0 %3063, %v1996_v54   ;;  %v1818_v48 = vmul.f32 %v3146_v11, %v1758_v8  ;;  %v1908_v59 = vmul.f32 %v1788_v49, %v5359_v7  ;;  %3151 = vrsqrt.f32 %v1607_v52  ;;  %v2373_v46 = vmul.f32 %v2175_v36, %v6552_v43  ;;  %v3148_v41 = vpop.eup %3147  ;;  %v6556_v11 = vld [vmem:[#allocation10_spill] sm:$0xff]  ;;  %v1878_v8 = vld [vmem:[%s6255_s4 + $0x198] sm:$0xff] }
 0x286   :  { %v2374_v17 = vmul.f32 %v2175_v36, %v6553_v38  ;;  %v1637_v44 = vadd.f32 1e-05, %v1577_v50  ;;  %3153 = vrsqrt.f32 %v1640_v56  ;;  %v1785_v57 = vmul.f32 %v3144_v13, %v1725_v14 }
 0x287   :  { %v5525_v36 = vmul.f32 0.0051020407, %v5111_v9  ;;  %v1432_v19 = vmul.f32 0.0051020407, %v5231_v31  ;;  %v1938_v13 = vmul.f32 %v1818_v48, %v5376_v22  ;;  %v2311_v53 = vmul.f32 %v2020_v62, %v6556_v11 }
 0x288   :  { %v2445_v21 = vpop.permute.xlu0 %2444  ;;  %2509 = vperm.xlu1 %3064, %v1963_v60   ;;  %v2170_v15 = vpop.permute.xlu1 %2169  ;;  %v1968_v60 = vsub.f32 %v1848_v45, %v1908_v59  ;;  %v1492_v31 = vmul.f32 %v5517_v39, %v5517_v39  ;;  %v5541_v22 = vmul.f32 0.0051020407, %v5214_v23  ;;  %v1815_v1 = vmul.f32 %v3148_v41, %v1755_v24  ;;  %v6558_v59 = vld [vmem:[#allocation11_spill] sm:$0xff] }
 0x289   :  { %2114 = vperm.xlu0 %3063, %v1788_v49   ;;  %v2312_v49 = vmul.f32 %v2020_v62, %v6557_v30  ;;  %v1429_v50 = vmul.f32 0.0051020407, %v5144_v40  ;;  %3155 = vrsqrt.f32 %v1637_v44  ;;  %v1489_v14 = vmul.f32 %v5525_v36, %v5525_v36  ;;  %v1730_v44 = vld [vmem:[%s6254_s3 + $0xb8] sm:$0xff] }
 0x28a   :  { %v1462_v40 = vmul.f32 0.0051020407, %v5246_v5  ;;  %v2371_v43 = vmul.f32 %v2170_v15, %v6558_v59  ;;  %v1845_v5 = vld [vmem:[%s6255_s4 + $0x90] sm:$0xff]  ;;  %v1459_v41 = vmul.f32 0.0051020407, %v5161_v35  ;;  %v1850_v59 = vld [vmem:[%s6255_s4 + $0xb8] sm:$0xff] }
 0x28c   :  { %v2595_v27 = vpop.permute.xlu0 %2594  ;;  %2659 = vperm.xlu1 %3064, %v1993_v32   ;;  %v2025_v47 = vpop.permute.xlu1 %2024  ;;  %v1552_v32 = vsub.f32 %v1432_v19, %v1492_v31 }
 0x28d   :  { %v2793_v7 = vadd.f32 %v2595_v27, %v2373_v46  ;;  %v2794_v58 = vadd.f32 %v2595_v27, %v2374_v17  ;;  %v2313_v54 = vmul.f32 %v2025_v47, %v6554_v2  ;;  %v2314_v61 = vmul.f32 %v2025_v47, %v6555_v3  ;;  %2264 = vperm.xlu0 %3063, %v1818_v48   ;;  %v6559_v46 = vld [vmem:[#allocation13_spill] sm:$0xff]  ;;  %v1875_v2 = vld [vmem:[%s6255_s4 + $0x180] sm:$0xff] }
 0x28e   :  { %v5559_v48 = vmul.f32 0.0051020407, %v5127_v16  ;;  %v2372_v38 = vmul.f32 %v2170_v15, %v6559_v46  ;;  %v3150_v16 = vpop.eup %3149  ;;  %v1522_v17 = vmul.f32 %v5541_v22, %v5541_v22  ;;  %v1935_v27 = vmul.f32 %v1815_v1, %v5387_v18  ;;  %v1757_v46 = vld [vmem:[%s6254_s3 + $0x190] sm:$0xff] }
 0x28f   :  { %2913 = vst [vmem:[%s6256_s5 + $0x210] sm:$0xff] %v2793_v7  ;;  %2914 = vst.msk [vmem:[%s6256_s5 + $0x218] sm:$0xff] %vm746_vm1, %v2794_v58  ;;  %v2733_v9 = vadd.f32 %v2445_v21, %v2313_v54  ;;  %v2734_v34 = vadd.f32 %v2445_v21, %v2314_v61  ;;  %v1905_v21 = vmul.f32 %v1785_v57, %v5366_v63  ;;  %v3152_v47 = vpop.eup %3151  ;;  %v1612_v3 = vadd.f32 1e-05, %v1552_v32 }
 0x290   :  { %v2185_v52 = vpop.permute.xlu0 %2184  ;;  %2099 = vperm.xlu1 %3064, %v1785_v57   ;;  %v2440_v62 = vpop.permute.xlu1 %2439  ;;  %v1998_v63 = vsub.f32 %v1878_v8, %v1938_v13  ;;  %v1549_v57 = vsub.f32 %v1429_v50, %v1489_v14  ;;  %v1582_v61 = vsub.f32 %v1462_v40, %v1522_v17  ;;  %v1519_v19 = vmul.f32 %v5559_v48, %v5559_v48  ;;  %v6561_v13 = vld [vmem:[#allocation25_spill] sm:$0xff] }
 0x291   :  { %2853 = vst [vmem:[%s6256_s5 + $0x30] sm:$0xff] %v2733_v9  ;;  %2854 = vst.msk [vmem:[%s6256_s5 + $0x38] sm:$0xff] %vm746_vm1, %v2734_v34  ;;  %v2731_v23 = vadd.f32 %v2440_v62, %v2311_v53  ;;  %v2732_v56 = vadd.f32 %v2440_v62, %v2312_v49  ;;  %2534 = vperm.xlu0 %3063, %v1968_v60   ;;  %v3154_v54 = vpop.eup %3153  ;;  %v1965_v24 = vsub.f32 %v1845_v5, %v1905_v21  ;;  %v6560_v60 = vld [vmem:[#allocation23_spill] sm:$0xff] }
 0x292   :  { %v2377_v18 = vmul.f32 %v2185_v52, %v6560_v60  ;;  %v2378_v11 = vmul.f32 %v2185_v52, %v6561_v13  ;;  %v1790_v35 = vmul.f32 %v3150_v16, %v1730_v44  ;;  %v1760_v53 = vld [vmem:[%s6254_s3 + $0x1a8] sm:$0xff]  ;;  %v1995_v9 = vsub.f32 %v1875_v2, %v1935_v27  ;;  %v6567_v60 = vld [vmem:[#allocation33_spill] sm:$0xff]  ;;  %v1847_v13 = vld [vmem:[%s6255_s4 + $0xa0] sm:$0xff] }
 0x293   :  { %2851 = vst [vmem:[%s6256_s5 + $0x20] sm:$0xff] %v2731_v23  ;;  %2852 = vst.msk [vmem:[%s6256_s5 + $0x28] sm:$0xff] %vm746_vm1, %v2732_v56  ;;  %v1609_v34 = vadd.f32 1e-05, %v1549_v57  ;;  %v1579_v31 = vsub.f32 %v1459_v41, %v1519_v19  ;;  %3157 = vrsqrt.f32 %v1612_v3  ;;  %v1642_v8 = vadd.f32 1e-05, %v1582_v61  ;;  %v3156_v21 = vpop.eup %3155 }
 0x294   :  { %v5575_v45 = vpop.permute.xlu0 %2454  ;;  %2249 = vperm.xlu1 %3064, %v1815_v1   ;;  %v2590_v15 = vpop.permute.xlu1 %2589  ;;  %v1727_v1 = vld [vmem:[%s6254_s3 + $0xa0] sm:$0xff]  ;;  %v5603_v50 = vmul.f32 0.0051020407, %v5265_v4  ;;  %v1820_v23 = vmul.f32 %v3154_v54, %v1760_v53  ;;  %v1910_v56 = vmul.f32 %v1790_v35, %v5434_v55  ;;  %v1434_v14 = vmul.f32 0.0051020407, %v5299_v26  ;;  %v6563_v41 = vld [vmem:[#allocation24_spill] sm:$0xff] }
 0x295   :  { %v2791_v7 = vadd.f32 %v2590_v15, %v2371_v43  ;;  %v2792_v58 = vadd.f32 %v2590_v15, %v2372_v38  ;;  %2684 = vperm.xlu0 %3063, %v1998_v63   ;;  %v1787_v4 = vmul.f32 %v3152_v47, %v1727_v1  ;;  %3159 = vrsqrt.f32 %v1609_v34  ;;  %v1880_v63 = vld [vmem:[%s6255_s4 + $0x1a8] sm:$0xff]  ;;  %v6565_v54 = vld [vmem:[#allocation20_spill] sm:$0xff] }
 0x296   :  { %v1639_v43 = vadd.f32 1e-05, %v1579_v31  ;;  %3161 = vrsqrt.f32 %v1642_v8  ;;  %v1494_v55 = vmul.f32 %v5603_v50, %v5603_v50  ;;  %v1940_v26 = vmul.f32 %v1820_v23, %v5437_v28  ;;  %v6562_v28 = vld [vmem:[#allocation22_spill] sm:$0xff] }
 0x297   :  { %2911 = vst [vmem:[%s6256_s5 + $0x200] sm:$0xff] %v2791_v7  ;;  %2912 = vst.msk [vmem:[%s6256_s5 + $0x208] sm:$0xff] %vm746_vm1, %v2792_v58  ;;  %v1970_v38 = vsub.f32 %v1850_v59, %v1910_v56  ;;  %v5627_v5 = vmul.f32 0.0051020407, %v5283_v10  ;;  %v1817_v44 = vmul.f32 %v3156_v21, %v1757_v46  ;;  %v1907_v27 = vmul.f32 %v1787_v4, %v5428_v37  ;;  %v6564_v58 = vld [vmem:[#allocation18_spill] sm:$0xff]  ;;  %v6568_v21 = vld [vmem:[#allocation19_spill] sm:$0xff] }
 0x298   :  { %v2605_v30 = vpop.permute.xlu0 %2604  ;;  %2519 = vperm.xlu1 %3064, %v1965_v24   ;;  %v2030_v49 = vpop.permute.xlu1 %2029  ;;  %v1554_v16 = vsub.f32 %v1434_v14, %v1494_v55  ;;  %3163 = vrsqrt.f32 %v1639_v43  ;;  %v5633_v47 = vmul.f32 0.0051020407, %v5180_v20  ;;  %v1464_v10 = vmul.f32 0.0051020407, %v5318_v12  ;;  %v6566_v24 = vld [vmem:[#allocation31_spill] sm:$0xff]  ;;  %v6570_v43 = vld [vmem:[#allocation121_spill] sm:$0xff] }
 0x299   :  { %v2797_v52 = vadd.f32 %v2605_v30, %v2377_v18  ;;  %v2798_v62 = vadd.f32 %v2605_v30, %v2378_v11  ;;  %2124 = vperm.xlu0 %3063, %v1790_v35   ;;  %v2315_v2 = vmul.f32 %v2030_v49, %v6564_v58  ;;  %v2316_v3 = vmul.f32 %v2030_v49, %v6565_v54  ;;  %v1759_v58 = vld [vmem:[%s6254_s3 + $0x1a0] sm:$0xff] }
 0x29a   :  { %v2000_v61 = vsub.f32 %v1880_v63, %v1940_v26  ;;  %v1431_v12 = vmul.f32 0.0051020407, %v5212_v0  ;;  %v1524_v35 = vmul.f32 %v5627_v5, %v5627_v5  ;;  %v1614_v53 = vadd.f32 1e-05, %v1554_v16 }
 0x29b   :  { %2917 = vst [vmem:[%s6256_s5 + $0x230] sm:$0xff] %v2797_v52  ;;  %2918 = vst.msk [vmem:[%s6256_s5 + $0x238] sm:$0xff] %vm746_vm1, %v2798_v62  ;;  %v5661_v52 = vmul.f32 0.0051020407, %v5195_v25  ;;  %v1967_v1 = vsub.f32 %v1847_v13, %v1907_v27  ;;  %v1937_v8 = vmul.f32 %v1817_v44, %v5472_v42  ;;  %v1491_v56 = vmul.f32 %v5633_v47, %v5633_v47  ;;  %v1877_v42 = vld [vmem:[%s6255_s4 + $0x190] sm:$0xff] }
 0x29c   :  { %v2195_v32 = vpop.permute.xlu0 %2194  ;;  %2669 = vperm.xlu1 %3064, %v1995_v9   ;;  %v2180_v40 = vpop.permute.xlu1 %2179  ;;  %v1732_v9 = vld [vmem:[%s6254_s3 + $0xc8] sm:$0xff]  ;;  %v1584_v62 = vsub.f32 %v1464_v10, %v1524_v35  ;;  %v1461_v46 = vmul.f32 0.0051020407, %v6570_v43  ;;  %3165 = vrsqrt.f32 %v1614_v53  ;;  %v5706_v54 = vmul.f32 0.0051020407, %v5336_v6  ;;  %v6572_v13 = vld [vmem:[#allocation40_spill] sm:$0xff] }
 0x29d   :  { %2274 = vperm.xlu0 %3063, %v1820_v23   ;;  %v2381_v19 = vmul.f32 %v2195_v32, %v6566_v24  ;;  %v2382_v37 = vmul.f32 %v2195_v32, %v6567_v60  ;;  %v3158_v11 = vpop.eup %3157  ;;  %v2375_v14 = vmul.f32 %v2180_v40, %v6568_v21  ;;  %v6569_v32 = vld [vmem:[#allocation21_spill] sm:$0xff]  ;;  %v1551_v63 = vsub.f32 %v1431_v12, %v1491_v56  ;;  %v1852_v24 = vld [vmem:[%s6255_s4 + $0xc8] sm:$0xff]  ;;  %v1849_v53 = vld [vmem:[%s6255_s4 + $0xb0] sm:$0xff] }
 0x29e   :  { %v1792_v25 = vmul.f32 %v3158_v11, %v1732_v9  ;;  %v1644_v27 = vadd.f32 1e-05, %v1584_v62  ;;  %v1882_v12 = vld [vmem:[%s6255_s4 + $0x1b8] sm:$0xff]  ;;  %v5728_v9 = vmul.f32 0.0051020407, %v5348_v33 }
 0x29f   :  { %v3160_v23 = vpop.eup %3159  ;;  %v1466_v62 = vmul.f32 0.0051020407, %v5392_v51  ;;  %v6575_v21 = vld [vmem:[#allocation41_spill] sm:$0xff] }
 0x2a0   :  { %v5629_v17 = vpop.permute.xlu0 %2464  ;;  %2109 = vperm.xlu1 %3064, %v1787_v4   ;;  %v2035_v15 = vpop.permute.xlu1 %2034  ;;  %v2376_v4 = vmul.f32 %v2180_v40, %v6569_v32  ;;  %v1729_v40 = vld [vmem:[%s6254_s3 + $0xb0] sm:$0xff]  ;;  %v1912_v10 = vmul.f32 %v1792_v25, %v5517_v39  ;;  %3167 = vrsqrt.f32 %v1644_v27  ;;  %v1436_v39 = vmul.f32 0.0051020407, %v5368_v29  ;;  %v6573_v29 = vld [vmem:[#allocation122_spill] sm:$0xff]  ;;  %v1734_v51 = vld [vmem:[%s6254_s3 + $0xd8] sm:$0xff] }
 0x2a1   :  { %v2317_v57 = vmul.f32 %v2035_v15, %v6562_v28  ;;  %v2318_v7 = vmul.f32 %v2035_v15, %v6563_v41  ;;  %2544 = vperm.xlu0 %3063, %v1970_v38   ;;  %v3162_v59 = vpop.eup %3161  ;;  %v1762_v38 = vld [vmem:[%s6254_s3 + $0x1b8] sm:$0xff]  ;;  %v1997_v28 = vsub.f32 %v1877_v42, %v1937_v8 }
 0x2a2   :  { %v3164_v41 = vpop.eup %3163  ;;  %v1972_v11 = vsub.f32 %v1852_v24, %v1912_v10 }
 0x2a3   :  { %v2737_v18 = vadd.f32 %v5575_v45, %v2317_v57  ;;  %v2738_v20 = vadd.f32 %v5575_v45, %v2318_v7  ;;  %v1789_v57 = vmul.f32 %v3160_v23, %v1729_v40  ;;  %v1822_v7 = vmul.f32 %v3162_v59, %v1762_v38  ;;  %v6574_v23 = vld [vmem:[#allocation39_spill] sm:$0xff] }
 0x2a4   :  { %v2615_v30 = vpop.permute.xlu0 %2614  ;;  %2259 = vperm.xlu1 %3064, %v1817_v44   ;;  %v2450_v49 = vpop.permute.xlu1 %2449  ;;  %v1521_v44 = vmul.f32 %v5661_v52, %v5661_v52  ;;  %v1819_v60 = vmul.f32 %v3164_v41, %v1759_v58  ;;  %v1526_v40 = vmul.f32 %v5728_v9, %v5728_v9 }
 0x2a5   :  { %2857 = vst [vmem:[%s6256_s5 + $0x50] sm:$0xff] %v2737_v18  ;;  %2858 = vst.msk [vmem:[%s6256_s5 + $0x58] sm:$0xff] %vm746_vm1, %v2738_v20  ;;  %v2801_v0 = vadd.f32 %v2615_v30, %v2381_v19  ;;  %v2802_v45 = vadd.f32 %v2615_v30, %v2382_v37  ;;  %v2735_v34 = vadd.f32 %v2450_v49, %v2315_v2  ;;  %2694 = vperm.xlu0 %3063, %v2000_v61   ;;  %v6571_v18 = vld [vmem:[#allocation38_spill] sm:$0xff] }
 0x2a6   :  { %v2736_v31 = vadd.f32 %v2450_v49, %v2316_v3  ;;  %v1581_v2 = vsub.f32 %v1461_v46, %v1521_v44  ;;  %v1611_v19 = vadd.f32 1e-05, %v1551_v63  ;;  %v1909_v37 = vmul.f32 %v1789_v57, %v5525_v36  ;;  %v3166_v8 = vpop.eup %3165  ;;  %v6578_v63 = vld [vmem:[#allocation32_spill] sm:$0xff] }
 0x2a7   :  { %2921 = vst [vmem:[%s6256_s5 + $0x250] sm:$0xff] %v2801_v0  ;;  %2922 = vst.msk [vmem:[%s6256_s5 + $0x258] sm:$0xff] %vm746_vm1, %v2802_v45  ;;  %v1942_v35 = vmul.f32 %v1822_v7, %v5541_v22  ;;  %v5723_v49 = vmul.f32 0.0051020407, %v6573_v29  ;;  %v1496_v36 = vmul.f32 %v5706_v54, %v5706_v54  ;;  %v1939_v32 = vmul.f32 %v1819_v60, %v5559_v48  ;;  %v6579_v48 = vld [vmem:[#allocation126_spill] sm:$0xff] }
 0x2a8   :  { %2855 = vst [vmem:[%s6256_s5 + $0x40] sm:$0xff] %v2735_v34  ;;  %2856 = vst.msk [vmem:[%s6256_s5 + $0x48] sm:$0xff] %vm746_vm1, %v2736_v31  ;;  %v2055_v55 = vpop.permute.xlu0 %2054  ;;  %2529 = vperm.xlu1 %3064, %v1967_v1   ;;  %v2600_v26 = vpop.permute.xlu1 %2599  ;;  %v1641_v30 = vadd.f32 1e-05, %v1581_v2  ;;  %3169 = vrsqrt.f32 %v1611_v19  ;;  %v1969_v1 = vsub.f32 %v1849_v53, %v1909_v37  ;;  %v1586_v27 = vsub.f32 %v1466_v62, %v1526_v40  ;;  %v6582_v37 = vld [vmem:[#allocation133_spill] sm:$0xff] }
 0x2a9   :  { %v2795_v16 = vadd.f32 %v2600_v26, %v2375_v14  ;;  %v2796_v15 = vadd.f32 %v2600_v26, %v2376_v4  ;;  %2134 = vperm.xlu0 %3063, %v1792_v25   ;;  %v2325_v20 = vmul.f32 %v2055_v55, %v6571_v18  ;;  %v2326_v6 = vmul.f32 %v2055_v55, %v6572_v13  ;;  %v6576_v25 = vld [vmem:[#allocation128_spill] sm:$0xff]  ;;  %v6577_v26 = vld [vmem:[#allocation30_spill] sm:$0xff] }
 0x2aa   :  { %v1556_v31 = vsub.f32 %v1436_v39, %v1496_v36  ;;  %v2002_v33 = vsub.f32 %v1882_v12, %v1942_v35  ;;  %3171 = vrsqrt.f32 %v1641_v30  ;;  %v1493_v4 = vmul.f32 %v5723_v49, %v5723_v49  ;;  %v3168_v24 = vpop.eup %3167  ;;  %v1764_v39 = vld [vmem:[%s6254_s3 + $0x1c8] sm:$0xff]  ;;  %v6584_v30 = vld [vmem:[#allocation29_spill] sm:$0xff] }
 0x2ab   :  { %2915 = vst [vmem:[%s6256_s5 + $0x220] sm:$0xff] %v2795_v16  ;;  %2916 = vst.msk [vmem:[%s6256_s5 + $0x228] sm:$0xff] %vm746_vm1, %v2796_v15  ;;  %v1433_v42 = vmul.f32 0.0051020407, %v6576_v25  ;;  %v5752_v15 = vmul.f32 0.0051020407, %v6579_v48  ;;  %v1824_v36 = vmul.f32 %v3168_v24, %v1764_v39 }
 0x2ac   :  { %v2205_v3 = vpop.permute.xlu0 %2204  ;;  %2679 = vperm.xlu1 %3064, %v1997_v28   ;;  %v2040_v61 = vpop.permute.xlu1 %2039  ;;  %v1616_v44 = vadd.f32 1e-05, %v1556_v31  ;;  %v1794_v28 = vmul.f32 %v3166_v8, %v1734_v51  ;;  %v1463_v18 = vmul.f32 0.0051020407, %v6582_v37  ;;  %v6583_v35 = vld [vmem:[#allocation27_spill] sm:$0xff]  ;;  %v6586_v51 = vld [vmem:[#allocation48_spill] sm:$0xff] }
 0x2ad   :  { %2284 = vperm.xlu0 %3063, %v1822_v7   ;;  %v2385_v56 = vmul.f32 %v2205_v3, %v6574_v23  ;;  %v2386_v14 = vmul.f32 %v2205_v3, %v6575_v21  ;;  %v6581_v7 = vld [vmem:[#allocation28_spill] sm:$0xff]  ;;  %v1879_v3 = vld [vmem:[%s6255_s4 + $0x1a0] sm:$0xff]  ;;  %v1523_v13 = vmul.f32 %v5752_v15, %v5752_v15  ;;  %v1944_v25 = vmul.f32 %v1824_v36, %v5627_v5  ;;  %v6588_v48 = vld [vmem:[#allocation47_spill] sm:$0xff] }
 0x2ae   :  { %v2320_v10 = vmul.f32 %v2040_v61, %v6581_v7  ;;  %3173 = vrsqrt.f32 %v1616_v44  ;;  %v6589_v44 = vld [vmem:[#allocation49_spill] sm:$0xff] }
 0x2b0   :  { %v2475_v0 = vpop.permute.xlu0 %2474  ;;  %2119 = vperm.xlu1 %3064, %v1789_v57   ;;  %v2190_v45 = vpop.permute.xlu1 %2189  ;;  %v6580_v57 = vld [vmem:[#allocation26_spill] sm:$0xff] }
 0x2b1   :  { %v2745_v34 = vadd.f32 %v2475_v0, %v2325_v20  ;;  %v2746_v22 = vadd.f32 %v2475_v0, %v2326_v6  ;;  %2554 = vperm.xlu0 %3063, %v1972_v11   ;;  %v2319_v41 = vmul.f32 %v2040_v61, %v6580_v57  ;;  %v1646_v6 = vadd.f32 1e-05, %v1586_v27  ;;  %v1731_v0 = vld [vmem:[%s6254_s3 + $0xc0] sm:$0xff] }
 0x2b2   :  { %v1999_v11 = vsub.f32 %v1879_v3, %v1939_v32  ;;  %v3170_v12 = vpop.eup %3169  ;;  %v2379_v53 = vmul.f32 %v2190_v45, %v6583_v35  ;;  %v2380_v29 = vmul.f32 %v2190_v45, %v6584_v30  ;;  %v1854_v45 = vld [vmem:[%s6255_s4 + $0xd8] sm:$0xff] }
 0x2b3   :  { %2865 = vst [vmem:[%s6256_s5 + $0x90] sm:$0xff] %v2745_v34  ;;  %2866 = vst.msk [vmem:[%s6256_s5 + $0x98] sm:$0xff] %vm746_vm1, %v2746_v22  ;;  %v1914_v34 = vmul.f32 %v1794_v28, %v5603_v50  ;;  %3175 = vrsqrt.f32 %v1646_v6  ;;  %v1791_v21 = vmul.f32 %v3170_v12, %v1731_v0 }
 0x2b4   :  { %v2625_v59 = vpop.permute.xlu0 %2624  ;;  %2269 = vperm.xlu1 %3064, %v1819_v60   ;;  %v2045_v43 = vpop.permute.xlu1 %2044  ;;  %v1553_v60 = vsub.f32 %v1433_v42, %v1493_v4  ;;  %v1761_v4 = vld [vmem:[%s6254_s3 + $0x1b0] sm:$0xff] }
 0x2b5   :  { %v2805_v46 = vadd.f32 %v2625_v59, %v2385_v56  ;;  %v2806_v55 = vadd.f32 %v2625_v59, %v2386_v14  ;;  %v2321_v38 = vmul.f32 %v2045_v43, %v6577_v26  ;;  %v2322_v16 = vmul.f32 %v2045_v43, %v6578_v63  ;;  %2704 = vperm.xlu0 %3063, %v2002_v33   ;;  %v3172_v56 = vpop.eup %3171  ;;  %v6585_v14 = vld [vmem:[#allocation46_spill] sm:$0xff]  ;;  %v1884_v59 = vld [vmem:[%s6255_s4 + $0x1c8] sm:$0xff]  ;;  %v6587_v63 = vld [vmem:[#allocation101_spill] sm:$0xff] }
 0x2b6   :  { %v1613_v62 = vadd.f32 1e-05, %v1553_v60  ;;  %v1974_v50 = vsub.f32 %v1854_v45, %v1914_v34  ;;  %v1821_v26 = vmul.f32 %v3172_v56, %v1761_v4 }
 0x2b7   :  { %2925 = vst [vmem:[%s6256_s5 + $0x270] sm:$0xff] %v2805_v46  ;;  %2926 = vst.msk [vmem:[%s6256_s5 + $0x278] sm:$0xff] %vm746_vm1, %v2806_v55  ;;  %v2741_v58 = vadd.f32 %v5629_v17, %v2321_v38  ;;  %v2742_v2 = vadd.f32 %v5629_v17, %v2322_v16  ;;  %v1911_v38 = vmul.f32 %v1791_v21, %v5633_v47  ;;  %v5815_v16 = vmul.f32 0.0051020407, %v6587_v63  ;;  %v1851_v47 = vld [vmem:[%s6255_s4 + $0xc0] sm:$0xff] }
 0x2b8   :  { %v2065_v19 = vpop.permute.xlu0 %2064  ;;  %2539 = vperm.xlu1 %3064, %v1969_v1   ;;  %v2460_v61 = vpop.permute.xlu1 %2459  ;;  %v1583_v1 = vsub.f32 %v1463_v18, %v1523_v13  ;;  %3177 = vrsqrt.f32 %v1613_v62  ;;  %v1941_v60 = vmul.f32 %v1821_v26, %v5661_v52  ;;  %v6592_v18 = vld [vmem:[#allocation34_spill] sm:$0xff]  ;;  %v1881_v52 = vld [vmem:[%s6255_s4 + $0x1b0] sm:$0xff]  ;;  %v6595_v62 = vld [vmem:[#allocation35_spill] sm:$0xff] }
 0x2b9   :  { %2861 = vst [vmem:[%s6256_s5 + $0x70] sm:$0xff] %v2741_v58  ;;  %2862 = vst.msk [vmem:[%s6256_s5 + $0x78] sm:$0xff] %vm746_vm1, %v2742_v2  ;;  %v2739_v17 = vadd.f32 %v2460_v61, %v2319_v41  ;;  %v2740_v20 = vadd.f32 %v2460_v61, %v2320_v10  ;;  %2144 = vperm.xlu0 %3063, %v1794_v28   ;;  %v2329_v33 = vmul.f32 %v2065_v19, %v6585_v14  ;;  %v3174_v57 = vpop.eup %3173  ;;  %v1736_v10 = vld [vmem:[%s6254_s3 + $0xe8] sm:$0xff] }
 0x2ba   :  { %v2330_v32 = vmul.f32 %v2065_v19, %v6586_v51  ;;  %v1643_v43 = vadd.f32 1e-05, %v1583_v1  ;;  %v2004_v28 = vsub.f32 %v1884_v59, %v1944_v25  ;;  %v6590_v58 = vld [vmem:[#allocation103_spill] sm:$0xff]  ;;  %v6591_v19 = vld [vmem:[#allocation105_spill] sm:$0xff]  ;;  %v1971_v39 = vsub.f32 %v1851_v47, %v1911_v38  ;;  %v1763_v38 = vld [vmem:[%s6254_s3 + $0x1c0] sm:$0xff] }
 0x2bb   :  { %2859 = vst [vmem:[%s6256_s5 + $0x60] sm:$0xff] %v2739_v17  ;;  %2860 = vst.msk [vmem:[%s6256_s5 + $0x68] sm:$0xff] %vm746_vm1, %v2740_v20  ;;  %v1435_v2 = vmul.f32 0.0051020407, %v6590_v58  ;;  %v5834_v61 = vmul.f32 0.0051020407, %v6591_v19  ;;  %v1495_v37 = vmul.f32 %v5815_v16, %v5815_v16  ;;  %v1796_v6 = vmul.f32 %v3174_v57, %v1736_v10 }
 0x2bc   :  { %v2215_v22 = vpop.permute.xlu0 %2214  ;;  %2689 = vperm.xlu1 %3064, %v1999_v11   ;;  %v2610_v31 = vpop.permute.xlu1 %2609  ;;  %3179 = vrsqrt.f32 %v1643_v43  ;;  %v6593_v20 = vld [vmem:[#allocation36_spill] sm:$0xff]  ;;  %v6597_v43 = vld [vmem:[#allocation54_spill] sm:$0xff]  ;;  %v6600_v58 = vld [vmem:[#allocation57_spill] sm:$0xff] }
 0x2bd   :  { %v2799_v8 = vadd.f32 %v2610_v31, %v2379_v53  ;;  %v2800_v23 = vadd.f32 %v2610_v31, %v2380_v29  ;;  %2294 = vperm.xlu0 %3063, %v1824_v36   ;;  %v2389_v5 = vmul.f32 %v2215_v22, %v6588_v48  ;;  %v2390_v27 = vmul.f32 %v2215_v22, %v6589_v44  ;;  %v3176_v11 = vpop.eup %3175  ;;  %v1766_v53 = vld [vmem:[%s6254_s3 + $0x1d8] sm:$0xff]  ;;  %v6594_v29 = vld [vmem:[#allocation110_spill] sm:$0xff] }
 0x2be   :  { %v1555_v30 = vsub.f32 %v1435_v2, %v1495_v37  ;;  %v1465_v36 = vmul.f32 0.0051020407, %v6594_v29  ;;  %v1525_v22 = vmul.f32 %v5834_v61, %v5834_v61  ;;  %v2001_v31 = vsub.f32 %v1881_v52, %v1941_v60  ;;  %v1886_v44 = vld [vmem:[%s6255_s4 + $0x1d8] sm:$0xff] }
 0x2bf   :  { %2919 = vst [vmem:[%s6256_s5 + $0x240] sm:$0xff] %v2799_v8  ;;  %2920 = vst.msk [vmem:[%s6256_s5 + $0x248] sm:$0xff] %vm746_vm1, %v2800_v23  ;;  %v6596_v8 = vld [vmem:[#allocation37_spill] sm:$0xff]  ;;  %v1826_v56 = vmul.f32 %v3176_v11, %v1766_v53  ;;  %v1916_v14 = vmul.f32 %v1796_v6, %v5706_v54 }
 0x2c0   :  { %v2485_v42 = vpop.permute.xlu0 %2484  ;;  %2129 = vperm.xlu1 %3064, %v1791_v21   ;;  %v2050_v40 = vpop.permute.xlu1 %2049  ;;  %v1733_v21 = vld [vmem:[%s6254_s3 + $0xd0] sm:$0xff]  ;;  %v1585_v4 = vsub.f32 %v1465_v36, %v1525_v22  ;;  %v6604_v36 = vld [vmem:[#allocation45_spill] sm:$0xff] }
 0x2c1   :  { %v2749_v46 = vadd.f32 %v2485_v42, %v2329_v33  ;;  %v2750_v55 = vadd.f32 %v2485_v42, %v2330_v32  ;;  %2564 = vperm.xlu0 %3063, %v1974_v50   ;;  %v2323_v17 = vmul.f32 %v2050_v40, %v6592_v18  ;;  %v2324_v13 = vmul.f32 %v2050_v40, %v6593_v20  ;;  %v1856_v32 = vld [vmem:[%s6255_s4 + $0xe8] sm:$0xff]  ;;  %v6601_v18 = vld [vmem:[#allocation42_spill] sm:$0xff]  ;;  %v6602_v20 = vld [vmem:[#allocation44_spill] sm:$0xff] }
 0x2c2   :  { %v3178_v45 = vpop.eup %3177  ;;  %v1615_v50 = vadd.f32 1e-05, %v1555_v30  ;;  %v1976_v54 = vsub.f32 %v1856_v32, %v1916_v14  ;;  %v1946_v63 = vmul.f32 %v1826_v56, %v5728_v9  ;;  %v6603_v30 = vld [vmem:[#allocation43_spill] sm:$0xff] }
 0x2c3   :  { %2869 = vst [vmem:[%s6256_s5 + $0xb0] sm:$0xff] %v2749_v46  ;;  %2870 = vst.msk [vmem:[%s6256_s5 + $0xb8] sm:$0xff] %vm746_vm1, %v2750_v55  ;;  %v1793_v40 = vmul.f32 %v3178_v45, %v1733_v21  ;;  %v6598_v55 = vld [vmem:[#allocation56_spill] sm:$0xff] }
 0x2c4   :  { %v2635_v41 = vpop.permute.xlu0 %2634  ;;  %2279 = vperm.xlu1 %3064, %v1821_v26   ;;  %v2200_v7 = vpop.permute.xlu1 %2199  ;;  %3181 = vrsqrt.f32 %v1615_v50  ;;  %v2006_v9 = vsub.f32 %v1886_v44, %v1946_v63  ;;  %v6606_v21 = vld [vmem:[#allocation64_spill] sm:$0xff] }
 0x2c5   :  { %v2809_v3 = vadd.f32 %v2635_v41, %v2389_v5  ;;  %v2810_v24 = vadd.f32 %v2635_v41, %v2390_v27  ;;  %2714 = vperm.xlu0 %3063, %v2004_v28   ;;  %v2383_v1 = vmul.f32 %v2200_v7, %v6595_v62  ;;  %v2384_v23 = vmul.f32 %v2200_v7, %v6596_v8  ;;  %v6599_v7 = vld [vmem:[#allocation55_spill] sm:$0xff] }
 0x2c6   :  { %v3180_v59 = vpop.eup %3179  ;;  %v1645_v27 = vadd.f32 1e-05, %v1585_v4  ;;  %v1913_v41 = vmul.f32 %v1793_v40, %v5723_v49 }
 0x2c7   :  { %2929 = vst [vmem:[%s6256_s5 + $0x290] sm:$0xff] %v2809_v3  ;;  %2930 = vst.msk [vmem:[%s6256_s5 + $0x298] sm:$0xff] %vm746_vm1, %v2810_v24  ;;  %v1823_v57 = vmul.f32 %v3180_v59, %v1763_v38  ;;  %v1853_v3 = vld [vmem:[%s6255_s4 + $0xd0] sm:$0xff] }
 0x2c8   :  { %v2075_v12 = vpop.permute.xlu0 %2074  ;;  %2549 = vperm.xlu1 %3064, %v1971_v39   ;;  %v2470_v35 = vpop.permute.xlu1 %2469  ;;  %3183 = vrsqrt.f32 %v1645_v27  ;;  %v1973_v60 = vsub.f32 %v1853_v3, %v1913_v41  ;;  %v6610_v27 = vld [vmem:[#allocation52_spill] sm:$0xff] }
 0x2c9   :  { %v2743_v0 = vadd.f32 %v2470_v35, %v2323_v17  ;;  %v2744_v34 = vadd.f32 %v2470_v35, %v2324_v13  ;;  %2154 = vperm.xlu0 %3063, %v1796_v6   ;;  %v2333_v46 = vmul.f32 %v2075_v12, %v6597_v43  ;;  %v2334_v26 = vmul.f32 %v2075_v12, %v6598_v55  ;;  %v1883_v6 = vld [vmem:[%s6255_s4 + $0x1c0] sm:$0xff]  ;;  %v6608_v43 = vld [vmem:[#allocation65_spill] sm:$0xff] }
 0x2ca   :  { %v1943_v37 = vmul.f32 %v1823_v57, %v5752_v15  ;;  %v1855_v55 = vld [vmem:[%s6255_s4 + $0xe0] sm:$0xff] }
 0x2cb   :  { %2863 = vst [vmem:[%s6256_s5 + $0x80] sm:$0xff] %v2743_v0  ;;  %2864 = vst.msk [vmem:[%s6256_s5 + $0x88] sm:$0xff] %vm746_vm1, %v2744_v34  ;;  %v1735_v34 = vld [vmem:[%s6254_s3 + $0xe0] sm:$0xff] }
 0x2cc   :  { %v2225_v33 = vpop.permute.xlu0 %2224  ;;  %2699 = vperm.xlu1 %3064, %v2001_v31   ;;  %v2620_v51 = vpop.permute.xlu1 %2619  ;;  %v2003_v35 = vsub.f32 %v1883_v6, %v1943_v37 }
 0x2cd   :  { %v2803_v25 = vadd.f32 %v2620_v51, %v2383_v1  ;;  %v2804_v42 = vadd.f32 %v2620_v51, %v2384_v23  ;;  %2304 = vperm.xlu0 %3063, %v1826_v56   ;;  %v2393_v10 = vmul.f32 %v2225_v33, %v6599_v7  ;;  %v2394_v2 = vmul.f32 %v2225_v33, %v6600_v58  ;;  %v6605_v23 = vld [vmem:[#allocation62_spill] sm:$0xff]  ;;  %v1765_v33 = vld [vmem:[%s6254_s3 + $0x1d0] sm:$0xff]  ;;  %v6611_v58 = vld [vmem:[#allocation51_spill] sm:$0xff] }
 0x2ce   :  { %v3182_v53 = vpop.eup %3181 }
 0x2cf   :  { %2923 = vst [vmem:[%s6256_s5 + $0x260] sm:$0xff] %v2803_v25  ;;  %2924 = vst.msk [vmem:[%s6256_s5 + $0x268] sm:$0xff] %vm746_vm1, %v2804_v42  ;;  %v1795_v1 = vmul.f32 %v3182_v53, %v1735_v34 }
 0x2d0   :  { %v2495_v48 = vpop.permute.xlu0 %2494  ;;  %2139 = vperm.xlu1 %3064, %v1793_v40   ;;  %v2060_v5 = vpop.permute.xlu1 %2059  ;;  %v6607_v40 = vld [vmem:[#allocation63_spill] sm:$0xff] }
 0x2d1   :  { %v2753_v28 = vadd.f32 %v2495_v48, %v2333_v46  ;;  %v2754_v47 = vadd.f32 %v2495_v48, %v2334_v26  ;;  %2574 = vperm.xlu0 %3063, %v1976_v54   ;;  %v2327_v17 = vmul.f32 %v2060_v5, %v6601_v18  ;;  %v2328_v13 = vmul.f32 %v2060_v5, %v6602_v20  ;;  %v6609_v5 = vld [vmem:[#allocation50_spill] sm:$0xff]  ;;  %v6614_v18 = vld [vmem:[#allocation72_spill] sm:$0xff] }
 0x2d2   :  { %v3184_v8 = vpop.eup %3183  ;;  %v1915_v42 = vmul.f32 %v1795_v1, %v5815_v16 }
 0x2d3   :  { %2873 = vst [vmem:[%s6256_s5 + $0xd0] sm:$0xff] %v2753_v28  ;;  %2874 = vst.msk [vmem:[%s6256_s5 + $0xd8] sm:$0xff] %vm746_vm1, %v2754_v47  ;;  %v1825_v25 = vmul.f32 %v3184_v8, %v1765_v33  ;;  %v1885_v47 = vld [vmem:[%s6255_s4 + $0x1d0] sm:$0xff] }
 0x2d4   :  { %v2645_v24 = vpop.permute.xlu0 %2644  ;;  %2289 = vperm.xlu1 %3064, %v1823_v57   ;;  %v2210_v49 = vpop.permute.xlu1 %2209  ;;  %v1975_v63 = vsub.f32 %v1855_v55, %v1915_v42  ;;  %v6622_v42 = vld [vmem:[#allocation80_spill] sm:$0xff] }
 0x2d5   :  { %v2813_v19 = vadd.f32 %v2645_v24, %v2393_v10  ;;  %v2814_v39 = vadd.f32 %v2645_v24, %v2394_v2  ;;  %2724 = vperm.xlu0 %3063, %v2006_v9   ;;  %v2387_v29 = vmul.f32 %v2210_v49, %v6603_v30  ;;  %v2388_v0 = vmul.f32 %v2210_v49, %v6604_v36  ;;  %v6612_v9 = vld [vmem:[#allocation53_spill] sm:$0xff] }
 0x2d6   :  { %v1945_v48 = vmul.f32 %v1825_v25, %v5834_v61 }
 0x2d7   :  { %2933 = vst [vmem:[%s6256_s5 + $0x2b0] sm:$0xff] %v2813_v19  ;;  %2934 = vst.msk [vmem:[%s6256_s5 + $0x2b8] sm:$0xff] %vm746_vm1, %v2814_v39 }
 0x2d8   :  { %v2085_v52 = vpop.permute.xlu0 %2084  ;;  %2559 = vperm.xlu1 %3064, %v1973_v60   ;;  %v2480_v15 = vpop.permute.xlu1 %2479  ;;  %v2005_v10 = vsub.f32 %v1885_v47, %v1945_v48  ;;  %v6613_v60 = vld [vmem:[#allocation70_spill] sm:$0xff]  ;;  %v6626_v47 = vld [vmem:[#allocation68_spill] sm:$0xff] }
 0x2d9   :  { %v2747_v11 = vadd.f32 %v2480_v15, %v2327_v17  ;;  %v2748_v12 = vadd.f32 %v2480_v15, %v2328_v13  ;;  %v2337_v56 = vmul.f32 %v2085_v52, %v6605_v23  ;;  %v2338_v14 = vmul.f32 %v2085_v52, %v6606_v21  ;;  %v6615_v15 = vld [vmem:[#allocation71_spill] sm:$0xff]  ;;  %v6620_v21 = vld [vmem:[#allocation61_spill] sm:$0xff] }
 0x2da   :  { %v6619_v23 = vld [vmem:[#allocation59_spill] sm:$0xff] }
 0x2db   :  { %2867 = vst [vmem:[%s6256_s5 + $0xa0] sm:$0xff] %v2747_v11  ;;  %2868 = vst.msk [vmem:[%s6256_s5 + $0xa8] sm:$0xff] %vm746_vm1, %v2748_v12  ;;  %v6616_v12 = vld [vmem:[#allocation73_spill] sm:$0xff] }
 0x2dc   :  { %v2235_v22 = vpop.permute.xlu0 %2234  ;;  %2709 = vperm.xlu1 %3064, %v2003_v35   ;;  %v2630_v31 = vpop.permute.xlu1 %2629 }
 0x2dd   :  { %v2807_v45 = vadd.f32 %v2630_v31, %v2387_v29  ;;  %v2808_v62 = vadd.f32 %v2630_v31, %v2388_v0  ;;  %v2397_v59 = vmul.f32 %v2235_v22, %v6607_v40  ;;  %v2398_v46 = vmul.f32 %v2235_v22, %v6608_v43  ;;  %v6617_v0 = vld [vmem:[#allocation58_spill] sm:$0xff]  ;;  %v6618_v22 = vld [vmem:[#allocation60_spill] sm:$0xff] }
 0x2df   :  { %2927 = vst [vmem:[%s6256_s5 + $0x280] sm:$0xff] %v2807_v45  ;;  %2928 = vst.msk [vmem:[%s6256_s5 + $0x288] sm:$0xff] %vm746_vm1, %v2808_v62 }
 0x2e0   :  { %v2505_v51 = vpop.permute.xlu0 %2504  ;;  %2149 = vperm.xlu1 %3064, %v1795_v1   ;;  %v2070_v32 = vpop.permute.xlu1 %2069 }
 0x2e1   :  { %v2757_v50 = vadd.f32 %v2505_v51, %v2337_v56  ;;  %v2758_v4 = vadd.f32 %v2505_v51, %v2338_v14  ;;  %v2331_v44 = vmul.f32 %v2070_v32, %v6609_v5  ;;  %v2332_v28 = vmul.f32 %v2070_v32, %v6610_v27  ;;  %v6625_v27 = vld [vmem:[#allocation66_spill] sm:$0xff] }
 0x2e3   :  { %2877 = vst [vmem:[%s6256_s5 + $0xf0] sm:$0xff] %v2757_v50  ;;  %2878 = vst.msk [vmem:[%s6256_s5 + $0xf8] sm:$0xff] %vm746_vm1, %v2758_v4  ;;  %v6621_v4 = vld [vmem:[#allocation78_spill] sm:$0xff] }
 0x2e4   :  { %v2655_v26 = vpop.permute.xlu0 %2654  ;;  %2299 = vperm.xlu1 %3064, %v1825_v25   ;;  %v2220_v16 = vpop.permute.xlu1 %2219 }
 0x2e5   :  { %v2817_v54 = vadd.f32 %v2655_v26, %v2397_v59  ;;  %v2818_v38 = vadd.f32 %v2655_v26, %v2398_v46  ;;  %v2391_v2 = vmul.f32 %v2220_v16, %v6611_v58  ;;  %v2392_v3 = vmul.f32 %v2220_v16, %v6612_v9  ;;  %v6623_v26 = vld [vmem:[#allocation79_spill] sm:$0xff]  ;;  %v6628_v9 = vld [vmem:[#allocation69_spill] sm:$0xff] }
 0x2e6   :  { %v6627_v58 = vld [vmem:[#allocation67_spill] sm:$0xff] }
 0x2e7   :  { %2937 = vst [vmem:[%s6256_s5 + $0x2d0] sm:$0xff] %v2817_v54  ;;  %2938 = vst.msk [vmem:[%s6256_s5 + $0x2d8] sm:$0xff] %vm746_vm1, %v2818_v38  ;;  %v6624_v54 = vld [vmem:[#allocation81_spill] sm:$0xff] }
 0x2e8   :  { %v2095_v57 = vpop.permute.xlu0 %2094  ;;  %2569 = vperm.xlu1 %3064, %v1975_v63   ;;  %v2490_v61 = vpop.permute.xlu1 %2489 }
 0x2e9   :  { %v2751_v41 = vadd.f32 %v2490_v61, %v2331_v44  ;;  %v2752_v7 = vadd.f32 %v2490_v61, %v2332_v28  ;;  %v2341_v37 = vmul.f32 %v2095_v57, %v6613_v60  ;;  %v2342_v17 = vmul.f32 %v2095_v57, %v6614_v18  ;;  %v6629_v60 = vld [vmem:[#allocation86_spill] sm:$0xff]  ;;  %v6630_v18 = vld [vmem:[#allocation88_spill] sm:$0xff] }
 0x2eb   :  { %2871 = vst [vmem:[%s6256_s5 + $0xc0] sm:$0xff] %v2751_v41  ;;  %2872 = vst.msk [vmem:[%s6256_s5 + $0xc8] sm:$0xff] %vm746_vm1, %v2752_v7 }
 0x2ec   :  { %v2245_v24 = vpop.permute.xlu0 %2244  ;;  %2719 = vperm.xlu1 %3064, %v2005_v10   ;;  %v2640_v49 = vpop.permute.xlu1 %2639 }
 0x2ed   :  { %v2811_v19 = vadd.f32 %v2640_v49, %v2391_v2  ;;  %v2812_v39 = vadd.f32 %v2640_v49, %v2392_v3  ;;  %v2401_v11 = vmul.f32 %v2245_v24, %v6615_v15  ;;  %v2402_v35 = vmul.f32 %v2245_v24, %v6616_v12  ;;  %v6631_v15 = vld [vmem:[#allocation87_spill] sm:$0xff]  ;;  %v6632_v12 = vld [vmem:[#allocation89_spill] sm:$0xff] }
 0x2ef   :  { %2931 = vst [vmem:[%s6256_s5 + $0x2a0] sm:$0xff] %v2811_v19  ;;  %2932 = vst.msk [vmem:[%s6256_s5 + $0x2a8] sm:$0xff] %vm746_vm1, %v2812_v39 }
 0x2f0   :  { %v2515_v20 = vpop.permute.xlu0 %2514  ;;  %v2080_v13 = vpop.permute.xlu1 %2079 }
 0x2f1   :  { %v2761_v6 = vadd.f32 %v2515_v20, %v2341_v37  ;;  %v2762_v52 = vadd.f32 %v2515_v20, %v2342_v17  ;;  %v2335_v34 = vmul.f32 %v2080_v13, %v6617_v0  ;;  %v2336_v31 = vmul.f32 %v2080_v13, %v6618_v22  ;;  %v6633_v0 = vld [vmem:[#allocation74_spill] sm:$0xff]  ;;  %v6634_v22 = vld [vmem:[#allocation76_spill] sm:$0xff] }
 0x2f3   :  { %2881 = vst [vmem:[%s6256_s5 + $0x110] sm:$0xff] %v2761_v6  ;;  %2882 = vst.msk [vmem:[%s6256_s5 + $0x118] sm:$0xff] %vm746_vm1, %v2762_v52 }
 0x2f4   :  { %v2665_v53 = vpop.permute.xlu0 %2664  ;;  %v2230_v30 = vpop.permute.xlu1 %2229 }
 0x2f5   :  { %v2821_v29 = vadd.f32 %v2665_v53, %v2401_v11  ;;  %v2822_v36 = vadd.f32 %v2665_v53, %v2402_v35  ;;  %v2395_v56 = vmul.f32 %v2230_v30, %v6619_v23  ;;  %v2396_v14 = vmul.f32 %v2230_v30, %v6620_v21  ;;  %v6635_v23 = vld [vmem:[#allocation75_spill] sm:$0xff]  ;;  %v6636_v21 = vld [vmem:[#allocation77_spill] sm:$0xff] }
 0x2f7   :  { %2941 = vst [vmem:[%s6256_s5 + $0x2f0] sm:$0xff] %v2821_v29  ;;  %2942 = vst.msk [vmem:[%s6256_s5 + $0x2f8] sm:$0xff] %vm746_vm1, %v2822_v36 }
 0x2f8   :  { %v2105_v45 = vpop.permute.xlu0 %2104  ;;  %v2500_v62 = vpop.permute.xlu1 %2499 }
 0x2f9   :  { %v2755_v1 = vadd.f32 %v2500_v62, %v2335_v34  ;;  %v2756_v8 = vadd.f32 %v2500_v62, %v2336_v31  ;;  %v2345_v25 = vmul.f32 %v2105_v45, %v6621_v4  ;;  %v2346_v40 = vmul.f32 %v2105_v45, %v6622_v42  ;;  %v6637_v4 = vld [vmem:[#allocation94_spill] sm:$0xff]  ;;  %v6638_v42 = vld [vmem:[#allocation96_spill] sm:$0xff] }
 0x2fb   :  { %2875 = vst [vmem:[%s6256_s5 + $0xe0] sm:$0xff] %v2755_v1  ;;  %2876 = vst.msk [vmem:[%s6256_s5 + $0xe8] sm:$0xff] %vm746_vm1, %v2756_v8 }
 0x2fc   :  { %v2255_v33 = vpop.permute.xlu0 %2254  ;;  %v2650_v51 = vpop.permute.xlu1 %2649 }
 0x2fd   :  { %v2815_v32 = vadd.f32 %v2650_v51, %v2395_v56  ;;  %v2816_v50 = vadd.f32 %v2650_v51, %v2396_v14  ;;  %v2405_v16 = vmul.f32 %v2255_v33, %v6623_v26  ;;  %v2406_v38 = vmul.f32 %v2255_v33, %v6624_v54  ;;  %v6639_v26 = vld [vmem:[#allocation95_spill] sm:$0xff]  ;;  %v6640_v54 = vld [vmem:[#allocation97_spill] sm:$0xff] }
 0x2ff   :  { %2935 = vst [vmem:[%s6256_s5 + $0x2c0] sm:$0xff] %v2815_v32  ;;  %2936 = vst.msk [vmem:[%s6256_s5 + $0x2c8] sm:$0xff] %vm746_vm1, %v2816_v50 }
 0x300   :  { %v2525_v59 = vpop.permute.xlu0 %2524  ;;  %v2090_v43 = vpop.permute.xlu1 %2089 }
 0x301   :  { %v2765_v46 = vadd.f32 %v2525_v59, %v2345_v25  ;;  %v2766_v55 = vadd.f32 %v2525_v59, %v2346_v40  ;;  %v2339_v28 = vmul.f32 %v2090_v43, %v6625_v27  ;;  %v2340_v57 = vmul.f32 %v2090_v43, %v6626_v47  ;;  %v6641_v27 = vld [vmem:[#allocation82_spill] sm:$0xff]  ;;  %v6642_v47 = vld [vmem:[#allocation84_spill] sm:$0xff] }
 0x303   :  { %2885 = vst [vmem:[%s6256_s5 + $0x130] sm:$0xff] %v2765_v46  ;;  %2886 = vst.msk [vmem:[%s6256_s5 + $0x138] sm:$0xff] %vm746_vm1, %v2766_v55 }
 0x304   :  { %v2675_v63 = vpop.permute.xlu0 %2674  ;;  %v2240_v48 = vpop.permute.xlu1 %2239 }
 0x305   :  { %v2825_v5 = vadd.f32 %v2675_v63, %v2405_v16  ;;  %v2826_v44 = vadd.f32 %v2675_v63, %v2406_v38  ;;  %v2399_v2 = vmul.f32 %v2240_v48, %v6627_v58  ;;  %v2400_v3 = vmul.f32 %v2240_v48, %v6628_v9  ;;  %v6643_v58 = vld [vmem:[#allocation83_spill] sm:$0xff]  ;;  %v6644_v9 = vld [vmem:[#allocation85_spill] sm:$0xff] }
 0x307   :  { %2945 = vst [vmem:[%s6256_s5 + $0x310] sm:$0xff] %v2825_v5  ;;  %2946 = vst.msk [vmem:[%s6256_s5 + $0x318] sm:$0xff] %vm746_vm1, %v2826_v44 }
 0x308   :  { %v2115_v61 = vpop.permute.xlu0 %2114  ;;  %v2510_v41 = vpop.permute.xlu1 %2509 }
 0x309   :  { %v2759_v7 = vadd.f32 %v2510_v41, %v2339_v28  ;;  %v2760_v10 = vadd.f32 %v2510_v41, %v2340_v57  ;;  %v2349_v37 = vmul.f32 %v2115_v61, %v6629_v60  ;;  %v2350_v17 = vmul.f32 %v2115_v61, %v6630_v18  ;;  %v6645_v60 = vld [vmem:[#allocation104_spill] sm:$0xff]  ;;  %v6646_v18 = vld [vmem:[#allocation107_spill] sm:$0xff] }
 0x30b   :  { %2879 = vst [vmem:[%s6256_s5 + $0x100] sm:$0xff] %v2759_v7  ;;  %2880 = vst.msk [vmem:[%s6256_s5 + $0x108] sm:$0xff] %vm746_vm1, %v2760_v10 }
 0x30c   :  { %v2265_v24 = vpop.permute.xlu0 %2264  ;;  %v2660_v49 = vpop.permute.xlu1 %2659 }
 0x30d   :  { %v2819_v19 = vadd.f32 %v2660_v49, %v2399_v2  ;;  %v2820_v39 = vadd.f32 %v2660_v49, %v2400_v3  ;;  %v2409_v11 = vmul.f32 %v2265_v24, %v6631_v15  ;;  %v2410_v35 = vmul.f32 %v2265_v24, %v6632_v12  ;;  %v6647_v15 = vld [vmem:[#allocation106_spill] sm:$0xff]  ;;  %v6648_v12 = vld [vmem:[#allocation108_spill] sm:$0xff] }
 0x30f   :  { %2939 = vst [vmem:[%s6256_s5 + $0x2e0] sm:$0xff] %v2819_v19  ;;  %2940 = vst.msk [vmem:[%s6256_s5 + $0x2e8] sm:$0xff] %vm746_vm1, %v2820_v39 }
 0x310   :  { %v2535_v20 = vpop.permute.xlu0 %2534  ;;  %v2100_v13 = vpop.permute.xlu1 %2099 }
 0x311   :  { %v2769_v6 = vadd.f32 %v2535_v20, %v2349_v37  ;;  %v2770_v52 = vadd.f32 %v2535_v20, %v2350_v17  ;;  %v2343_v34 = vmul.f32 %v2100_v13, %v6633_v0  ;;  %v2344_v31 = vmul.f32 %v2100_v13, %v6634_v22  ;;  %v6649_v0 = vld [vmem:[#allocation90_spill] sm:$0xff]  ;;  %v6650_v22 = vld [vmem:[#allocation92_spill] sm:$0xff] }
 0x313   :  { %2889 = vst [vmem:[%s6256_s5 + $0x150] sm:$0xff] %v2769_v6  ;;  %2890 = vst.msk [vmem:[%s6256_s5 + $0x158] sm:$0xff] %vm746_vm1, %v2770_v52 }
 0x314   :  { %v2685_v53 = vpop.permute.xlu0 %2684  ;;  %v2250_v30 = vpop.permute.xlu1 %2249 }
 0x315   :  { %v2829_v29 = vadd.f32 %v2685_v53, %v2409_v11  ;;  %v2830_v36 = vadd.f32 %v2685_v53, %v2410_v35  ;;  %v2403_v56 = vmul.f32 %v2250_v30, %v6635_v23  ;;  %v2404_v14 = vmul.f32 %v2250_v30, %v6636_v21  ;;  %v6651_v23 = vld [vmem:[#allocation91_spill] sm:$0xff]  ;;  %v6652_v21 = vld [vmem:[#allocation93_spill] sm:$0xff] }
 0x317   :  { %2949 = vst [vmem:[%s6256_s5 + $0x330] sm:$0xff] %v2829_v29  ;;  %2950 = vst.msk [vmem:[%s6256_s5 + $0x338] sm:$0xff] %vm746_vm1, %v2830_v36 }
 0x318   :  { %v2125_v45 = vpop.permute.xlu0 %2124  ;;  %v2520_v62 = vpop.permute.xlu1 %2519 }
 0x319   :  { %v2763_v1 = vadd.f32 %v2520_v62, %v2343_v34  ;;  %v2764_v8 = vadd.f32 %v2520_v62, %v2344_v31  ;;  %v2353_v25 = vmul.f32 %v2125_v45, %v6637_v4  ;;  %v2354_v40 = vmul.f32 %v2125_v45, %v6638_v42  ;;  %v6653_v4 = vld [vmem:[#allocation117_spill] sm:$0xff]  ;;  %v6654_v42 = vld [vmem:[#allocation119_spill] sm:$0xff] }
 0x31b   :  { %2883 = vst [vmem:[%s6256_s5 + $0x120] sm:$0xff] %v2763_v1  ;;  %2884 = vst.msk [vmem:[%s6256_s5 + $0x128] sm:$0xff] %vm746_vm1, %v2764_v8 }
 0x31c   :  { %v2275_v33 = vpop.permute.xlu0 %2274  ;;  %v2670_v51 = vpop.permute.xlu1 %2669 }
 0x31d   :  { %v2823_v32 = vadd.f32 %v2670_v51, %v2403_v56  ;;  %v2824_v50 = vadd.f32 %v2670_v51, %v2404_v14  ;;  %v2413_v16 = vmul.f32 %v2275_v33, %v6639_v26  ;;  %v2414_v38 = vmul.f32 %v2275_v33, %v6640_v54  ;;  %v6655_v26 = vld [vmem:[#allocation118_spill] sm:$0xff]  ;;  %v6656_v54 = vld [vmem:[#allocation120_spill] sm:$0xff] }
 0x31f   :  { %2943 = vst [vmem:[%s6256_s5 + $0x300] sm:$0xff] %v2823_v32  ;;  %2944 = vst.msk [vmem:[%s6256_s5 + $0x308] sm:$0xff] %vm746_vm1, %v2824_v50 }
 0x320   :  { %v2545_v59 = vpop.permute.xlu0 %2544  ;;  %v2110_v43 = vpop.permute.xlu1 %2109 }
 0x321   :  { %v2773_v46 = vadd.f32 %v2545_v59, %v2353_v25  ;;  %v2774_v55 = vadd.f32 %v2545_v59, %v2354_v40  ;;  %v2347_v28 = vmul.f32 %v2110_v43, %v6641_v27  ;;  %v2348_v57 = vmul.f32 %v2110_v43, %v6642_v47  ;;  %v6657_v27 = vld [vmem:[#allocation98_spill] sm:$0xff]  ;;  %v6658_v47 = vld [vmem:[#allocation100_spill] sm:$0xff] }
 0x323   :  { %2893 = vst [vmem:[%s6256_s5 + $0x170] sm:$0xff] %v2773_v46  ;;  %2894 = vst.msk [vmem:[%s6256_s5 + $0x178] sm:$0xff] %vm746_vm1, %v2774_v55 }
 0x324   :  { %v2695_v63 = vpop.permute.xlu0 %2694  ;;  %v2260_v48 = vpop.permute.xlu1 %2259 }
 0x325   :  { %v2833_v5 = vadd.f32 %v2695_v63, %v2413_v16  ;;  %v2834_v44 = vadd.f32 %v2695_v63, %v2414_v38  ;;  %v2407_v2 = vmul.f32 %v2260_v48, %v6643_v58  ;;  %v2408_v3 = vmul.f32 %v2260_v48, %v6644_v9  ;;  %v6659_v58 = vld [vmem:[#allocation99_spill] sm:$0xff]  ;;  %v6660_v9 = vld [vmem:[#allocation102_spill] sm:$0xff] }
 0x327   :  { %2953 = vst [vmem:[%s6256_s5 + $0x350] sm:$0xff] %v2833_v5  ;;  %2954 = vst.msk [vmem:[%s6256_s5 + $0x358] sm:$0xff] %vm746_vm1, %v2834_v44 }
 0x328   :  { %v2135_v61 = vpop.permute.xlu0 %2134  ;;  %v2530_v41 = vpop.permute.xlu1 %2529 }
 0x329   :  { %v2767_v7 = vadd.f32 %v2530_v41, %v2347_v28  ;;  %v2768_v10 = vadd.f32 %v2530_v41, %v2348_v57  ;;  %v2357_v37 = vmul.f32 %v2135_v61, %v6645_v60  ;;  %v2358_v17 = vmul.f32 %v2135_v61, %v6646_v18  ;;  %v6661_v60 = vld [vmem:[#allocation129_spill] sm:$0xff]  ;;  %v6662_v18 = vld [vmem:[#allocation131_spill] sm:$0xff] }
 0x32b   :  { %2887 = vst [vmem:[%s6256_s5 + $0x140] sm:$0xff] %v2767_v7  ;;  %2888 = vst.msk [vmem:[%s6256_s5 + $0x148] sm:$0xff] %vm746_vm1, %v2768_v10 }
 0x32c   :  { %v2285_v24 = vpop.permute.xlu0 %2284  ;;  %v2680_v49 = vpop.permute.xlu1 %2679 }
 0x32d   :  { %v2827_v19 = vadd.f32 %v2680_v49, %v2407_v2  ;;  %v2828_v39 = vadd.f32 %v2680_v49, %v2408_v3  ;;  %v2417_v11 = vmul.f32 %v2285_v24, %v6647_v15  ;;  %v2418_v35 = vmul.f32 %v2285_v24, %v6648_v12  ;;  %v6663_v15 = vld [vmem:[#allocation130_spill] sm:$0xff]  ;;  %v6664_v12 = vld [vmem:[#allocation132_spill] sm:$0xff] }
 0x32f   :  { %2947 = vst [vmem:[%s6256_s5 + $0x320] sm:$0xff] %v2827_v19  ;;  %2948 = vst.msk [vmem:[%s6256_s5 + $0x328] sm:$0xff] %vm746_vm1, %v2828_v39 }
 0x330   :  { %v2555_v20 = vpop.permute.xlu0 %2554  ;;  %v2120_v13 = vpop.permute.xlu1 %2119 }
 0x331   :  { %v2777_v6 = vadd.f32 %v2555_v20, %v2357_v37  ;;  %v2778_v52 = vadd.f32 %v2555_v20, %v2358_v17  ;;  %v2351_v34 = vmul.f32 %v2120_v13, %v6649_v0  ;;  %v2352_v31 = vmul.f32 %v2120_v13, %v6650_v22  ;;  %v6665_v0 = vld [vmem:[#allocation111_spill] sm:$0xff]  ;;  %v6666_v22 = vld [vmem:[#allocation113_spill] sm:$0xff] }
 0x333   :  { %2897 = vst [vmem:[%s6256_s5 + $0x190] sm:$0xff] %v2777_v6  ;;  %2898 = vst.msk [vmem:[%s6256_s5 + $0x198] sm:$0xff] %vm746_vm1, %v2778_v52 }
 0x334   :  { %v2705_v53 = vpop.permute.xlu0 %2704  ;;  %v2270_v30 = vpop.permute.xlu1 %2269 }
 0x335   :  { %v2837_v29 = vadd.f32 %v2705_v53, %v2417_v11  ;;  %v2838_v36 = vadd.f32 %v2705_v53, %v2418_v35  ;;  %v2411_v56 = vmul.f32 %v2270_v30, %v6651_v23  ;;  %v2412_v14 = vmul.f32 %v2270_v30, %v6652_v21 }
 0x337   :  { %2957 = vst [vmem:[%s6256_s5 + $0x370] sm:$0xff] %v2837_v29  ;;  %2958 = vst.msk [vmem:[%s6256_s5 + $0x378] sm:$0xff] %vm746_vm1, %v2838_v36 }
 0x338   :  { %v2145_v45 = vpop.permute.xlu0 %2144  ;;  %v2540_v62 = vpop.permute.xlu1 %2539 }
 0x339   :  { %v2771_v1 = vadd.f32 %v2540_v62, %v2351_v34  ;;  %v2772_v8 = vadd.f32 %v2540_v62, %v2352_v31  ;;  %v2361_v25 = vmul.f32 %v2145_v45, %v6653_v4  ;;  %v2362_v40 = vmul.f32 %v2145_v45, %v6654_v42  ;;  %v6669_v4 = vld [vmem:[#allocation123_spill] sm:$0xff]  ;;  %v6670_v42 = vld [vmem:[#allocation125_spill] sm:$0xff] }
 0x33b   :  { %2891 = vst [vmem:[%s6256_s5 + $0x160] sm:$0xff] %v2771_v1  ;;  %2892 = vst.msk [vmem:[%s6256_s5 + $0x168] sm:$0xff] %vm746_vm1, %v2772_v8  ;;  %v6667_v8 = vld [vmem:[#allocation112_spill] sm:$0xff] }
 0x33c   :  { %v2295_v33 = vpop.permute.xlu0 %2294  ;;  %v2690_v51 = vpop.permute.xlu1 %2689 }
 0x33d   :  { %v2831_v32 = vadd.f32 %v2690_v51, %v2411_v56  ;;  %v2832_v50 = vadd.f32 %v2690_v51, %v2412_v14  ;;  %v2421_v16 = vmul.f32 %v2295_v33, %v6655_v26  ;;  %v2422_v38 = vmul.f32 %v2295_v33, %v6656_v54  ;;  %v6668_v56 = vld [vmem:[#allocation115_spill] sm:$0xff] }
 0x33f   :  { %2951 = vst [vmem:[%s6256_s5 + $0x340] sm:$0xff] %v2831_v32  ;;  %2952 = vst.msk [vmem:[%s6256_s5 + $0x348] sm:$0xff] %vm746_vm1, %v2832_v50 }
 0x340   :  { %v2565_v59 = vpop.permute.xlu0 %2564  ;;  %v2130_v43 = vpop.permute.xlu1 %2129 }
 0x341   :  { %v2781_v46 = vadd.f32 %v2565_v59, %v2361_v25  ;;  %v2782_v55 = vadd.f32 %v2565_v59, %v2362_v40  ;;  %v2355_v28 = vmul.f32 %v2130_v43, %v6657_v27  ;;  %v2356_v57 = vmul.f32 %v2130_v43, %v6658_v47 }
 0x343   :  { %2901 = vst [vmem:[%s6256_s5 + $0x1b0] sm:$0xff] %v2781_v46  ;;  %2902 = vst.msk [vmem:[%s6256_s5 + $0x1b8] sm:$0xff] %vm746_vm1, %v2782_v55  ;;  %v6671_v55 = vld [vmem:[#allocation124_spill] sm:$0xff] }
 0x344   :  { %v2715_v63 = vpop.permute.xlu0 %2714  ;;  %v2280_v48 = vpop.permute.xlu1 %2279 }
 0x345   :  { %v2841_v5 = vadd.f32 %v2715_v63, %v2421_v16  ;;  %v2842_v44 = vadd.f32 %v2715_v63, %v2422_v38  ;;  %v2415_v2 = vmul.f32 %v2280_v48, %v6659_v58  ;;  %v2416_v3 = vmul.f32 %v2280_v48, %v6660_v9  ;;  %v6672_v16 = vld [vmem:[#allocation127_spill] sm:$0xff] }
 0x347   :  { %2961 = vst [vmem:[%s6256_s5 + $0x390] sm:$0xff] %v2841_v5  ;;  %2962 = vst.msk [vmem:[%s6256_s5 + $0x398] sm:$0xff] %vm746_vm1, %v2842_v44 }
 0x348   :  { %v2155_v61 = vpop.permute.xlu0 %2154  ;;  %v2550_v41 = vpop.permute.xlu1 %2549 }
 0x349   :  { %v2775_v7 = vadd.f32 %v2550_v41, %v2355_v28  ;;  %v2776_v10 = vadd.f32 %v2550_v41, %v2356_v57  ;;  %v2365_v37 = vmul.f32 %v2155_v61, %v6661_v60  ;;  %v2366_v17 = vmul.f32 %v2155_v61, %v6662_v18 }
 0x34b   :  { %2895 = vst [vmem:[%s6256_s5 + $0x180] sm:$0xff] %v2775_v7  ;;  %2896 = vst.msk [vmem:[%s6256_s5 + $0x188] sm:$0xff] %vm746_vm1, %v2776_v10 }
 0x34c   :  { %v2305_v24 = vpop.permute.xlu0 %2304  ;;  %v2700_v49 = vpop.permute.xlu1 %2699 }
 0x34d   :  { %v2835_v19 = vadd.f32 %v2700_v49, %v2415_v2  ;;  %v2836_v39 = vadd.f32 %v2700_v49, %v2416_v3  ;;  %v2425_v11 = vmul.f32 %v2305_v24, %v6663_v15  ;;  %v2426_v35 = vmul.f32 %v2305_v24, %v6664_v12 }
 0x34f   :  { %2955 = vst [vmem:[%s6256_s5 + $0x360] sm:$0xff] %v2835_v19  ;;  %2956 = vst.msk [vmem:[%s6256_s5 + $0x368] sm:$0xff] %vm746_vm1, %v2836_v39 }
 0x350   :  { %v2575_v20 = vpop.permute.xlu0 %2574  ;;  %v2140_v13 = vpop.permute.xlu1 %2139 }
 0x351   :  { %v2785_v6 = vadd.f32 %v2575_v20, %v2365_v37  ;;  %v2786_v52 = vadd.f32 %v2575_v20, %v2366_v17  ;;  %v2359_v34 = vmul.f32 %v2140_v13, %v6665_v0  ;;  %v2360_v31 = vmul.f32 %v2140_v13, %v6666_v22 }
 0x353   :  { %2905 = vst [vmem:[%s6256_s5 + $0x1d0] sm:$0xff] %v2785_v6  ;;  %2906 = vst.msk [vmem:[%s6256_s5 + $0x1d8] sm:$0xff] %vm746_vm1, %v2786_v52 }
 0x354   :  { %v2725_v53 = vpop.permute.xlu0 %2724  ;;  %v2290_v30 = vpop.permute.xlu1 %2289 }
 0x355   :  { %v2845_v29 = vadd.f32 %v2725_v53, %v2425_v11  ;;  %v2846_v36 = vadd.f32 %v2725_v53, %v2426_v35  ;;  %v2419_v23 = vmul.f32 %v2290_v30, %v6667_v8  ;;  %v2420_v21 = vmul.f32 %v2290_v30, %v6668_v56 }
 0x357   :  { %2965 = vst [vmem:[%s6256_s5 + $0x3b0] sm:$0xff] %v2845_v29  ;;  %2966 = vst.msk [vmem:[%s6256_s5 + $0x3b8] sm:$0xff] %vm746_vm1, %v2846_v36 }
 0x358   :  { %v2560_v45 = vpop.permute.xlu1 %2559 }
 0x359   :  { %v2779_v62 = vadd.f32 %v2560_v45, %v2359_v34  ;;  %v2780_v1 = vadd.f32 %v2560_v45, %v2360_v31 }
 0x35b   :  { %2899 = vst [vmem:[%s6256_s5 + $0x1a0] sm:$0xff] %v2779_v62  ;;  %2900 = vst.msk [vmem:[%s6256_s5 + $0x1a8] sm:$0xff] %vm746_vm1, %v2780_v1 }
 0x35c   :  { %v2710_v14 = vpop.permute.xlu1 %2709 }
 0x35d   :  { %v2839_v33 = vadd.f32 %v2710_v14, %v2419_v23  ;;  %v2840_v51 = vadd.f32 %v2710_v14, %v2420_v21 }
 0x35f   :  { %2959 = vst [vmem:[%s6256_s5 + $0x380] sm:$0xff] %v2839_v33  ;;  %2960 = vst.msk [vmem:[%s6256_s5 + $0x388] sm:$0xff] %vm746_vm1, %v2840_v51 }
 0x360   :  { %v2150_v32 = vpop.permute.xlu1 %2149 }
 0x361   :  { %v2363_v25 = vmul.f32 %v2150_v32, %v6669_v4  ;;  %v2364_v40 = vmul.f32 %v2150_v32, %v6670_v42 }
 0x364   :  { %v2300_v50 = vpop.permute.xlu1 %2299 }
 0x365   :  { %v2423_v26 = vmul.f32 %v2300_v50, %v6671_v55  ;;  %v2424_v54 = vmul.f32 %v2300_v50, %v6672_v16 }
 0x368   :  { %v2570_v59 = vpop.permute.xlu1 %2569 }
 0x369   :  { %v2783_v43 = vadd.f32 %v2570_v59, %v2363_v25  ;;  %v2784_v46 = vadd.f32 %v2570_v59, %v2364_v40 }
 0x36b   :  { %2903 = vst [vmem:[%s6256_s5 + $0x1c0] sm:$0xff] %v2783_v43  ;;  %2904 = vst.msk [vmem:[%s6256_s5 + $0x1c8] sm:$0xff] %vm746_vm1, %v2784_v46 }
 0x36c   :  { %v2720_v38 = vpop.permute.xlu1 %2719 }
 0x36d   :  { %v2843_v63 = vadd.f32 %v2720_v38, %v2423_v26  ;;  %v2844_v48 = vadd.f32 %v2720_v38, %v2424_v54 }
 0x36f   :  { %2963 = vst [vmem:[%s6256_s5 + $0x3a0] sm:$0xff] %v2843_v63  ;;  %2964 = vst.msk [vmem:[%s6256_s5 + $0x3a8] sm:$0xff] %vm746_vm1, %v2844_v48 }

</bundles_post_ra>
